<compile_context>
chip_gen: v7x
topology: tpu7x:2x2x1
jax: 0.10.0
libtpu: 0.0.40
codegen_flags: <defaults>
</compile_context>

<pallas_src>
import functools

import jax
import jax.numpy as jnp
import numpy as np
from jax.experimental import pallas as pl
from jax.experimental.pallas import tpu as pltpu


def _spatial_attention_kernel(wa_ref, wm_ref, x_ref, o_ref, sum_ref, max_ref,
                              *, K, W, C):
    """One (batch-block, channel-block) grid step.

    wa_ref, wm_ref: (1, K*K, HW) f32 pre-masked conv weights (avg / max path).
    x_ref:          (Bt, Ct, HW) input block.
    o_ref:          (Bt, 1, HW) output block (revisited across the channel axis).
    sum_ref/max_ref: (Bt, HW) f32 running channel-sum / channel-max.
    """
    c_step = pl.program_id(1)

    @pl.when(c_step == 0)
    def _init():
        sum_ref[...] = jnp.zeros_like(sum_ref)
        max_ref[...] = jnp.full(max_ref.shape, -jnp.inf, dtype=max_ref.dtype)

    x = x_ref[...].astype(jnp.float32)                 # (Bt, Ct, HW)
    sum_ref[...] = sum_ref[...] + jnp.sum(x, axis=1)
    max_ref[...] = jnp.maximum(max_ref[...], jnp.max(x, axis=1))

    @pl.when(c_step == pl.num_programs(1) - 1)
    def _finalize():
        P = K // 2
        avg = sum_ref[...] * jnp.float32(1.0 / C)      # (Bt, HW)
        mx = max_ref[...]                              # (Bt, HW)
        bt, hw = avg.shape

        wa = wa_ref[0]                                 # (K*K, HW)
        wm = wm_ref[0]

        # Zero-extend the flattened maps once so every conv tap is a static
        # lane-offset value slice (stays in vregs; no scratch round-trip).
        pad = P * W + P                                # max |flattened shift|
        zpad = jnp.zeros((bt, pad), jnp.float32)
        avg_p = jnp.concatenate([zpad, avg, zpad], axis=-1)
        mx_p = jnp.concatenate([zpad, mx, zpad], axis=-1)

        acc = jnp.zeros((bt, hw), jnp.float32)
        tap = 0
        for dy in range(-P, P + 1):
            for dx in range(-P, P + 1):
                s = pad + dy * W + dx
                a_sh = avg_p[:, s:s + hw]
                m_sh = mx_p[:, s:s + hw]
                acc = acc + wa[tap:tap + 1, :] * a_sh + wm[tap:tap + 1, :] * m_sh
                tap += 1

        o_ref[:, 0, :] = jax.nn.sigmoid(acc).astype(o_ref.dtype)


def _masked_conv_weights(weight, H, W, K):
    """Fold the conv weights and image-border validity masks together.

    Returns wa, wm of shape (1, K*K, H*W) f32 where
      wa[0, tap, i*W + j] = weight[0, 0, dy+P, dx+P] if (i+dy, j+dx) in-bounds
    (taps ordered dy outer, dx inner), else 0.  Likewise wm for the max path.
    """
    P = K // 2
    HW = H * W
    ii = np.arange(H).reshape(H, 1)
    jj = np.arange(W).reshape(1, W)
    masks = []
    for dy in range(-P, P + 1):
        for dx in range(-P, P + 1):
            valid = ((ii + dy >= 0) & (ii + dy < H) &
                     (jj + dx >= 0) & (jj + dx < W))
            masks.append(valid.reshape(HW))
    masks = jnp.asarray(np.stack(masks, axis=0).astype(np.float32))  # (K*K, HW)

    w = weight.reshape(2, K * K).astype(jnp.float32)                 # OIHW flatten
    wa = (w[0][:, None] * masks)[None]                               # (1, K*K, HW)
    wm = (w[1][:, None] * masks)[None]
    return wa, wm


def _pick_channel_block(C, HW):
    """Full C when small; otherwise a multiple-of-8 divisor (~2 MiB slab)."""
    target = max(8, (2 * 1024 * 1024) // (HW * 4))
    if C <= target or C % 8 != 0:
        return C
    ct = min(C, (target // 8) * 8)
    while ct > 8 and C % ct != 0:
        ct -= 8
    return ct if (ct >= 8 and C % ct == 0) else C


def _pick_batch_block(B, Ct, HW, budget_bytes):
    # Per batch element: double-buffered input block + scratch + output buffers.
    per_elem = (2 * Ct * HW + 6 * HW) * 4
    bt = max(1, budget_bytes // per_elem)
    bt = min(bt, B)
    if B >= 2:
        bt = min(bt, B // 2)      # keep >= 2 parallel steps for dual-TC chips
    while bt > 1 and B % bt != 0:
        bt -= 1
    return max(1, bt)


def spatial_attention(x, weight, *, kernel_size=7,
                      vmem_block_budget_bytes=12 * 1024 * 1024):
    """x: (B, C, H, W); weight: (1, 2, K, K) -> (B, 1, H, W) attention map."""
    assert kernel_size in (3, 7), "kernel size must be 3 or 7"
    B, C, H, W = x.shape
    K = kernel_size
    HW = H * W

    x_flat = x.reshape(B, C, HW)                      # lane-dense last axis
    wa, wm = _masked_conv_weights(weight, H, W, K)

    Ct = _pick_channel_block(C, HW)
    Bt = _pick_batch_block(B, Ct, HW, vmem_block_budget_bytes)
    grid = (B // Bt, C // Ct)

    kernel = functools.partial(_spatial_attention_kernel, K=K, W=W, C=C)

    out_flat = pl.pallas_call(
        kernel,
        out_shape=jax.ShapeDtypeStruct((B, 1, HW), x.dtype),
        grid=grid,
        in_specs=[
            pl.BlockSpec((1, K * K, HW), lambda b, c: (0, 0, 0)),
            pl.BlockSpec((1, K * K, HW), lambda b, c: (0, 0, 0)),
            pl.BlockSpec((Bt, Ct, HW), lambda b, c: (b, c, 0)),
        ],
        out_specs=pl.BlockSpec((Bt, 1, HW), lambda b, c: (b, 0, 0)),
        scratch_shapes=[
            pltpu.VMEM((Bt, HW), jnp.float32),   # running channel sum
            pltpu.VMEM((Bt, HW), jnp.float32),   # running channel max
        ],
        compiler_params=pltpu.CompilerParams(
            dimension_semantics=("parallel", "arbitrary"),
            vmem_limit_bytes=32 * 1024 * 1024,
        ),
    )(wa, wm, x_flat)

    return out_flat.reshape(B, 1, H, W)


def _reference(x, weight):
    # Pure-JAX reference matching the PyTorch module.
    avg_out = jnp.mean(x, axis=1, keepdims=True)
    max_out = jnp.max(x, axis=1, keepdims=True)
    feat = jnp.concatenate([avg_out, max_out], axis=1)          # (B, 2, H, W)
    P = weight.shape[-1] // 2
    y = jax.lax.conv_general_dilated(
        feat, weight, window_strides=(1, 1), padding=[(P, P), (P, P)],
        dimension_numbers=("NCHW", "OIHW", "NCHW"))
    return jax.nn.sigmoid(y)


if __name__ == "__main__":
    key = jax.random.PRNGKey(0)
    kx, kw = jax.random.split(key)

    B, C, H, W = 2, 4, 16, 16
    kernel_size = 7

    x = jax.random.normal(kx, (B, C, H, W), dtype=jnp.float32)
    # Deterministic synthetic conv1 weight (nn.Conv2d(2, 1, 7, bias=False)).
    weight = 0.1 * jax.random.normal(kw, (1, 2, kernel_size, kernel_size),
                                     dtype=jnp.float32)

    out = spatial_attention(x, weight, kernel_size=kernel_size)
    out = jax.block_until_ready(out)

    ref = _reference(x, weight)
    assert out.shape == (B, 1, H, W), out.shape
    np.testing.assert_allclose(np.asarray(out), np.asarray(ref),
                               rtol=1e-5, atol=1e-5)
    print("KERNEL_OK")
</pallas_src>

<mosaic_0001>
module attributes {stable_mosaic.version = 11 : i64} {
  func.func @_spatial_attention_kernel(%arg0: i32, %arg1: i32, %arg2: memref<1x49x256xf32, #tpu.memory_space<vmem>>, %arg3: memref<1x49x256xf32, #tpu.memory_space<vmem>>, %arg4: memref<1x4x256xf32, #tpu.memory_space<vmem>>, %arg5: memref<1x1x256xf32, #tpu.memory_space<vmem>>, %arg6: memref<1x256xf32, #tpu.memory_space<vmem>>, %arg7: memref<1x256xf32, #tpu.memory_space<vmem>>) attributes {dimension_semantics = [#tpu.dimension_semantics<parallel>, #tpu.dimension_semantics<arbitrary>], iteration_bounds = array<i64: 2, 1>, scalar_prefetch = 0 : i64, scratch_operands = 2 : i64, tpu.core_type = #tpu.core_type<tc>, window_params = [{pipeline_mode = #tpu.pipeline_mode<synchronous>, transform_indices = @transform_0, window_bounds = array<i64: 1, 49, 256>}, {pipeline_mode = #tpu.pipeline_mode<synchronous>, transform_indices = @transform_1, window_bounds = array<i64: 1, 49, 256>}, {transform_indices = @transform_2, window_bounds = array<i64: 1, 4, 256>}, {transform_indices = @transform_3, window_bounds = array<i64: 1, 1, 256>}]} {
    %c0_i32 = arith.constant 0 : i32
    %0 = arith.cmpi eq, %arg1, %c0_i32 : i32
    %1 = arith.extui %0 : i1 to i32
    %c0_i32_0 = arith.constant 0 : i32
    %2 = arith.cmpi ne, %1, %c0_i32_0 : i32
    scf.if %2 {
      %cst_14 = arith.constant 0.000000e+00 : f32
      %15 = vector.broadcast %cst_14 : f32 to vector<1x256xf32>
      %c0_15 = arith.constant 0 : index
      %c0_16 = arith.constant 0 : index
      %16 = vector.load %arg6[%c0_15, %c0_16] : memref<1x256xf32, #tpu.memory_space<vmem>>, vector<1x256xf32>
      tpu.vector_store %arg6[%c0_15, %c0_16], %15 {strides = array<i32>} : memref<1x256xf32, #tpu.memory_space<vmem>>, vector<1x256xf32>,
      %cst_17 = arith.constant 0xFF800000 : f32
      %17 = vector.broadcast %cst_17 : f32 to vector<1x256xf32>
      %c0_18 = arith.constant 0 : index
      %c0_19 = arith.constant 0 : index
      %18 = vector.load %arg7[%c0_18, %c0_19] : memref<1x256xf32, #tpu.memory_space<vmem>>, vector<1x256xf32>
      tpu.vector_store %arg7[%c0_18, %c0_19], %17 {strides = array<i32>} : memref<1x256xf32, #tpu.memory_space<vmem>>, vector<1x256xf32>,
    } else {
    }
    %c0 = arith.constant 0 : index
    %c0_1 = arith.constant 0 : index
    %c0_2 = arith.constant 0 : index
    %3 = vector.load %arg4[%c0, %c0_1, %c0_2] : memref<1x4x256xf32, #tpu.memory_space<vmem>>, vector<1x4x256xf32>
    %c0_3 = arith.constant 0 : index
    %c0_4 = arith.constant 0 : index
    %4 = vector.load %arg6[%c0_3, %c0_4] : memref<1x256xf32, #tpu.memory_space<vmem>>, vector<1x256xf32>
    %cst = arith.constant dense<0.000000e+00> : vector<1x256xf32>
    %5 = vector.multi_reduction <add>, %3, %cst [1] : vector<1x4x256xf32> to vector<1x256xf32>
    %6 = arith.addf %4, %5 : vector<1x256xf32>
    %c0_5 = arith.constant 0 : index
    %c0_6 = arith.constant 0 : index
    %7 = vector.load %arg6[%c0_5, %c0_6] : memref<1x256xf32, #tpu.memory_space<vmem>>, vector<1x256xf32>
    tpu.vector_store %arg6[%c0_5, %c0_6], %6 {strides = array<i32>} : memref<1x256xf32, #tpu.memory_space<vmem>>, vector<1x256xf32>,
    %c0_7 = arith.constant 0 : index
    %c0_8 = arith.constant 0 : index
    %8 = vector.load %arg7[%c0_7, %c0_8] : memref<1x256xf32, #tpu.memory_space<vmem>>, vector<1x256xf32>
    %cst_9 = arith.constant dense<0xFF800000> : vector<1x256xf32>
    %9 = vector.multi_reduction <maximumf>, %3, %cst_9 [1] : vector<1x4x256xf32> to vector<1x256xf32>
    %10 = arith.maximumf %8, %9 : vector<1x256xf32>
    %c0_10 = arith.constant 0 : index
    %c0_11 = arith.constant 0 : index
    %11 = vector.load %arg7[%c0_10, %c0_11] : memref<1x256xf32, #tpu.memory_space<vmem>>, vector<1x256xf32>
    tpu.vector_store %arg7[%c0_10, %c0_11], %10 {strides = array<i32>} : memref<1x256xf32, #tpu.memory_space<vmem>>, vector<1x256xf32>,
    %c0_i32_12 = arith.constant 0 : i32
    %12 = arith.cmpi eq, %arg1, %c0_i32_12 : i32
    %13 = arith.extui %12 : i1 to i32
    %c0_i32_13 = arith.constant 0 : i32
    %14 = arith.cmpi ne, %13, %c0_i32_13 : i32
    scf.if %14 {
      %c0_14 = arith.constant 0 : index
      %c0_15 = arith.constant 0 : index
      %15 = vector.load %arg6[%c0_14, %c0_15] : memref<1x256xf32, #tpu.memory_space<vmem>>, vector<1x256xf32>
      %cst_16 = arith.constant 2.500000e-01 : f32
      %16 = vector.broadcast %cst_16 : f32 to vector<1x256xf32>
      %17 = arith.mulf %15, %16 : vector<1x256xf32>
      %c0_17 = arith.constant 0 : index
      %c0_18 = arith.constant 0 : index
      %18 = vector.load %arg7[%c0_17, %c0_18] : memref<1x256xf32, #tpu.memory_space<vmem>>, vector<1x256xf32>
      %c0_19 = arith.constant 0 : index
      %c0_20 = arith.constant 0 : index
      %c0_21 = arith.constant 0 : index
      %19 = vector.load %arg2[%c0_19, %c0_20, %c0_21] : memref<1x49x256xf32, #tpu.memory_space<vmem>>, vector<1x49x256xf32>
      %20 = vector.shape_cast %19 : vector<1x49x256xf32> to vector<49x256xf32>
      %c0_22 = arith.constant 0 : index
      %c0_23 = arith.constant 0 : index
      %c0_24 = arith.constant 0 : index
      %21 = vector.load %arg3[%c0_22, %c0_23, %c0_24] : memref<1x49x256xf32, #tpu.memory_space<vmem>>, vector<1x49x256xf32>
      %22 = vector.shape_cast %21 : vector<1x49x256xf32> to vector<49x256xf32>
      %cst_25 = arith.constant 0.000000e+00 : f32
      %23 = vector.broadcast %cst_25 : f32 to vector<1x51xf32>
      %24 = tpu.concatenate %23, %17, %23 in 1 : vector<1x51xf32>, vector<1x256xf32>, vector<1x51xf32> -> vector<1x358xf32>
      %25 = tpu.concatenate %23, %18, %23 in 1 : vector<1x51xf32>, vector<1x256xf32>, vector<1x51xf32> -> vector<1x358xf32>
      %cst_26 = arith.constant 0.000000e+00 : f32
      %26 = vector.broadcast %cst_26 : f32 to vector<1x256xf32>
      %27 = vector.extract_strided_slice %24 {offsets = [0, 0], sizes = [1, 256], strides = [1, 1]} : vector<1x358xf32> to vector<1x256xf32>
      %28 = vector.extract_strided_slice %25 {offsets = [0, 0], sizes = [1, 256], strides = [1, 1]} : vector<1x358xf32> to vector<1x256xf32>
      %29 = vector.extract_strided_slice %20 {offsets = [0, 0], sizes = [1, 256], strides = [1, 1]} : vector<49x256xf32> to vector<1x256xf32>
      %30 = arith.mulf %29, %27 : vector<1x256xf32>
      %31 = arith.addf %26, %30 : vector<1x256xf32>
      %32 = vector.extract_strided_slice %22 {offsets = [0, 0], sizes = [1, 256], strides = [1, 1]} : vector<49x256xf32> to vector<1x256xf32>
      %33 = arith.mulf %32, %28 : vector<1x256xf32>
      %34 = arith.addf %31, %33 : vector<1x256xf32>
      %35 = vector.extract_strided_slice %24 {offsets = [0, 1], sizes = [1, 256], strides = [1, 1]} : vector<1x358xf32> to vector<1x256xf32>
      %36 = vector.extract_strided_slice %25 {offsets = [0, 1], sizes = [1, 256], strides = [1, 1]} : vector<1x358xf32> to vector<1x256xf32>
      %37 = vector.extract_strided_slice %20 {offsets = [1, 0], sizes = [1, 256], strides = [1, 1]} : vector<49x256xf32> to vector<1x256xf32>
      %38 = arith.mulf %37, %35 : vector<1x256xf32>
      %39 = arith.addf %34, %38 : vector<1x256xf32>
      %40 = vector.extract_strided_slice %22 {offsets = [1, 0], sizes = [1, 256], strides = [1, 1]} : vector<49x256xf32> to vector<1x256xf32>
      %41 = arith.mulf %40, %36 : vector<1x256xf32>
      %42 = arith.addf %39, %41 : vector<1x256xf32>
      %43 = vector.extract_strided_slice %24 {offsets = [0, 2], sizes = [1, 256], strides = [1, 1]} : vector<1x358xf32> to vector<1x256xf32>
      %44 = vector.extract_strided_slice %25 {offsets = [0, 2], sizes = [1, 256], strides = [1, 1]} : vector<1x358xf32> to vector<1x256xf32>
      %45 = vector.extract_strided_slice %20 {offsets = [2, 0], sizes = [1, 256], strides = [1, 1]} : vector<49x256xf32> to vector<1x256xf32>
      %46 = arith.mulf %45, %43 : vector<1x256xf32>
      %47 = arith.addf %42, %46 : vector<1x256xf32>
      %48 = vector.extract_strided_slice %22 {offsets = [2, 0], sizes = [1, 256], strides = [1, 1]} : vector<49x256xf32> to vector<1x256xf32>
      %49 = arith.mulf %48, %44 : vector<1x256xf32>
      %50 = arith.addf %47, %49 : vector<1x256xf32>
      %51 = vector.extract_strided_slice %24 {offsets = [0, 3], sizes = [1, 256], strides = [1, 1]} : vector<1x358xf32> to vector<1x256xf32>
      %52 = vector.extract_strided_slice %25 {offsets = [0, 3], sizes = [1, 256], strides = [1, 1]} : vector<1x358xf32> to vector<1x256xf32>
      %53 = vector.extract_strided_slice %20 {offsets = [3, 0], sizes = [1, 256], strides = [1, 1]} : vector<49x256xf32> to vector<1x256xf32>
      %54 = arith.mulf %53, %51 : vector<1x256xf32>
      %55 = arith.addf %50, %54 : vector<1x256xf32>
      %56 = vector.extract_strided_slice %22 {offsets = [3, 0], sizes = [1, 256], strides = [1, 1]} : vector<49x256xf32> to vector<1x256xf32>
      %57 = arith.mulf %56, %52 : vector<1x256xf32>
      %58 = arith.addf %55, %57 : vector<1x256xf32>
      %59 = vector.extract_strided_slice %24 {offsets = [0, 4], sizes = [1, 256], strides = [1, 1]} : vector<1x358xf32> to vector<1x256xf32>
      %60 = vector.extract_strided_slice %25 {offsets = [0, 4], sizes = [1, 256], strides = [1, 1]} : vector<1x358xf32> to vector<1x256xf32>
      %61 = vector.extract_strided_slice %20 {offsets = [4, 0], sizes = [1, 256], strides = [1, 1]} : vector<49x256xf32> to vector<1x256xf32>
      %62 = arith.mulf %61, %59 : vector<1x256xf32>
      %63 = arith.addf %58, %62 : vector<1x256xf32>
      %64 = vector.extract_strided_slice %22 {offsets = [4, 0], sizes = [1, 256], strides = [1, 1]} : vector<49x256xf32> to vector<1x256xf32>
      %65 = arith.mulf %64, %60 : vector<1x256xf32>
      %66 = arith.addf %63, %65 : vector<1x256xf32>
      %67 = vector.extract_strided_slice %24 {offsets = [0, 5], sizes = [1, 256], strides = [1, 1]} : vector<1x358xf32> to vector<1x256xf32>
      %68 = vector.extract_strided_slice %25 {offsets = [0, 5], sizes = [1, 256], strides = [1, 1]} : vector<1x358xf32> to vector<1x256xf32>
      %69 = vector.extract_strided_slice %20 {offsets = [5, 0], sizes = [1, 256], strides = [1, 1]} : vector<49x256xf32> to vector<1x256xf32>
      %70 = arith.mulf %69, %67 : vector<1x256xf32>
      %71 = arith.addf %66, %70 : vector<1x256xf32>
      %72 = vector.extract_strided_slice %22 {offsets = [5, 0], sizes = [1, 256], strides = [1, 1]} : vector<49x256xf32> to vector<1x256xf32>
      %73 = arith.mulf %72, %68 : vector<1x256xf32>
      %74 = arith.addf %71, %73 : vector<1x256xf32>
      %75 = vector.extract_strided_slice %24 {offsets = [0, 6], sizes = [1, 256], strides = [1, 1]} : vector<1x358xf32> to vector<1x256xf32>
      %76 = vector.extract_strided_slice %25 {offsets = [0, 6], sizes = [1, 256], strides = [1, 1]} : vector<1x358xf32> to vector<1x256xf32>
      %77 = vector.extract_strided_slice %20 {offsets = [6, 0], sizes = [1, 256], strides = [1, 1]} : vector<49x256xf32> to vector<1x256xf32>
      %78 = arith.mulf %77, %75 : vector<1x256xf32>
      %79 = arith.addf %74, %78 : vector<1x256xf32>
      %80 = vector.extract_strided_slice %22 {offsets = [6, 0], sizes = [1, 256], strides = [1, 1]} : vector<49x256xf32> to vector<1x256xf32>
      %81 = arith.mulf %80, %76 : vector<1x256xf32>
      %82 = arith.addf %79, %81 : vector<1x256xf32>
      %83 = vector.extract_strided_slice %24 {offsets = [0, 16], sizes = [1, 256], strides = [1, 1]} : vector<1x358xf32> to vector<1x256xf32>
      %84 = vector.extract_strided_slice %25 {offsets = [0, 16], sizes = [1, 256], strides = [1, 1]} : vector<1x358xf32> to vector<1x256xf32>
      %85 = vector.extract_strided_slice %20 {offsets = [7, 0], sizes = [1, 256], strides = [1, 1]} : vector<49x256xf32> to vector<1x256xf32>
      %86 = arith.mulf %85, %83 : vector<1x256xf32>
      %87 = arith.addf %82, %86 : vector<1x256xf32>
      %88 = vector.extract_strided_slice %22 {offsets = [7, 0], sizes = [1, 256], strides = [1, 1]} : vector<49x256xf32> to vector<1x256xf32>
      %89 = arith.mulf %88, %84 : vector<1x256xf32>
      %90 = arith.addf %87, %89 : vector<1x256xf32>
      %91 = vector.extract_strided_slice %24 {offsets = [0, 17], sizes = [1, 256], strides = [1, 1]} : vector<1x358xf32> to vector<1x256xf32>
      %92 = vector.extract_strided_slice %25 {offsets = [0, 17], sizes = [1, 256], strides = [1, 1]} : vector<1x358xf32> to vector<1x256xf32>
      %93 = vector.extract_strided_slice %20 {offsets = [8, 0], sizes = [1, 256], strides = [1, 1]} : vector<49x256xf32> to vector<1x256xf32>
      %94 = arith.mulf %93, %91 : vector<1x256xf32>
      %95 = arith.addf %90, %94 : vector<1x256xf32>
      %96 = vector.extract_strided_slice %22 {offsets = [8, 0], sizes = [1, 256], strides = [1, 1]} : vector<49x256xf32> to vector<1x256xf32>
      %97 = arith.mulf %96, %92 : vector<1x256xf32>
      %98 = arith.addf %95, %97 : vector<1x256xf32>
      %99 = vector.extract_strided_slice %24 {offsets = [0, 18], sizes = [1, 256], strides = [1, 1]} : vector<1x358xf32> to vector<1x256xf32>
      %100 = vector.extract_strided_slice %25 {offsets = [0, 18], sizes = [1, 256], strides = [1, 1]} : vector<1x358xf32> to vector<1x256xf32>
      %101 = vector.extract_strided_slice %20 {offsets = [9, 0], sizes = [1, 256], strides = [1, 1]} : vector<49x256xf32> to vector<1x256xf32>
      %102 = arith.mulf %101, %99 : vector<1x256xf32>
      %103 = arith.addf %98, %102 : vector<1x256xf32>
      %104 = vector.extract_strided_slice %22 {offsets = [9, 0], sizes = [1, 256], strides = [1, 1]} : vector<49x256xf32> to vector<1x256xf32>
      %105 = arith.mulf %104, %100 : vector<1x256xf32>
      %106 = arith.addf %103, %105 : vector<1x256xf32>
      %107 = vector.extract_strided_slice %24 {offsets = [0, 19], sizes = [1, 256], strides = [1, 1]} : vector<1x358xf32> to vector<1x256xf32>
      %108 = vector.extract_strided_slice %25 {offsets = [0, 19], sizes = [1, 256], strides = [1, 1]} : vector<1x358xf32> to vector<1x256xf32>
      %109 = vector.extract_strided_slice %20 {offsets = [10, 0], sizes = [1, 256], strides = [1, 1]} : vector<49x256xf32> to vector<1x256xf32>
      %110 = arith.mulf %109, %107 : vector<1x256xf32>
      %111 = arith.addf %106, %110 : vector<1x256xf32>
      %112 = vector.extract_strided_slice %22 {offsets = [10, 0], sizes = [1, 256], strides = [1, 1]} : vector<49x256xf32> to vector<1x256xf32>
      %113 = arith.mulf %112, %108 : vector<1x256xf32>
      %114 = arith.addf %111, %113 : vector<1x256xf32>
      %115 = vector.extract_strided_slice %24 {offsets = [0, 20], sizes = [1, 256], strides = [1, 1]} : vector<1x358xf32> to vector<1x256xf32>
      %116 = vector.extract_strided_slice %25 {offsets = [0, 20], sizes = [1, 256], strides = [1, 1]} : vector<1x358xf32> to vector<1x256xf32>
      %117 = vector.extract_strided_slice %20 {offsets = [11, 0], sizes = [1, 256], strides = [1, 1]} : vector<49x256xf32> to vector<1x256xf32>
      %118 = arith.mulf %117, %115 : vector<1x256xf32>
      %119 = arith.addf %114, %118 : vector<1x256xf32>
      %120 = vector.extract_strided_slice %22 {offsets = [11, 0], sizes = [1, 256], strides = [1, 1]} : vector<49x256xf32> to vector<1x256xf32>
      %121 = arith.mulf %120, %116 : vector<1x256xf32>
      %122 = arith.addf %119, %121 : vector<1x256xf32>
      %123 = vector.extract_strided_slice %24 {offsets = [0, 21], sizes = [1, 256], strides = [1, 1]} : vector<1x358xf32> to vector<1x256xf32>
      %124 = vector.extract_strided_slice %25 {offsets = [0, 21], sizes = [1, 256], strides = [1, 1]} : vector<1x358xf32> to vector<1x256xf32>
      %125 = vector.extract_strided_slice %20 {offsets = [12, 0], sizes = [1, 256], strides = [1, 1]} : vector<49x256xf32> to vector<1x256xf32>
      %126 = arith.mulf %125, %123 : vector<1x256xf32>
      %127 = arith.addf %122, %126 : vector<1x256xf32>
      %128 = vector.extract_strided_slice %22 {offsets = [12, 0], sizes = [1, 256], strides = [1, 1]} : vector<49x256xf32> to vector<1x256xf32>
      %129 = arith.mulf %128, %124 : vector<1x256xf32>
      %130 = arith.addf %127, %129 : vector<1x256xf32>
      %131 = vector.extract_strided_slice %24 {offsets = [0, 22], sizes = [1, 256], strides = [1, 1]} : vector<1x358xf32> to vector<1x256xf32>
      %132 = vector.extract_strided_slice %25 {offsets = [0, 22], sizes = [1, 256], strides = [1, 1]} : vector<1x358xf32> to vector<1x256xf32>
      %133 = vector.extract_strided_slice %20 {offsets = [13, 0], sizes = [1, 256], strides = [1, 1]} : vector<49x256xf32> to vector<1x256xf32>
      %134 = arith.mulf %133, %131 : vector<1x256xf32>
      %135 = arith.addf %130, %134 : vector<1x256xf32>
      %136 = vector.extract_strided_slice %22 {offsets = [13, 0], sizes = [1, 256], strides = [1, 1]} : vector<49x256xf32> to vector<1x256xf32>
      %137 = arith.mulf %136, %132 : vector<1x256xf32>
      %138 = arith.addf %135, %137 : vector<1x256xf32>
      %139 = vector.extract_strided_slice %24 {offsets = [0, 32], sizes = [1, 256], strides = [1, 1]} : vector<1x358xf32> to vector<1x256xf32>
      %140 = vector.extract_strided_slice %25 {offsets = [0, 32], sizes = [1, 256], strides = [1, 1]} : vector<1x358xf32> to vector<1x256xf32>
      %141 = vector.extract_strided_slice %20 {offsets = [14, 0], sizes = [1, 256], strides = [1, 1]} : vector<49x256xf32> to vector<1x256xf32>
      %142 = arith.mulf %141, %139 : vector<1x256xf32>
      %143 = arith.addf %138, %142 : vector<1x256xf32>
      %144 = vector.extract_strided_slice %22 {offsets = [14, 0], sizes = [1, 256], strides = [1, 1]} : vector<49x256xf32> to vector<1x256xf32>
      %145 = arith.mulf %144, %140 : vector<1x256xf32>
      %146 = arith.addf %143, %145 : vector<1x256xf32>
      %147 = vector.extract_strided_slice %24 {offsets = [0, 33], sizes = [1, 256], strides = [1, 1]} : vector<1x358xf32> to vector<1x256xf32>
      %148 = vector.extract_strided_slice %25 {offsets = [0, 33], sizes = [1, 256], strides = [1, 1]} : vector<1x358xf32> to vector<1x256xf32>
      %149 = vector.extract_strided_slice %20 {offsets = [15, 0], sizes = [1, 256], strides = [1, 1]} : vector<49x256xf32> to vector<1x256xf32>
      %150 = arith.mulf %149, %147 : vector<1x256xf32>
      %151 = arith.addf %146, %150 : vector<1x256xf32>
      %152 = vector.extract_strided_slice %22 {offsets = [15, 0], sizes = [1, 256], strides = [1, 1]} : vector<49x256xf32> to vector<1x256xf32>
      %153 = arith.mulf %152, %148 : vector<1x256xf32>
      %154 = arith.addf %151, %153 : vector<1x256xf32>
      %155 = vector.extract_strided_slice %24 {offsets = [0, 34], sizes = [1, 256], strides = [1, 1]} : vector<1x358xf32> to vector<1x256xf32>
      %156 = vector.extract_strided_slice %25 {offsets = [0, 34], sizes = [1, 256], strides = [1, 1]} : vector<1x358xf32> to vector<1x256xf32>
      %157 = vector.extract_strided_slice %20 {offsets = [16, 0], sizes = [1, 256], strides = [1, 1]} : vector<49x256xf32> to vector<1x256xf32>
      %158 = arith.mulf %157, %155 : vector<1x256xf32>
      %159 = arith.addf %154, %158 : vector<1x256xf32>
      %160 = vector.extract_strided_slice %22 {offsets = [16, 0], sizes = [1, 256], strides = [1, 1]} : vector<49x256xf32> to vector<1x256xf32>
      %161 = arith.mulf %160, %156 : vector<1x256xf32>
      %162 = arith.addf %159, %161 : vector<1x256xf32>
      %163 = vector.extract_strided_slice %24 {offsets = [0, 35], sizes = [1, 256], strides = [1, 1]} : vector<1x358xf32> to vector<1x256xf32>
      %164 = vector.extract_strided_slice %25 {offsets = [0, 35], sizes = [1, 256], strides = [1, 1]} : vector<1x358xf32> to vector<1x256xf32>
      %165 = vector.extract_strided_slice %20 {offsets = [17, 0], sizes = [1, 256], strides = [1, 1]} : vector<49x256xf32> to vector<1x256xf32>
      %166 = arith.mulf %165, %163 : vector<1x256xf32>
      %167 = arith.addf %162, %166 : vector<1x256xf32>
      %168 = vector.extract_strided_slice %22 {offsets = [17, 0], sizes = [1, 256], strides = [1, 1]} : vector<49x256xf32> to vector<1x256xf32>
      %169 = arith.mulf %168, %164 : vector<1x256xf32>
      %170 = arith.addf %167, %169 : vector<1x256xf32>
      %171 = vector.extract_strided_slice %24 {offsets = [0, 36], sizes = [1, 256], strides = [1, 1]} : vector<1x358xf32> to vector<1x256xf32>
      %172 = vector.extract_strided_slice %25 {offsets = [0, 36], sizes = [1, 256], strides = [1, 1]} : vector<1x358xf32> to vector<1x256xf32>
      %173 = vector.extract_strided_slice %20 {offsets = [18, 0], sizes = [1, 256], strides = [1, 1]} : vector<49x256xf32> to vector<1x256xf32>
      %174 = arith.mulf %173, %171 : vector<1x256xf32>
      %175 = arith.addf %170, %174 : vector<1x256xf32>
      %176 = vector.extract_strided_slice %22 {offsets = [18, 0], sizes = [1, 256], strides = [1, 1]} : vector<49x256xf32> to vector<1x256xf32>
      %177 = arith.mulf %176, %172 : vector<1x256xf32>
      %178 = arith.addf %175, %177 : vector<1x256xf32>
      %179 = vector.extract_strided_slice %24 {offsets = [0, 37], sizes = [1, 256], strides = [1, 1]} : vector<1x358xf32> to vector<1x256xf32>
      %180 = vector.extract_strided_slice %25 {offsets = [0, 37], sizes = [1, 256], strides = [1, 1]} : vector<1x358xf32> to vector<1x256xf32>
      %181 = vector.extract_strided_slice %20 {offsets = [19, 0], sizes = [1, 256], strides = [1, 1]} : vector<49x256xf32> to vector<1x256xf32>
      %182 = arith.mulf %181, %179 : vector<1x256xf32>
      %183 = arith.addf %178, %182 : vector<1x256xf32>
      %184 = vector.extract_strided_slice %22 {offsets = [19, 0], sizes = [1, 256], strides = [1, 1]} : vector<49x256xf32> to vector<1x256xf32>
      %185 = arith.mulf %184, %180 : vector<1x256xf32>
      %186 = arith.addf %183, %185 : vector<1x256xf32>
      %187 = vector.extract_strided_slice %24 {offsets = [0, 38], sizes = [1, 256], strides = [1, 1]} : vector<1x358xf32> to vector<1x256xf32>
      %188 = vector.extract_strided_slice %25 {offsets = [0, 38], sizes = [1, 256], strides = [1, 1]} : vector<1x358xf32> to vector<1x256xf32>
      %189 = vector.extract_strided_slice %20 {offsets = [20, 0], sizes = [1, 256], strides = [1, 1]} : vector<49x256xf32> to vector<1x256xf32>
      %190 = arith.mulf %189, %187 : vector<1x256xf32>
      %191 = arith.addf %186, %190 : vector<1x256xf32>
      %192 = vector.extract_strided_slice %22 {offsets = [20, 0], sizes = [1, 256], strides = [1, 1]} : vector<49x256xf32> to vector<1x256xf32>
      %193 = arith.mulf %192, %188 : vector<1x256xf32>
      %194 = arith.addf %191, %193 : vector<1x256xf32>
      %195 = vector.extract_strided_slice %24 {offsets = [0, 48], sizes = [1, 256], strides = [1, 1]} : vector<1x358xf32> to vector<1x256xf32>
      %196 = vector.extract_strided_slice %25 {offsets = [0, 48], sizes = [1, 256], strides = [1, 1]} : vector<1x358xf32> to vector<1x256xf32>
      %197 = vector.extract_strided_slice %20 {offsets = [21, 0], sizes = [1, 256], strides = [1, 1]} : vector<49x256xf32> to vector<1x256xf32>
      %198 = arith.mulf %197, %195 : vector<1x256xf32>
      %199 = arith.addf %194, %198 : vector<1x256xf32>
      %200 = vector.extract_strided_slice %22 {offsets = [21, 0], sizes = [1, 256], strides = [1, 1]} : vector<49x256xf32> to vector<1x256xf32>
      %201 = arith.mulf %200, %196 : vector<1x256xf32>
      %202 = arith.addf %199, %201 : vector<1x256xf32>
      %203 = vector.extract_strided_slice %24 {offsets = [0, 49], sizes = [1, 256], strides = [1, 1]} : vector<1x358xf32> to vector<1x256xf32>
      %204 = vector.extract_strided_slice %25 {offsets = [0, 49], sizes = [1, 256], strides = [1, 1]} : vector<1x358xf32> to vector<1x256xf32>
      %205 = vector.extract_strided_slice %20 {offsets = [22, 0], sizes = [1, 256], strides = [1, 1]} : vector<49x256xf32> to vector<1x256xf32>
      %206 = arith.mulf %205, %203 : vector<1x256xf32>
      %207 = arith.addf %202, %206 : vector<1x256xf32>
      %208 = vector.extract_strided_slice %22 {offsets = [22, 0], sizes = [1, 256], strides = [1, 1]} : vector<49x256xf32> to vector<1x256xf32>
      %209 = arith.mulf %208, %204 : vector<1x256xf32>
      %210 = arith.addf %207, %209 : vector<1x256xf32>
      %211 = vector.extract_strided_slice %24 {offsets = [0, 50], sizes = [1, 256], strides = [1, 1]} : vector<1x358xf32> to vector<1x256xf32>
      %212 = vector.extract_strided_slice %25 {offsets = [0, 50], sizes = [1, 256], strides = [1, 1]} : vector<1x358xf32> to vector<1x256xf32>
      %213 = vector.extract_strided_slice %20 {offsets = [23, 0], sizes = [1, 256], strides = [1, 1]} : vector<49x256xf32> to vector<1x256xf32>
      %214 = arith.mulf %213, %211 : vector<1x256xf32>
      %215 = arith.addf %210, %214 : vector<1x256xf32>
      %216 = vector.extract_strided_slice %22 {offsets = [23, 0], sizes = [1, 256], strides = [1, 1]} : vector<49x256xf32> to vector<1x256xf32>
      %217 = arith.mulf %216, %212 : vector<1x256xf32>
      %218 = arith.addf %215, %217 : vector<1x256xf32>
      %219 = vector.extract_strided_slice %24 {offsets = [0, 51], sizes = [1, 256], strides = [1, 1]} : vector<1x358xf32> to vector<1x256xf32>
      %220 = vector.extract_strided_slice %25 {offsets = [0, 51], sizes = [1, 256], strides = [1, 1]} : vector<1x358xf32> to vector<1x256xf32>
      %221 = vector.extract_strided_slice %20 {offsets = [24, 0], sizes = [1, 256], strides = [1, 1]} : vector<49x256xf32> to vector<1x256xf32>
      %222 = arith.mulf %221, %219 : vector<1x256xf32>
      %223 = arith.addf %218, %222 : vector<1x256xf32>
      %224 = vector.extract_strided_slice %22 {offsets = [24, 0], sizes = [1, 256], strides = [1, 1]} : vector<49x256xf32> to vector<1x256xf32>
      %225 = arith.mulf %224, %220 : vector<1x256xf32>
      %226 = arith.addf %223, %225 : vector<1x256xf32>
      %227 = vector.extract_strided_slice %24 {offsets = [0, 52], sizes = [1, 256], strides = [1, 1]} : vector<1x358xf32> to vector<1x256xf32>
      %228 = vector.extract_strided_slice %25 {offsets = [0, 52], sizes = [1, 256], strides = [1, 1]} : vector<1x358xf32> to vector<1x256xf32>
      %229 = vector.extract_strided_slice %20 {offsets = [25, 0], sizes = [1, 256], strides = [1, 1]} : vector<49x256xf32> to vector<1x256xf32>
      %230 = arith.mulf %229, %227 : vector<1x256xf32>
      %231 = arith.addf %226, %230 : vector<1x256xf32>
      %232 = vector.extract_strided_slice %22 {offsets = [25, 0], sizes = [1, 256], strides = [1, 1]} : vector<49x256xf32> to vector<1x256xf32>
      %233 = arith.mulf %232, %228 : vector<1x256xf32>
      %234 = arith.addf %231, %233 : vector<1x256xf32>
      %235 = vector.extract_strided_slice %24 {offsets = [0, 53], sizes = [1, 256], strides = [1, 1]} : vector<1x358xf32> to vector<1x256xf32>
      %236 = vector.extract_strided_slice %25 {offsets = [0, 53], sizes = [1, 256], strides = [1, 1]} : vector<1x358xf32> to vector<1x256xf32>
      %237 = vector.extract_strided_slice %20 {offsets = [26, 0], sizes = [1, 256], strides = [1, 1]} : vector<49x256xf32> to vector<1x256xf32>
      %238 = arith.mulf %237, %235 : vector<1x256xf32>
      %239 = arith.addf %234, %238 : vector<1x256xf32>
      %240 = vector.extract_strided_slice %22 {offsets = [26, 0], sizes = [1, 256], strides = [1, 1]} : vector<49x256xf32> to vector<1x256xf32>
      %241 = arith.mulf %240, %236 : vector<1x256xf32>
      %242 = arith.addf %239, %241 : vector<1x256xf32>
      %243 = vector.extract_strided_slice %24 {offsets = [0, 54], sizes = [1, 256], strides = [1, 1]} : vector<1x358xf32> to vector<1x256xf32>
      %244 = vector.extract_strided_slice %25 {offsets = [0, 54], sizes = [1, 256], strides = [1, 1]} : vector<1x358xf32> to vector<1x256xf32>
      %245 = vector.extract_strided_slice %20 {offsets = [27, 0], sizes = [1, 256], strides = [1, 1]} : vector<49x256xf32> to vector<1x256xf32>
      %246 = arith.mulf %245, %243 : vector<1x256xf32>
      %247 = arith.addf %242, %246 : vector<1x256xf32>
      %248 = vector.extract_strided_slice %22 {offsets = [27, 0], sizes = [1, 256], strides = [1, 1]} : vector<49x256xf32> to vector<1x256xf32>
      %249 = arith.mulf %248, %244 : vector<1x256xf32>
      %250 = arith.addf %247, %249 : vector<1x256xf32>
      %251 = vector.extract_strided_slice %24 {offsets = [0, 64], sizes = [1, 256], strides = [1, 1]} : vector<1x358xf32> to vector<1x256xf32>
      %252 = vector.extract_strided_slice %25 {offsets = [0, 64], sizes = [1, 256], strides = [1, 1]} : vector<1x358xf32> to vector<1x256xf32>
      %253 = vector.extract_strided_slice %20 {offsets = [28, 0], sizes = [1, 256], strides = [1, 1]} : vector<49x256xf32> to vector<1x256xf32>
      %254 = arith.mulf %253, %251 : vector<1x256xf32>
      %255 = arith.addf %250, %254 : vector<1x256xf32>
      %256 = vector.extract_strided_slice %22 {offsets = [28, 0], sizes = [1, 256], strides = [1, 1]} : vector<49x256xf32> to vector<1x256xf32>
      %257 = arith.mulf %256, %252 : vector<1x256xf32>
      %258 = arith.addf %255, %257 : vector<1x256xf32>
      %259 = vector.extract_strided_slice %24 {offsets = [0, 65], sizes = [1, 256], strides = [1, 1]} : vector<1x358xf32> to vector<1x256xf32>
      %260 = vector.extract_strided_slice %25 {offsets = [0, 65], sizes = [1, 256], strides = [1, 1]} : vector<1x358xf32> to vector<1x256xf32>
      %261 = vector.extract_strided_slice %20 {offsets = [29, 0], sizes = [1, 256], strides = [1, 1]} : vector<49x256xf32> to vector<1x256xf32>
      %262 = arith.mulf %261, %259 : vector<1x256xf32>
      %263 = arith.addf %258, %262 : vector<1x256xf32>
      %264 = vector.extract_strided_slice %22 {offsets = [29, 0], sizes = [1, 256], strides = [1, 1]} : vector<49x256xf32> to vector<1x256xf32>
      %265 = arith.mulf %264, %260 : vector<1x256xf32>
      %266 = arith.addf %263, %265 : vector<1x256xf32>
      %267 = vector.extract_strided_slice %24 {offsets = [0, 66], sizes = [1, 256], strides = [1, 1]} : vector<1x358xf32> to vector<1x256xf32>
      %268 = vector.extract_strided_slice %25 {offsets = [0, 66], sizes = [1, 256], strides = [1, 1]} : vector<1x358xf32> to vector<1x256xf32>
      %269 = vector.extract_strided_slice %20 {offsets = [30, 0], sizes = [1, 256], strides = [1, 1]} : vector<49x256xf32> to vector<1x256xf32>
      %270 = arith.mulf %269, %267 : vector<1x256xf32>
      %271 = arith.addf %266, %270 : vector<1x256xf32>
      %272 = vector.extract_strided_slice %22 {offsets = [30, 0], sizes = [1, 256], strides = [1, 1]} : vector<49x256xf32> to vector<1x256xf32>
      %273 = arith.mulf %272, %268 : vector<1x256xf32>
      %274 = arith.addf %271, %273 : vector<1x256xf32>
      %275 = vector.extract_strided_slice %24 {offsets = [0, 67], sizes = [1, 256], strides = [1, 1]} : vector<1x358xf32> to vector<1x256xf32>
      %276 = vector.extract_strided_slice %25 {offsets = [0, 67], sizes = [1, 256], strides = [1, 1]} : vector<1x358xf32> to vector<1x256xf32>
      %277 = vector.extract_strided_slice %20 {offsets = [31, 0], sizes = [1, 256], strides = [1, 1]} : vector<49x256xf32> to vector<1x256xf32>
      %278 = arith.mulf %277, %275 : vector<1x256xf32>
      %279 = arith.addf %274, %278 : vector<1x256xf32>
      %280 = vector.extract_strided_slice %22 {offsets = [31, 0], sizes = [1, 256], strides = [1, 1]} : vector<49x256xf32> to vector<1x256xf32>
      %281 = arith.mulf %280, %276 : vector<1x256xf32>
      %282 = arith.addf %279, %281 : vector<1x256xf32>
      %283 = vector.extract_strided_slice %24 {offsets = [0, 68], sizes = [1, 256], strides = [1, 1]} : vector<1x358xf32> to vector<1x256xf32>
      %284 = vector.extract_strided_slice %25 {offsets = [0, 68], sizes = [1, 256], strides = [1, 1]} : vector<1x358xf32> to vector<1x256xf32>
      %285 = vector.extract_strided_slice %20 {offsets = [32, 0], sizes = [1, 256], strides = [1, 1]} : vector<49x256xf32> to vector<1x256xf32>
      %286 = arith.mulf %285, %283 : vector<1x256xf32>
      %287 = arith.addf %282, %286 : vector<1x256xf32>
      %288 = vector.extract_strided_slice %22 {offsets = [32, 0], sizes = [1, 256], strides = [1, 1]} : vector<49x256xf32> to vector<1x256xf32>
      %289 = arith.mulf %288, %284 : vector<1x256xf32>
      %290 = arith.addf %287, %289 : vector<1x256xf32>
      %291 = vector.extract_strided_slice %24 {offsets = [0, 69], sizes = [1, 256], strides = [1, 1]} : vector<1x358xf32> to vector<1x256xf32>
      %292 = vector.extract_strided_slice %25 {offsets = [0, 69], sizes = [1, 256], strides = [1, 1]} : vector<1x358xf32> to vector<1x256xf32>
      %293 = vector.extract_strided_slice %20 {offsets = [33, 0], sizes = [1, 256], strides = [1, 1]} : vector<49x256xf32> to vector<1x256xf32>
      %294 = arith.mulf %293, %291 : vector<1x256xf32>
      %295 = arith.addf %290, %294 : vector<1x256xf32>
      %296 = vector.extract_strided_slice %22 {offsets = [33, 0], sizes = [1, 256], strides = [1, 1]} : vector<49x256xf32> to vector<1x256xf32>
      %297 = arith.mulf %296, %292 : vector<1x256xf32>
      %298 = arith.addf %295, %297 : vector<1x256xf32>
      %299 = vector.extract_strided_slice %24 {offsets = [0, 70], sizes = [1, 256], strides = [1, 1]} : vector<1x358xf32> to vector<1x256xf32>
      %300 = vector.extract_strided_slice %25 {offsets = [0, 70], sizes = [1, 256], strides = [1, 1]} : vector<1x358xf32> to vector<1x256xf32>
      %301 = vector.extract_strided_slice %20 {offsets = [34, 0], sizes = [1, 256], strides = [1, 1]} : vector<49x256xf32> to vector<1x256xf32>
      %302 = arith.mulf %301, %299 : vector<1x256xf32>
      %303 = arith.addf %298, %302 : vector<1x256xf32>
      %304 = vector.extract_strided_slice %22 {offsets = [34, 0], sizes = [1, 256], strides = [1, 1]} : vector<49x256xf32> to vector<1x256xf32>
      %305 = arith.mulf %304, %300 : vector<1x256xf32>
      %306 = arith.addf %303, %305 : vector<1x256xf32>
      %307 = vector.extract_strided_slice %24 {offsets = [0, 80], sizes = [1, 256], strides = [1, 1]} : vector<1x358xf32> to vector<1x256xf32>
      %308 = vector.extract_strided_slice %25 {offsets = [0, 80], sizes = [1, 256], strides = [1, 1]} : vector<1x358xf32> to vector<1x256xf32>
      %309 = vector.extract_strided_slice %20 {offsets = [35, 0], sizes = [1, 256], strides = [1, 1]} : vector<49x256xf32> to vector<1x256xf32>
      %310 = arith.mulf %309, %307 : vector<1x256xf32>
      %311 = arith.addf %306, %310 : vector<1x256xf32>
      %312 = vector.extract_strided_slice %22 {offsets = [35, 0], sizes = [1, 256], strides = [1, 1]} : vector<49x256xf32> to vector<1x256xf32>
      %313 = arith.mulf %312, %308 : vector<1x256xf32>
      %314 = arith.addf %311, %313 : vector<1x256xf32>
      %315 = vector.extract_strided_slice %24 {offsets = [0, 81], sizes = [1, 256], strides = [1, 1]} : vector<1x358xf32> to vector<1x256xf32>
      %316 = vector.extract_strided_slice %25 {offsets = [0, 81], sizes = [1, 256], strides = [1, 1]} : vector<1x358xf32> to vector<1x256xf32>
      %317 = vector.extract_strided_slice %20 {offsets = [36, 0], sizes = [1, 256], strides = [1, 1]} : vector<49x256xf32> to vector<1x256xf32>
      %318 = arith.mulf %317, %315 : vector<1x256xf32>
      %319 = arith.addf %314, %318 : vector<1x256xf32>
      %320 = vector.extract_strided_slice %22 {offsets = [36, 0], sizes = [1, 256], strides = [1, 1]} : vector<49x256xf32> to vector<1x256xf32>
      %321 = arith.mulf %320, %316 : vector<1x256xf32>
      %322 = arith.addf %319, %321 : vector<1x256xf32>
      %323 = vector.extract_strided_slice %24 {offsets = [0, 82], sizes = [1, 256], strides = [1, 1]} : vector<1x358xf32> to vector<1x256xf32>
      %324 = vector.extract_strided_slice %25 {offsets = [0, 82], sizes = [1, 256], strides = [1, 1]} : vector<1x358xf32> to vector<1x256xf32>
      %325 = vector.extract_strided_slice %20 {offsets = [37, 0], sizes = [1, 256], strides = [1, 1]} : vector<49x256xf32> to vector<1x256xf32>
      %326 = arith.mulf %325, %323 : vector<1x256xf32>
      %327 = arith.addf %322, %326 : vector<1x256xf32>
      %328 = vector.extract_strided_slice %22 {offsets = [37, 0], sizes = [1, 256], strides = [1, 1]} : vector<49x256xf32> to vector<1x256xf32>
      %329 = arith.mulf %328, %324 : vector<1x256xf32>
      %330 = arith.addf %327, %329 : vector<1x256xf32>
      %331 = vector.extract_strided_slice %24 {offsets = [0, 83], sizes = [1, 256], strides = [1, 1]} : vector<1x358xf32> to vector<1x256xf32>
      %332 = vector.extract_strided_slice %25 {offsets = [0, 83], sizes = [1, 256], strides = [1, 1]} : vector<1x358xf32> to vector<1x256xf32>
      %333 = vector.extract_strided_slice %20 {offsets = [38, 0], sizes = [1, 256], strides = [1, 1]} : vector<49x256xf32> to vector<1x256xf32>
      %334 = arith.mulf %333, %331 : vector<1x256xf32>
      %335 = arith.addf %330, %334 : vector<1x256xf32>
      %336 = vector.extract_strided_slice %22 {offsets = [38, 0], sizes = [1, 256], strides = [1, 1]} : vector<49x256xf32> to vector<1x256xf32>
      %337 = arith.mulf %336, %332 : vector<1x256xf32>
      %338 = arith.addf %335, %337 : vector<1x256xf32>
      %339 = vector.extract_strided_slice %24 {offsets = [0, 84], sizes = [1, 256], strides = [1, 1]} : vector<1x358xf32> to vector<1x256xf32>
      %340 = vector.extract_strided_slice %25 {offsets = [0, 84], sizes = [1, 256], strides = [1, 1]} : vector<1x358xf32> to vector<1x256xf32>
      %341 = vector.extract_strided_slice %20 {offsets = [39, 0], sizes = [1, 256], strides = [1, 1]} : vector<49x256xf32> to vector<1x256xf32>
      %342 = arith.mulf %341, %339 : vector<1x256xf32>
      %343 = arith.addf %338, %342 : vector<1x256xf32>
      %344 = vector.extract_strided_slice %22 {offsets = [39, 0], sizes = [1, 256], strides = [1, 1]} : vector<49x256xf32> to vector<1x256xf32>
      %345 = arith.mulf %344, %340 : vector<1x256xf32>
      %346 = arith.addf %343, %345 : vector<1x256xf32>
      %347 = vector.extract_strided_slice %24 {offsets = [0, 85], sizes = [1, 256], strides = [1, 1]} : vector<1x358xf32> to vector<1x256xf32>
      %348 = vector.extract_strided_slice %25 {offsets = [0, 85], sizes = [1, 256], strides = [1, 1]} : vector<1x358xf32> to vector<1x256xf32>
      %349 = vector.extract_strided_slice %20 {offsets = [40, 0], sizes = [1, 256], strides = [1, 1]} : vector<49x256xf32> to vector<1x256xf32>
      %350 = arith.mulf %349, %347 : vector<1x256xf32>
      %351 = arith.addf %346, %350 : vector<1x256xf32>
      %352 = vector.extract_strided_slice %22 {offsets = [40, 0], sizes = [1, 256], strides = [1, 1]} : vector<49x256xf32> to vector<1x256xf32>
      %353 = arith.mulf %352, %348 : vector<1x256xf32>
      %354 = arith.addf %351, %353 : vector<1x256xf32>
      %355 = vector.extract_strided_slice %24 {offsets = [0, 86], sizes = [1, 256], strides = [1, 1]} : vector<1x358xf32> to vector<1x256xf32>
      %356 = vector.extract_strided_slice %25 {offsets = [0, 86], sizes = [1, 256], strides = [1, 1]} : vector<1x358xf32> to vector<1x256xf32>
      %357 = vector.extract_strided_slice %20 {offsets = [41, 0], sizes = [1, 256], strides = [1, 1]} : vector<49x256xf32> to vector<1x256xf32>
      %358 = arith.mulf %357, %355 : vector<1x256xf32>
      %359 = arith.addf %354, %358 : vector<1x256xf32>
      %360 = vector.extract_strided_slice %22 {offsets = [41, 0], sizes = [1, 256], strides = [1, 1]} : vector<49x256xf32> to vector<1x256xf32>
      %361 = arith.mulf %360, %356 : vector<1x256xf32>
      %362 = arith.addf %359, %361 : vector<1x256xf32>
      %363 = vector.extract_strided_slice %24 {offsets = [0, 96], sizes = [1, 256], strides = [1, 1]} : vector<1x358xf32> to vector<1x256xf32>
      %364 = vector.extract_strided_slice %25 {offsets = [0, 96], sizes = [1, 256], strides = [1, 1]} : vector<1x358xf32> to vector<1x256xf32>
      %365 = vector.extract_strided_slice %20 {offsets = [42, 0], sizes = [1, 256], strides = [1, 1]} : vector<49x256xf32> to vector<1x256xf32>
      %366 = arith.mulf %365, %363 : vector<1x256xf32>
      %367 = arith.addf %362, %366 : vector<1x256xf32>
      %368 = vector.extract_strided_slice %22 {offsets = [42, 0], sizes = [1, 256], strides = [1, 1]} : vector<49x256xf32> to vector<1x256xf32>
      %369 = arith.mulf %368, %364 : vector<1x256xf32>
      %370 = arith.addf %367, %369 : vector<1x256xf32>
      %371 = vector.extract_strided_slice %24 {offsets = [0, 97], sizes = [1, 256], strides = [1, 1]} : vector<1x358xf32> to vector<1x256xf32>
      %372 = vector.extract_strided_slice %25 {offsets = [0, 97], sizes = [1, 256], strides = [1, 1]} : vector<1x358xf32> to vector<1x256xf32>
      %373 = vector.extract_strided_slice %20 {offsets = [43, 0], sizes = [1, 256], strides = [1, 1]} : vector<49x256xf32> to vector<1x256xf32>
      %374 = arith.mulf %373, %371 : vector<1x256xf32>
      %375 = arith.addf %370, %374 : vector<1x256xf32>
      %376 = vector.extract_strided_slice %22 {offsets = [43, 0], sizes = [1, 256], strides = [1, 1]} : vector<49x256xf32> to vector<1x256xf32>
      %377 = arith.mulf %376, %372 : vector<1x256xf32>
      %378 = arith.addf %375, %377 : vector<1x256xf32>
      %379 = vector.extract_strided_slice %24 {offsets = [0, 98], sizes = [1, 256], strides = [1, 1]} : vector<1x358xf32> to vector<1x256xf32>
      %380 = vector.extract_strided_slice %25 {offsets = [0, 98], sizes = [1, 256], strides = [1, 1]} : vector<1x358xf32> to vector<1x256xf32>
      %381 = vector.extract_strided_slice %20 {offsets = [44, 0], sizes = [1, 256], strides = [1, 1]} : vector<49x256xf32> to vector<1x256xf32>
      %382 = arith.mulf %381, %379 : vector<1x256xf32>
      %383 = arith.addf %378, %382 : vector<1x256xf32>
      %384 = vector.extract_strided_slice %22 {offsets = [44, 0], sizes = [1, 256], strides = [1, 1]} : vector<49x256xf32> to vector<1x256xf32>
      %385 = arith.mulf %384, %380 : vector<1x256xf32>
      %386 = arith.addf %383, %385 : vector<1x256xf32>
      %387 = vector.extract_strided_slice %24 {offsets = [0, 99], sizes = [1, 256], strides = [1, 1]} : vector<1x358xf32> to vector<1x256xf32>
      %388 = vector.extract_strided_slice %25 {offsets = [0, 99], sizes = [1, 256], strides = [1, 1]} : vector<1x358xf32> to vector<1x256xf32>
      %389 = vector.extract_strided_slice %20 {offsets = [45, 0], sizes = [1, 256], strides = [1, 1]} : vector<49x256xf32> to vector<1x256xf32>
      %390 = arith.mulf %389, %387 : vector<1x256xf32>
      %391 = arith.addf %386, %390 : vector<1x256xf32>
      %392 = vector.extract_strided_slice %22 {offsets = [45, 0], sizes = [1, 256], strides = [1, 1]} : vector<49x256xf32> to vector<1x256xf32>
      %393 = arith.mulf %392, %388 : vector<1x256xf32>
      %394 = arith.addf %391, %393 : vector<1x256xf32>
      %395 = vector.extract_strided_slice %24 {offsets = [0, 100], sizes = [1, 256], strides = [1, 1]} : vector<1x358xf32> to vector<1x256xf32>
      %396 = vector.extract_strided_slice %25 {offsets = [0, 100], sizes = [1, 256], strides = [1, 1]} : vector<1x358xf32> to vector<1x256xf32>
      %397 = vector.extract_strided_slice %20 {offsets = [46, 0], sizes = [1, 256], strides = [1, 1]} : vector<49x256xf32> to vector<1x256xf32>
      %398 = arith.mulf %397, %395 : vector<1x256xf32>
      %399 = arith.addf %394, %398 : vector<1x256xf32>
      %400 = vector.extract_strided_slice %22 {offsets = [46, 0], sizes = [1, 256], strides = [1, 1]} : vector<49x256xf32> to vector<1x256xf32>
      %401 = arith.mulf %400, %396 : vector<1x256xf32>
      %402 = arith.addf %399, %401 : vector<1x256xf32>
      %403 = vector.extract_strided_slice %24 {offsets = [0, 101], sizes = [1, 256], strides = [1, 1]} : vector<1x358xf32> to vector<1x256xf32>
      %404 = vector.extract_strided_slice %25 {offsets = [0, 101], sizes = [1, 256], strides = [1, 1]} : vector<1x358xf32> to vector<1x256xf32>
      %405 = vector.extract_strided_slice %20 {offsets = [47, 0], sizes = [1, 256], strides = [1, 1]} : vector<49x256xf32> to vector<1x256xf32>
      %406 = arith.mulf %405, %403 : vector<1x256xf32>
      %407 = arith.addf %402, %406 : vector<1x256xf32>
      %408 = vector.extract_strided_slice %22 {offsets = [47, 0], sizes = [1, 256], strides = [1, 1]} : vector<49x256xf32> to vector<1x256xf32>
      %409 = arith.mulf %408, %404 : vector<1x256xf32>
      %410 = arith.addf %407, %409 : vector<1x256xf32>
      %411 = vector.extract_strided_slice %24 {offsets = [0, 102], sizes = [1, 256], strides = [1, 1]} : vector<1x358xf32> to vector<1x256xf32>
      %412 = vector.extract_strided_slice %25 {offsets = [0, 102], sizes = [1, 256], strides = [1, 1]} : vector<1x358xf32> to vector<1x256xf32>
      %413 = vector.extract_strided_slice %20 {offsets = [48, 0], sizes = [1, 256], strides = [1, 1]} : vector<49x256xf32> to vector<1x256xf32>
      %414 = arith.mulf %413, %411 : vector<1x256xf32>
      %415 = arith.addf %410, %414 : vector<1x256xf32>
      %416 = vector.extract_strided_slice %22 {offsets = [48, 0], sizes = [1, 256], strides = [1, 1]} : vector<49x256xf32> to vector<1x256xf32>
      %417 = arith.mulf %416, %412 : vector<1x256xf32>
      %418 = arith.addf %415, %417 : vector<1x256xf32>
      %419 = arith.negf %418 : vector<1x256xf32>
      %420 = math.exp %419 : vector<1x256xf32>
      %cst_27 = arith.constant 1.000000e+00 : f32
      %421 = vector.broadcast %cst_27 : f32 to vector<1x256xf32>
      %422 = arith.addf %421, %420 : vector<1x256xf32>
      %423 = arith.divf %421, %422 : vector<1x256xf32>
      %c0_28 = arith.constant 0 : index
      %c0_29 = arith.constant 0 : index
      %c0_30 = arith.constant 0 : index
      %424 = vector.load %arg5[%c0_28, %c0_29, %c0_30] : memref<1x1x256xf32, #tpu.memory_space<vmem>>, vector<1x1x256xf32>
      %425 = vector.shape_cast %424 : vector<1x1x256xf32> to vector<1x256xf32>
      %426 = vector.shape_cast %423 : vector<1x256xf32> to vector<1x1x256xf32>
      tpu.vector_store %arg5[%c0_28, %c0_29, %c0_30], %426 {strides = array<i32>} : memref<1x1x256xf32, #tpu.memory_space<vmem>>, vector<1x1x256xf32>,
    } else {
    }
    return
  }
  func.func @transform_0(%arg0: i32, %arg1: i32) -> (i32, i32, i32) {
    %c0_i32 = arith.constant 0 : i32
    %c0_i32_0 = arith.constant 0 : i32
    %c0_i32_1 = arith.constant 0 : i32
    %c0_i32_2 = arith.constant 0 : i32
    return %c0_i32, %c0_i32_0, %c0_i32_1 : i32, i32, i32
  }
  func.func @transform_1(%arg0: i32, %arg1: i32) -> (i32, i32, i32) {
    %c0_i32 = arith.constant 0 : i32
    %c0_i32_0 = arith.constant 0 : i32
    %c0_i32_1 = arith.constant 0 : i32
    %c0_i32_2 = arith.constant 0 : i32
    return %c0_i32, %c0_i32_0, %c0_i32_1 : i32, i32, i32
  }
  func.func @transform_2(%arg0: i32, %arg1: i32) -> (i32, i32, i32) {
    %c0_i32 = arith.constant 0 : i32
    %c0_i32_0 = arith.constant 0 : i32
    return %arg0, %arg1, %c0_i32 : i32, i32, i32
  }
  func.func @transform_3(%arg0: i32, %arg1: i32) -> (i32, i32, i32) {
    %c0_i32 = arith.constant 0 : i32
    %c0_i32_0 = arith.constant 0 : i32
    %c0_i32_1 = arith.constant 0 : i32
    return %arg0, %c0_i32, %c0_i32_0 : i32, i32, i32
  }
}

</mosaic_0001>

<bundles_post_ra>
// kernel: tpu_custom_call.1
= control target key start
LH: loop header
LB: loop body
LE: loop exit
PB: predicated region body
PF: predicated region fallthrough
CT: control target
= control target key end

     0   :  { %8 = vsyncpa [#allocation5], 0  ;;  %s4651_s0 = inlined_call_operand.vmem [shape: f32[1,49,256], index: 0, kind: input, shape index: {}]   ;;  %s4652_s1 = inlined_call_operand.vmem [shape: f32[1,49,256], index: 1, kind: input, shape index: {}]   ;;  %s4653_s2 = inlined_call_operand.vmem [shape: f32[2,4,256], index: 2, kind: input, shape index: {}]   ;;  %s4654_s3 = inlined_call_operand.hbm [shape: f32[2,1,256], index: 3, kind: output, shape index: {}]  }
   0x1   :  { %10 = vsyncpa [#allocation5 + $0x1], 0  ;;  %s2715_s12 = smov 0   ;;  %s2717_s13 = smov 0  }
   0x2   :  { %s2719_s14 = smov 0   ;;  %s2721_s15 = smov 0  }
   0x3   :  { %s2723_s16 = smov 0   ;;  %s2725_s17 = smov 0  }
   0x4 LB: > { %s2429_s18 = sadd.s32 4294967295, %s2640_s17   ;;  %s2430_s19 = sadd.s32 4294967294, %s2640_s17   ;;  %s2640_s17 = sphi %s2725_s17, %s16_s17   ;;  %s2636_s16 = sphi %s2723_s16, %s5125_s16   ;;  %s2632_s15 = sphi %s2721_s15, %s5124_s15   ;;  %s2628_s14 = sphi %s2719_s14, %s5123_s14   ;;  %s2624_s13 = sphi %s2717_s13, %s5122_s13   ;;  %s2620_s12 = sphi %s2715_s12, %s5121_s12  }
   0x5   : > { %s28_s20 = sadd.s32 1, %s2636_s16  ;;  %s105_s21 = sadd.s32 1, %s2628_s14 }
   0x6   : > { %p30_p0 = scmp.ge.s32.totalorder %s28_s20, 2  ;;  %p115_p1 = scmp.ne.s32.totalorder %s2628_s14, %s2624_s13 }
   0x7   : > { %p116_p2 = scmp.eq.s32.totalorder %s2429_s18, 1  ;;  %p121_p3 = scmp.ne.s32.totalorder %s2624_s13, %s2620_s12 }
   0x8   : > { %s5127_s20 = smov (%p30_p0, %s28_s20), 0  ;;  %p122_p5 = scmp.eq.s32.totalorder %s2430_s19, 1 }
   0x9   : > { %p2755_p4 = por %p116_p2, %p115_p1  ;;  %s102_s23 = ssub.s32 %s2636_s16, %s5127_s20 }
   0xa   : > { %p2433_p6 = scmp.ge.s32.totalorder %s2640_s17, 1  ;;  %p103_p7 = scmp.eq.s32.totalorder %s102_s23, 0 }
   0xb   : > { %p2762_p8 = por %p122_p5, %p121_p3  ;;  %p158_p9 = scmp.lt.s32.totalorder %s2640_s17, 3 }
   0xc   : > { %s2768_s25 = scalar_select %p103_p7, %s2628_s14, %s105_s21  }
   0xd   : > { %p159_p10 = pnand %p2433_p6, %p158_p9 }
   0xf   : > { %162 = sbr.rel (%p159_p10) target bundleno = 921 (0x399), region = 32 }
  0x16   : > { %p186_p11 = scmp.lt.s32.totalorder %s2632_s15, 1  ;;  %v199_v0 = vlaneseq  ;;  %v4771_v1 = vmov 0  ;;  %v2642_v2 = vmov 0.0   ;;  %v2643_v3 = vmov -inf   ;;  %s2645_s4 = smov 51  }
  0x17   : > { %vm210_vm1 = vcmask 1043456   ;;  %v2644_v16 = vmov 1966171168   ;;  %vm331_vm2 = vcmask 416768   ;;  %s2646_s5 = smov 111   ;;  %s2647_s6 = smov 127  }
  0x18   : > { %s187_s26 = scalar_select %p186_p11, %s2632_s15, 1  ;;  %vm2772_vm0 = vcmp.lt.s32.totalorder %v199_v0, 256  ;;  %v229_v17 = vunpack.c.l.s4 %v2644_v16  ;;  %v232_v27 = vshrl.u32 %v199_v0, 7  ;;  %vm376_vm3 = vcmask 1039360  }
  0x19   : > { %v4772_v1 = vsel %vm2772_vm0, 4294967295, %v4771_v1  ;;  %203 = vst.msk [vmem:[#allocation2] sm:$0x3] %vm2772_vm0, %v2642_v2  ;;  %204 = vst.msk [vmem:[#allocation3] sm:$0x3] %vm2772_vm0, %v2643_v3  ;;  %s2648_s7 = smov 126  }
  0x1a   : > { %4773 = vst [vmem:[#allocation7_spill] sm:$0xff] %v4772_v1  ;;  %s2444_s27 = sshll.u32 %s187_s26, 3  ;;  %v230_v26 = vunpack.c.0.s8 %v229_v17  ;;  %v321_v49 = vsub.s32 0, %v232_v27  ;;  %v325_v50 = vsub.s32 1, %v232_v27  ;;  %s2649_s8 = smov 125   ;;  %vm425_vm4 = vcmask 1031168  }
  0x1b   : > { %s194_s30 = scalar_lea.vmem %s4653_s2, %s2444_s27  ;;  %s2650_s9 = smov 124   ;;  %vm472_vm5 = vcmask 1022976   ;;  %vm519_vm6 = vcmask 1014784   ;;  %vm566_vm7 = vcmask 1006592   ;;  %vm613_vm8 = vcmask 998400  }
  0x1c   : > { %v205_v4 = vld [vmem:[%s194_s30] sm:$0xff]  ;;  %v2783_v36 = vsub.s32 %v230_v26, %v232_v27  ;;  %s2651_s10 = smov 123   ;;  %s2652_s11 = smov 122   ;;  %vm660_vm9 = vcmask 916480   ;;  %vm704_vm10 = vcmask 908288   ;;  %vm733_vm11 = vcmask 900096  }
  0x1d   : > { %v208_v5 = vcombine.high %v205_v4, %v205_v4  ;;  %v211_v6 = vsel %vm210_vm1, %v205_v4, 0.0  ;;  %v250_v7 = vsel %vm210_vm1, %v205_v4, -inf  ;;  %s2653_s18 = smov 112   ;;  %s2654_s19 = smov 110   ;;  %vm774_vm12 = vcmask 891904  }
  0x1e   : > { %v212_v8 = vrot.slane %v211_v6, 4  ;;  %v251_v9 = vrot.slane %v250_v7, 4  ;;  %4774 = vst [vmem:[#allocation8_spill] sm:$0xff] %v2783_v36  ;;  %s2655_s21 = smov 109   ;;  %s2656_s23 = smov 108   ;;  %vm815_vm13 = vcmask 883712  }
  0x1f   : > { %v257_v10 = vsel %vm210_vm1, %v208_v5, -inf  ;;  %v218_v11 = vsel %vm210_vm1, %v208_v5, 0.0  ;;  %s2657_s26 = smov 107   ;;  %s2658_s27 = smov 106   ;;  %vm856_vm14 = vcmask 875520   ;;  %vm897_vm15 = vcmask 867328  }
  0x20   : > { %v213_v12 = vadd.f32 %v212_v8, %v211_v6  ;;  %v252_v13 = vmax.f32 %v250_v7, %v251_v9  ;;  %v258_v14 = vrot.slane %v257_v10, 4  ;;  %v219_v15 = vrot.slane %v218_v11, 4  ;;  %v206_v43 = vld [vmem:[#allocation2] sm:$0x3]  ;;  %v249_v44 = vld [vmem:[#allocation3] sm:$0x3] }
  0x21   : > { %s2659_s28 = smov 96   ;;  %s2660_s29 = smov 95   ;;  %vm938_vm1 = vcmask 785408  }
  0x22   : > { %v214_v18 = vrot.slane %v213_v12, 2  ;;  %v253_v19 = vrot.slane %v252_v13, 2  ;;  %v259_v20 = vmax.f32 %v257_v10, %v258_v14  ;;  %v220_v21 = vadd.f32 %v219_v15, %v218_v11  ;;  %s2661_s30 = smov 94  }
  0x24   : > { %v215_v22 = vadd.f32 %v214_v18, %v213_v12  ;;  %v254_v23 = vmax.f32 %v252_v13, %v253_v19  ;;  %v260_v24 = vrot.slane %v259_v20, 2  ;;  %v221_v25 = vrot.slane %v220_v21, 2 }
  0x26   : > { %v216_v28 = vrot.slane %v215_v22, 1  ;;  %v255_v29 = vrot.slane %v254_v23, 1  ;;  %v261_v30 = vmax.f32 %v259_v20, %v260_v24  ;;  %v222_v31 = vadd.f32 %v221_v25, %v220_v21 }
  0x28   : > { %v217_v32 = vadd.f32 %v216_v28, %v215_v22  ;;  %v256_v33 = vmax.f32 %v254_v23, %v255_v29  ;;  %v262_v34 = vrot.slane %v261_v30, 1  ;;  %v223_v35 = vrot.slane %v222_v31, 1 }
  0x2a   : > { %v263_v37 = vmax.f32 %v261_v30, %v262_v34  ;;  %v224_v38 = vadd.f32 %v223_v35, %v222_v31 }
  0x2c   : > { %v266_v39 = vcombine.low %v256_v33, %v263_v37  ;;  %v227_v40 = vcombine.low %v217_v32, %v224_v38 }
  0x2e   : > { %v273_v41 = vrot.slane %v266_v39, %v2783_v36  ;;  %v234_v42 = vrot.slane %v227_v40, %v2783_v36 }
  0x30   : > { %v280_v45 = vrot.slane %v273_v41, %v2783_v36  ;;  %v241_v46 = vrot.slane %v234_v42, %v2783_v36 }
  0x32   : > { %v282_v47 = vmax.f32 %v249_v44, %v280_v45  ;;  %v243_v48 = vadd.f32 %v241_v46, %v206_v43 }
  0x34   : > { %283 = vst.msk [vmem:[#allocation3] sm:$0x3] %vm2772_vm0, %v282_v47  ;;  %248 = vst.msk [vmem:[#allocation2] sm:$0x3] %vm2772_vm0, %v243_v48 }
  0x3b   : > { %v289_v51 = vld [vmem:[#allocation3] sm:$0x3]  ;;  %v287_v52 = vld [vmem:[#allocation2] sm:$0x3] }
  0x3c   : > { %v342_v53 = vrot.slane %v289_v51, %v321_v49  ;;  %v288_v54 = vmul.f32 0.25, %v287_v52  ;;  %v346_v55 = vrot.slane %v289_v51, %v325_v50 }
  0x3e   : > { %347 = vrot.lane.b32.xlu1 %v342_v53, %s2645_s4  ;;  %v322_v56 = vrot.slane %v288_v54, %v321_v49  ;;  %v326_v57 = vrot.slane %v288_v54, %v325_v50 }
  0x40   : > { %327 = vrot.lane.b32.xlu0 %v322_v56, %s2645_s4 }
  0x42   : > { %349 = vrot.lane.b32.xlu1 %v346_v55, %s2645_s4 }
  0x44   : > { %329 = vrot.lane.b32.xlu0 %v326_v57, %s2645_s4  ;;  %s2662_s4 = smov 93  }
  0xb0   : > { %v348_v58 = vpop.permute.xlu1 %347 }
  0xb1   : > { %v2794_v59 = vsel %vm331_vm2, 0.0, %v348_v58 }
  0xb2   : > { %4775 = vst [vmem:[#allocation9_spill] sm:$0xff] %v2794_v59  ;;  %713 = vrot.lane.b32.xlu1 %v2794_v59, %s2646_s5  ;;  %v2809_v63 = vrot.slane %v2794_v59, 7  ;;  %v2829_v4 = vrot.slane %v2794_v59, 6  ;;  %v2849_v8 = vrot.slane %v2794_v59, 5  ;;  %v328_v12 = vpop.permute.xlu0 %327  ;;  %v2869_v13 = vrot.slane %v2794_v59, 4 }
  0xb3   : > { %v2882_v16 = vsel %vm331_vm2, 0.0, %v328_v12  ;;  %v2892_v19 = vrot.slane %v2794_v59, 3  ;;  %v2906_v21 = vrot.slane %v2794_v59, 2  ;;  %v2920_v23 = vrot.slane %v2794_v59, 1 }
  0xb4   : > { %v350_v60 = vpop.permute.xlu1 %349  ;;  %4778 = vst [vmem:[#allocation12_spill] sm:$0xff] %v2809_v63  ;;  %4782 = vst [vmem:[#allocation16_spill] sm:$0xff] %v2829_v4  ;;  %v2934_v25 = vrot.slane %v2882_v16, 7  ;;  %v2951_v28 = vrot.slane %v2882_v16, 6  ;;  %v2965_v30 = vrot.slane %v2882_v16, 5  ;;  %v2979_v32 = vrot.slane %v2882_v16, 4 }
  0xb5   : > { %v2799_v61 = vsel %vm331_vm2, %v348_v58, %v350_v60  ;;  %v2802_v62 = vsel %vm331_vm2, %v350_v60, 0.0  ;;  %4786 = vst [vmem:[#allocation20_spill] sm:$0xff] %v2849_v8  ;;  %4790 = vst [vmem:[#allocation24_spill] sm:$0xff] %v2869_v13  ;;  %v2993_v34 = vrot.slane %v2882_v16, 3  ;;  %v3007_v37 = vrot.slane %v2882_v16, 2 }
  0xb6   : > { %4776 = vst [vmem:[#allocation10_spill] sm:$0xff] %v2799_v61  ;;  %4777 = vst [vmem:[#allocation11_spill] sm:$0xff] %v2802_v62  ;;  %717 = vrot.lane.b32.xlu1 %v2802_v62, %s2646_s5  ;;  %715 = vrot.lane.b32.xlu0 %v2799_v61, %s2646_s5  ;;  %v2812_v0 = vrot.slane %v2799_v61, 7  ;;  %v2819_v2 = vrot.slane %v2802_v62, 7  ;;  %v2822_v3 = vrot.slane %v2799_v61, 6  ;;  %v2832_v5 = vrot.slane %v2799_v61, 5  ;;  %v330_v17 = vpop.permute.xlu0 %329 }
  0xb7   : > { %v2839_v6 = vrot.slane %v2802_v62, 6  ;;  %v2842_v7 = vrot.slane %v2799_v61, 4  ;;  %v2852_v9 = vrot.slane %v2799_v61, 3  ;;  %v2859_v10 = vrot.slane %v2802_v62, 5  ;;  %4793 = vst [vmem:[#allocation27_spill] sm:$0xff] %v2882_v16  ;;  %4796 = vst [vmem:[#allocation30_spill] sm:$0xff] %v2906_v21 }
  0xb8   : > { %4779 = vst [vmem:[#allocation13_spill] sm:$0xff] %v2812_v0  ;;  %4780 = vst [vmem:[#allocation14_spill] sm:$0xff] %v2819_v2  ;;  %v2862_v11 = vrot.slane %v2799_v61, 2  ;;  %v2872_v14 = vrot.slane %v2799_v61, 1  ;;  %v2879_v15 = vrot.slane %v2802_v62, 4  ;;  %v2889_v18 = vsel %vm331_vm2, %v330_v17, 0.0 }
  0xb9   : > { %4781 = vst [vmem:[#allocation15_spill] sm:$0xff] %v2822_v3  ;;  %4783 = vst [vmem:[#allocation17_spill] sm:$0xff] %v2832_v5  ;;  %v2899_v20 = vrot.slane %v2802_v62, 3  ;;  %v2913_v22 = vrot.slane %v2802_v62, 2  ;;  %v2927_v24 = vrot.slane %v2802_v62, 1  ;;  %v2937_v26 = vsel %vm331_vm2, %v328_v12, %v330_v17 }
  0xba   : > { %396 = vrot.lane.b32.xlu1 %v2809_v63, %s2647_s6  ;;  %398 = vrot.lane.b32.xlu0 %v2812_v0, %s2647_s6  ;;  %4784 = vst [vmem:[#allocation18_spill] sm:$0xff] %v2839_v6  ;;  %4785 = vst [vmem:[#allocation19_spill] sm:$0xff] %v2842_v7  ;;  %v2944_v27 = vrot.slane %v2889_v18, 7  ;;  %v2958_v29 = vrot.slane %v2889_v18, 6  ;;  %v2972_v31 = vrot.slane %v2889_v18, 5  ;;  %v2986_v33 = vrot.slane %v2889_v18, 4 }
  0xbb   : > { %4787 = vst [vmem:[#allocation21_spill] sm:$0xff] %v2852_v9  ;;  %4788 = vst [vmem:[#allocation22_spill] sm:$0xff] %v2859_v10  ;;  %v3000_v35 = vrot.slane %v2889_v18, 3  ;;  %v3014_v38 = vrot.slane %v2889_v18, 2  ;;  %v3017_v39 = vrot.slane %v2937_v26, 7  ;;  %v3024_v40 = vrot.slane %v2882_v16, 1 }
  0xbc   : > { %4789 = vst [vmem:[#allocation23_spill] sm:$0xff] %v2862_v11  ;;  %4791 = vst [vmem:[#allocation25_spill] sm:$0xff] %v2872_v14  ;;  %v3027_v41 = vrot.slane %v2937_v26, 6  ;;  %v3036_v43 = vrot.slane %v2889_v18, 1  ;;  %v3039_v44 = vrot.slane %v2937_v26, 5  ;;  %v3050_v47 = vrot.slane %v2937_v26, 4 }
  0xbd   : > { %4792 = vst [vmem:[#allocation26_spill] sm:$0xff] %v2879_v15  ;;  %4794 = vst [vmem:[#allocation28_spill] sm:$0xff] %v2889_v18  ;;  %v3061_v50 = vrot.slane %v2937_v26, 3  ;;  %v3072_v53 = vrot.slane %v2937_v26, 2  ;;  %v3083_v56 = vrot.slane %v2937_v26, 1  ;;  %vm979_vm2 = vcmask 777216  }
  0xbe   : > { %400 = vrot.lane.b32.xlu1 %v2819_v2, %s2647_s6  ;;  %445 = vrot.lane.b32.xlu0 %v2822_v3, %s2648_s7  ;;  %4795 = vst [vmem:[#allocation29_spill] sm:$0xff] %v2899_v20  ;;  %4797 = vst [vmem:[#allocation31_spill] sm:$0xff] %v2920_v23 }
  0xbf   : > { %4798 = vst [vmem:[#allocation32_spill] sm:$0xff] %v2927_v24  ;;  %4799 = vst [vmem:[#allocation33_spill] sm:$0xff] %v2934_v25 }
  0xc0   : > { %4800 = vst [vmem:[#allocation34_spill] sm:$0xff] %v2937_v26  ;;  %4801 = vst [vmem:[#allocation35_spill] sm:$0xff] %v2944_v27 }
  0xc1   : > { %4802 = vst [vmem:[#allocation36_spill] sm:$0xff] %v2951_v28  ;;  %4803 = vst [vmem:[#allocation37_spill] sm:$0xff] %v2958_v29 }
  0xc2   : > { %443 = vrot.lane.b32.xlu1 %v2829_v4, %s2648_s7  ;;  %492 = vrot.lane.b32.xlu0 %v2832_v5, %s2649_s8  ;;  %4804 = vst [vmem:[#allocation38_spill] sm:$0xff] %v2965_v30  ;;  %4805 = vst [vmem:[#allocation39_spill] sm:$0xff] %v2972_v31 }
  0xc3   : > { %4806 = vst [vmem:[#allocation40_spill] sm:$0xff] %v2979_v32  ;;  %4807 = vst [vmem:[#allocation41_spill] sm:$0xff] %v2986_v33 }
  0xc4   : > { %4808 = vst [vmem:[#allocation42_spill] sm:$0xff] %v3000_v35  ;;  %4809 = vst [vmem:[#allocation43_spill] sm:$0xff] %v3007_v37 }
  0xc5   : > { %4810 = vst [vmem:[#allocation44_spill] sm:$0xff] %v3017_v39  ;;  %4811 = vst [vmem:[#allocation45_spill] sm:$0xff] %v3024_v40 }
  0xc6   : > { %447 = vrot.lane.b32.xlu1 %v2839_v6, %s2648_s7  ;;  %539 = vrot.lane.b32.xlu0 %v2842_v7, %s2650_s9  ;;  %4812 = vst [vmem:[#allocation46_spill] sm:$0xff] %v3027_v41  ;;  %4814 = vst [vmem:[#allocation48_spill] sm:$0xff] %v3036_v43 }
  0xc7   : > { %4815 = vst [vmem:[#allocation49_spill] sm:$0xff] %v3039_v44  ;;  %4818 = vst [vmem:[#allocation52_spill] sm:$0xff] %v3050_v47 }
  0xc8   : > { %4819 = vst [vmem:[#allocation53_spill] sm:$0xff] %v3061_v50  ;;  %4821 = vst [vmem:[#allocation55_spill] sm:$0xff] %v3083_v56 }
  0xca   : > { %490 = vrot.lane.b32.xlu1 %v2849_v8, %s2649_s8  ;;  %586 = vrot.lane.b32.xlu0 %v2852_v9, %s2651_s10 }
  0xce   : > { %494 = vrot.lane.b32.xlu1 %v2859_v10, %s2649_s8  ;;  %633 = vrot.lane.b32.xlu0 %v2862_v11, %s2652_s11 }
  0xd2   : > { %537 = vrot.lane.b32.xlu1 %v2869_v13, %s2650_s9  ;;  %680 = vrot.lane.b32.xlu0 %v2872_v14, %s2653_s18 }
  0xd6   : > { %541 = vrot.lane.b32.xlu1 %v2879_v15, %s2650_s9  ;;  %698 = vrot.lane.b32.xlu0 %v2882_v16, %s2646_s5 }
  0xda   : > { %584 = vrot.lane.b32.xlu1 %v2892_v19, %s2651_s10  ;;  %702 = vrot.lane.b32.xlu0 %v2889_v18, %s2646_s5 }
  0xde   : > { %588 = vrot.lane.b32.xlu1 %v2899_v20, %s2651_s10  ;;  %750 = vrot.lane.b32.xlu0 %v2812_v0, %s2654_s19 }
  0xe2   : > { %631 = vrot.lane.b32.xlu1 %v2906_v21, %s2652_s11  ;;  %791 = vrot.lane.b32.xlu0 %v2822_v3, %s2655_s21 }
  0xe6   : > { %635 = vrot.lane.b32.xlu1 %v2913_v22, %s2652_s11  ;;  %832 = vrot.lane.b32.xlu0 %v2832_v5, %s2656_s23 }
  0xea   : > { %678 = vrot.lane.b32.xlu1 %v2920_v23, %s2653_s18  ;;  %873 = vrot.lane.b32.xlu0 %v2842_v7, %s2657_s26 }
  0xee   : > { %682 = vrot.lane.b32.xlu1 %v2927_v24, %s2653_s18  ;;  %914 = vrot.lane.b32.xlu0 %v2852_v9, %s2658_s27 }
  0xf2   : > { %370 = vrot.lane.b32.xlu0 %v2934_v25, %s2647_s6  ;;  %700 = vrot.lane.b32.xlu1 %v2937_v26, %s2646_s5  ;;  %s2663_s5 = smov 92  }
  0xf6   : > { %374 = vrot.lane.b32.xlu0 %v2944_v27, %s2647_s6  ;;  %748 = vrot.lane.b32.xlu1 %v2809_v63, %s2654_s19 }
  0xfa   : > { %419 = vrot.lane.b32.xlu0 %v2951_v28, %s2648_s7  ;;  %752 = vrot.lane.b32.xlu1 %v2819_v2, %s2654_s19 }
  0xfe   : > { %423 = vrot.lane.b32.xlu0 %v2958_v29, %s2648_s7  ;;  %789 = vrot.lane.b32.xlu1 %v2829_v4, %s2655_s21 }
 0x102   : > { %466 = vrot.lane.b32.xlu0 %v2965_v30, %s2649_s8  ;;  %793 = vrot.lane.b32.xlu1 %v2839_v6, %s2655_s21 }
 0x106   : > { %470 = vrot.lane.b32.xlu0 %v2972_v31, %s2649_s8  ;;  %830 = vrot.lane.b32.xlu1 %v2849_v8, %s2656_s23 }
 0x10a   : > { %513 = vrot.lane.b32.xlu0 %v2979_v32, %s2650_s9  ;;  %834 = vrot.lane.b32.xlu1 %v2859_v10, %s2656_s23 }
 0x10e   : > { %517 = vrot.lane.b32.xlu0 %v2986_v33, %s2650_s9  ;;  %871 = vrot.lane.b32.xlu1 %v2869_v13, %s2657_s26 }
 0x112   : > { %560 = vrot.lane.b32.xlu0 %v2993_v34, %s2651_s10  ;;  %875 = vrot.lane.b32.xlu1 %v2879_v15, %s2657_s26 }
 0x116   : > { %564 = vrot.lane.b32.xlu0 %v3000_v35, %s2651_s10  ;;  %912 = vrot.lane.b32.xlu1 %v2892_v19, %s2658_s27 }
 0x11a   : > { %607 = vrot.lane.b32.xlu0 %v3007_v37, %s2652_s11  ;;  %916 = vrot.lane.b32.xlu1 %v2899_v20, %s2658_s27 }
 0x11e   : > { %611 = vrot.lane.b32.xlu0 %v3014_v38, %s2652_s11  ;;  %372 = vrot.lane.b32.xlu1 %v3017_v39, %s2647_s6  ;;  %s2664_s6 = smov 91  }
 0x122   : > { %654 = vrot.lane.b32.xlu0 %v3024_v40, %s2653_s18  ;;  %421 = vrot.lane.b32.xlu1 %v3027_v41, %s2648_s7  ;;  %s2665_s7 = smov 90  }
 0x124   : > { %v3033_v42 = vpop.permute.xlu1 %713 }
 0x125   : > { %4813 = vst [vmem:[#allocation47_spill] sm:$0xff] %v3033_v42 }
 0x126   : > { %658 = vrot.lane.b32.xlu0 %v3036_v43, %s2653_s18  ;;  %468 = vrot.lane.b32.xlu1 %v3039_v44, %s2649_s8  ;;  %s2666_s8 = smov 80  }
 0x128   : > { %v3045_v45 = vpop.permute.xlu1 %717  ;;  %v3047_v46 = vpop.permute.xlu0 %715 }
 0x129   : > { %4816 = vst [vmem:[#allocation50_spill] sm:$0xff] %v3045_v45  ;;  %4817 = vst [vmem:[#allocation51_spill] sm:$0xff] %v3047_v46 }
 0x12a   : > { %727 = vrot.lane.b32.xlu0 %v2934_v25, %s2654_s19  ;;  %515 = vrot.lane.b32.xlu1 %v3050_v47, %s2650_s9  ;;  %s2667_s9 = smov 79  }
 0x12c   : > { %v3056_v48 = vpop.permute.xlu1 %396  ;;  %v3058_v49 = vpop.permute.xlu0 %398 }
 0x12e   : > { %731 = vrot.lane.b32.xlu0 %v2944_v27, %s2654_s19  ;;  %562 = vrot.lane.b32.xlu1 %v3061_v50, %s2651_s10  ;;  %s2668_s10 = smov 78  }
 0x130   : > { %v3067_v51 = vpop.permute.xlu1 %400  ;;  %v3069_v52 = vpop.permute.xlu0 %445 }
 0x132   : > { %768 = vrot.lane.b32.xlu0 %v2951_v28, %s2655_s21  ;;  %609 = vrot.lane.b32.xlu1 %v3072_v53, %s2652_s11  ;;  %s2669_s11 = smov 77  }
 0x134   : > { %v3078_v54 = vpop.permute.xlu1 %443  ;;  %v3080_v55 = vpop.permute.xlu0 %492 }
 0x135   : > { %4820 = vst [vmem:[#allocation54_spill] sm:$0xff] %v3080_v55 }
 0x136   : > { %772 = vrot.lane.b32.xlu0 %v2958_v29, %s2655_s21  ;;  %656 = vrot.lane.b32.xlu1 %v3083_v56, %s2653_s18  ;;  %s2670_s18 = smov 76  }
 0x138   : > { %v3089_v57 = vpop.permute.xlu1 %447  ;;  %v3091_v58 = vpop.permute.xlu0 %539 }
 0x139   : > { %4822 = vst [vmem:[#allocation56_spill] sm:$0xff] %v3089_v57  ;;  %4823 = vst [vmem:[#allocation57_spill] sm:$0xff] %v3091_v58 }
 0x13a   : > { %809 = vrot.lane.b32.xlu0 %v2965_v30, %s2656_s23  ;;  %729 = vrot.lane.b32.xlu1 %v3017_v39, %s2654_s19  ;;  %s2671_s19 = smov 75  }
 0x13c   : > { %v3097_v60 = vpop.permute.xlu1 %490  ;;  %v3099_v12 = vpop.permute.xlu0 %586 }
 0x13d   : > { %4824 = vst [vmem:[#allocation58_spill] sm:$0xff] %v3097_v60  ;;  %4825 = vst [vmem:[#allocation59_spill] sm:$0xff] %v3099_v12 }
 0x13e   : > { %813 = vrot.lane.b32.xlu0 %v2972_v31, %s2656_s23  ;;  %770 = vrot.lane.b32.xlu1 %v3027_v41, %s2655_s21 }
 0x140   : > { %v3105_v17 = vpop.permute.xlu1 %494  ;;  %v3107_v1 = vpop.permute.xlu0 %633 }
 0x141   : > { %4826 = vst [vmem:[#allocation60_spill] sm:$0xff] %v3105_v17  ;;  %4827 = vst [vmem:[#allocation61_spill] sm:$0xff] %v3107_v1 }
 0x142   : > { %850 = vrot.lane.b32.xlu0 %v2979_v32, %s2657_s26  ;;  %811 = vrot.lane.b32.xlu1 %v3039_v44, %s2656_s23  ;;  %s2683_s23 = smov 45  }
 0x144   : > { %v3113_v36 = vpop.permute.xlu1 %537  ;;  %v3115_v45 = vpop.permute.xlu0 %680 }
 0x145   : > { %4828 = vst [vmem:[#allocation62_spill] sm:$0xff] %v3113_v36  ;;  %4829 = vst [vmem:[#allocation63_spill] sm:$0xff] %v3115_v45 }
 0x146   : > { %854 = vrot.lane.b32.xlu0 %v2986_v33, %s2657_s26  ;;  %852 = vrot.lane.b32.xlu1 %v3050_v47, %s2657_s26  ;;  %s2684_s26 = smov 44  }
 0x148   : > { %v3121_v42 = vpop.permute.xlu1 %541  ;;  %v3123_v46 = vpop.permute.xlu0 %698 }
 0x149   : > { %4830 = vst [vmem:[#allocation64_spill] sm:$0xff] %v3121_v42  ;;  %4831 = vst [vmem:[#allocation65_spill] sm:$0xff] %v3123_v46 }
 0x14a   : > { %891 = vrot.lane.b32.xlu0 %v2993_v34, %s2658_s27  ;;  %893 = vrot.lane.b32.xlu1 %v3061_v50, %s2658_s27 }
 0x14c   : > { %v3129_v1 = vpop.permute.xlu1 %584  ;;  %v3131_v12 = vpop.permute.xlu0 %702 }
 0x14d   : > { %4832 = vst [vmem:[#allocation66_spill] sm:$0xff] %v3129_v1  ;;  %4833 = vst [vmem:[#allocation67_spill] sm:$0xff] %v3131_v12 }
 0x14e   : > { %895 = vrot.lane.b32.xlu0 %v3000_v35, %s2658_s27  ;;  %934 = vrot.lane.b32.xlu1 %v3072_v53, %s2659_s28 }
 0x150   : > { %v3136_v45 = vpop.permute.xlu1 %588  ;;  %v3138_v42 = vpop.permute.xlu0 %750 }
 0x151   : > { %4834 = vst [vmem:[#allocation68_spill] sm:$0xff] %v3136_v45  ;;  %4835 = vst [vmem:[#allocation69_spill] sm:$0xff] %v3138_v42 }
 0x152   : > { %932 = vrot.lane.b32.xlu0 %v3007_v37, %s2659_s28  ;;  %953 = vrot.lane.b32.xlu1 %v2906_v21, %s2659_s28 }
 0x154   : > { %v3142_v46 = vpop.permute.xlu1 %631  ;;  %v3144_v17 = vpop.permute.xlu0 %791 }
 0x155   : > { %4836 = vst [vmem:[#allocation70_spill] sm:$0xff] %v3142_v46  ;;  %4837 = vst [vmem:[#allocation71_spill] sm:$0xff] %v3144_v17 }
 0x156   : > { %936 = vrot.lane.b32.xlu0 %v3014_v38, %s2659_s28  ;;  %957 = vrot.lane.b32.xlu1 %v2913_v22, %s2659_s28 }
 0x158   : > { %v3148_v12 = vpop.permute.xlu1 %635  ;;  %v3150_v1 = vpop.permute.xlu0 %832 }
 0x159   : > { %4838 = vst [vmem:[#allocation72_spill] sm:$0xff] %v3148_v12  ;;  %4839 = vst [vmem:[#allocation73_spill] sm:$0xff] %v3150_v1 }
 0x15a   : > { %955 = vrot.lane.b32.xlu0 %v2862_v11, %s2659_s28  ;;  %975 = vrot.lane.b32.xlu1 %v3083_v56, %s2660_s29  ;;  %s2672_s28 = smov 74  }
 0x15c   : > { %v3154_v42 = vpop.permute.xlu1 %678  ;;  %v3156_v45 = vpop.permute.xlu0 %873 }
 0x15d   : > { %4840 = vst [vmem:[#allocation74_spill] sm:$0xff] %v3154_v42  ;;  %4841 = vst [vmem:[#allocation75_spill] sm:$0xff] %v3156_v45 }
 0x15e   : > { %973 = vrot.lane.b32.xlu0 %v3024_v40, %s2660_s29  ;;  %994 = vrot.lane.b32.xlu1 %v2920_v23, %s2660_s29 }
 0x160   : > { %v3160_v17 = vpop.permute.xlu1 %682  ;;  %v3162_v46 = vpop.permute.xlu0 %914 }
 0x161   : > { %4842 = vst [vmem:[#allocation76_spill] sm:$0xff] %v3160_v17  ;;  %4843 = vst [vmem:[#allocation77_spill] sm:$0xff] %v3162_v46 }
 0x162   : > { %977 = vrot.lane.b32.xlu0 %v3036_v43, %s2660_s29  ;;  %998 = vrot.lane.b32.xlu1 %v2927_v24, %s2660_s29 }
 0x164   : > { %v3166_v1 = vpop.permute.xlu1 %700  ;;  %v3168_v12 = vpop.permute.xlu0 %370 }
 0x165   : > { %4844 = vst [vmem:[#allocation78_spill] sm:$0xff] %v3166_v1 }
 0x166   : > { %996 = vrot.lane.b32.xlu0 %v2872_v14, %s2660_s29  ;;  %1016 = vrot.lane.b32.xlu1 %v2937_v26, %s2661_s30  ;;  %s2678_s29 = smov 59  }
 0x168   : > { %v3172_v45 = vpop.permute.xlu1 %748  ;;  %v3174_v42 = vpop.permute.xlu0 %374 }
 0x169   : > { %4845 = vst [vmem:[#allocation79_spill] sm:$0xff] %v3172_v45 }
 0x16a   : > { %1014 = vrot.lane.b32.xlu0 %v2882_v16, %s2661_s30  ;;  %1029 = vrot.lane.b32.xlu1 %v2794_v59, %s2661_s30 }
 0x16c   : > { %v3178_v46 = vpop.permute.xlu1 %752  ;;  %v3180_v17 = vpop.permute.xlu0 %419 }
 0x16d   : > { %4846 = vst [vmem:[#allocation80_spill] sm:$0xff] %v3178_v46 }
 0x16e   : > { %1018 = vrot.lane.b32.xlu0 %v2889_v18, %s2661_s30  ;;  %1033 = vrot.lane.b32.xlu1 %v2802_v62, %s2661_s30 }
 0x170   : > { %v3184_v1 = vpop.permute.xlu1 %789  ;;  %v3186_v36 = vpop.permute.xlu0 %423 }
 0x171   : > { %4847 = vst [vmem:[#allocation81_spill] sm:$0xff] %v3184_v1  ;;  %4848 = vst [vmem:[#allocation82_spill] sm:$0xff] %v3186_v36 }
 0x172   : > { %1031 = vrot.lane.b32.xlu0 %v2799_v61, %s2661_s30  ;;  %1045 = vrot.lane.b32.xlu1 %v3017_v39, %s2662_s4  ;;  %s2679_s30 = smov 58  }
 0x174   : > { %v3190_v45 = vpop.permute.xlu1 %793  ;;  %v3192_v58 = vpop.permute.xlu0 %466 }
 0x175   : > { %4849 = vst [vmem:[#allocation83_spill] sm:$0xff] %v3190_v45 }
 0x176   : > { %1043 = vrot.lane.b32.xlu0 %v2934_v25, %s2662_s4  ;;  %1064 = vrot.lane.b32.xlu1 %v2809_v63, %s2662_s4 }
 0x178   : > { %v3196_v46 = vpop.permute.xlu1 %830  ;;  %v3198_v57 = vpop.permute.xlu0 %470 }
 0x179   : > { %4850 = vst [vmem:[#allocation84_spill] sm:$0xff] %v3196_v46  ;;  %4851 = vst [vmem:[#allocation85_spill] sm:$0xff] %v3198_v57 }
 0x17a   : > { %1068 = vrot.lane.b32.xlu1 %v2819_v2, %s2662_s4  ;;  %1047 = vrot.lane.b32.xlu0 %v2944_v27, %s2662_s4 }
 0x17c   : > { %v3202_v1 = vpop.permute.xlu1 %834  ;;  %v3204_v60 = vpop.permute.xlu0 %513 }
 0x17d   : > { %4852 = vst [vmem:[#allocation86_spill] sm:$0xff] %v3202_v1  ;;  %4853 = vst [vmem:[#allocation87_spill] sm:$0xff] %v3204_v60 }
 0x17e   : > { %1086 = vrot.lane.b32.xlu1 %v3027_v41, %s2663_s5  ;;  %1066 = vrot.lane.b32.xlu0 %v2812_v0, %s2662_s4  ;;  %s2680_s4 = smov 48  }
 0x180   : > { %v3208_v45 = vpop.permute.xlu1 %871  ;;  %v3210_v55 = vpop.permute.xlu0 %517 }
 0x181   : > { %4854 = vst [vmem:[#allocation88_spill] sm:$0xff] %v3208_v45  ;;  %4855 = vst [vmem:[#allocation89_spill] sm:$0xff] %v3210_v55 }
 0x182   : > { %1105 = vrot.lane.b32.xlu1 %v2829_v4, %s2663_s5  ;;  %1084 = vrot.lane.b32.xlu0 %v2951_v28, %s2663_s5 }
 0x184   : > { %v3214_v46 = vpop.permute.xlu1 %875  ;;  %v3216_v57 = vpop.permute.xlu0 %560 }
 0x185   : > { %4856 = vst [vmem:[#allocation90_spill] sm:$0xff] %v3214_v46  ;;  %4857 = vst [vmem:[#allocation91_spill] sm:$0xff] %v3216_v57 }
 0x186   : > { %1109 = vrot.lane.b32.xlu1 %v2839_v6, %s2663_s5  ;;  %1088 = vrot.lane.b32.xlu0 %v2958_v29, %s2663_s5 }
 0x188   : > { %v3220_v1 = vpop.permute.xlu1 %912  ;;  %v3222_v60 = vpop.permute.xlu0 %564 }
 0x189   : > { %4858 = vst [vmem:[#allocation92_spill] sm:$0xff] %v3220_v1  ;;  %4859 = vst [vmem:[#allocation93_spill] sm:$0xff] %v3222_v60 }
 0x18a   : > { %1127 = vrot.lane.b32.xlu1 %v3039_v44, %s2664_s6  ;;  %1107 = vrot.lane.b32.xlu0 %v2822_v3, %s2663_s5  ;;  %s2681_s5 = smov 47  }
 0x18c   : > { %v3226_v45 = vpop.permute.xlu1 %916  ;;  %v3228_v55 = vpop.permute.xlu0 %607 }
 0x18d   : > { %4860 = vst [vmem:[#allocation94_spill] sm:$0xff] %v3226_v45  ;;  %4861 = vst [vmem:[#allocation95_spill] sm:$0xff] %v3228_v55 }
 0x18e   : > { %1146 = vrot.lane.b32.xlu1 %v2849_v8, %s2664_s6  ;;  %1125 = vrot.lane.b32.xlu0 %v2965_v30, %s2664_s6 }
 0x190   : > { %v3232_v46 = vpop.permute.xlu1 %372  ;;  %v3234_v57 = vpop.permute.xlu0 %611 }
 0x191   : > { %4862 = vst [vmem:[#allocation96_spill] sm:$0xff] %v3234_v57 }
 0x192   : > { %1150 = vrot.lane.b32.xlu1 %v2859_v10, %s2664_s6  ;;  %1129 = vrot.lane.b32.xlu0 %v2972_v31, %s2664_s6 }
 0x194   : > { %v3238_v1 = vpop.permute.xlu1 %421  ;;  %v3240_v60 = vpop.permute.xlu0 %654 }
 0x195   : > { %4863 = vst [vmem:[#allocation97_spill] sm:$0xff] %v3240_v60 }
 0x196   : > { %1168 = vrot.lane.b32.xlu1 %v3050_v47, %s2665_s7  ;;  %1148 = vrot.lane.b32.xlu0 %v2832_v5, %s2664_s6  ;;  %s2673_s6 = smov 64  }
 0x198   : > { %v3244_v45 = vpop.permute.xlu1 %468  ;;  %v3246_v55 = vpop.permute.xlu0 %658 }
 0x199   : > { %4864 = vst [vmem:[#allocation98_spill] sm:$0xff] %v3246_v55 }
 0x19a   : > { %1187 = vrot.lane.b32.xlu1 %v2869_v13, %s2665_s7  ;;  %1166 = vrot.lane.b32.xlu0 %v2979_v32, %s2665_s7 }
 0x19c   : > { %v3250_v57 = vpop.permute.xlu1 %515  ;;  %v3252_v36 = vpop.permute.xlu0 %727 }
 0x19d   : > { %4865 = vst [vmem:[#allocation99_spill] sm:$0xff] %v3252_v36 }
 0x19e   : > { %1191 = vrot.lane.b32.xlu1 %v2879_v15, %s2665_s7  ;;  %1170 = vrot.lane.b32.xlu0 %v2986_v33, %s2665_s7 }
 0x1a0   : > { %v3256_v60 = vpop.permute.xlu1 %562  ;;  %v3258_v47 = vpop.permute.xlu0 %731 }
 0x1a1   : > { %4866 = vst [vmem:[#allocation100_spill] sm:$0xff] %v3256_v60  ;;  %4867 = vst [vmem:[#allocation101_spill] sm:$0xff] %v3258_v47 }
 0x1a2   : > { %1209 = vrot.lane.b32.xlu1 %v3061_v50, %s2666_s8  ;;  %1189 = vrot.lane.b32.xlu0 %v2842_v7, %s2665_s7  ;;  %s2674_s7 = smov 63  }
 0x1a4   : > { %v3262_v55 = vpop.permute.xlu1 %609  ;;  %v3264_v32 = vpop.permute.xlu0 %768 }
 0x1a5   : > { %4868 = vst [vmem:[#allocation102_spill] sm:$0xff] %v3262_v55  ;;  %4869 = vst [vmem:[#allocation103_spill] sm:$0xff] %v3264_v32 }
 0x1a6   : > { %1228 = vrot.lane.b32.xlu1 %v2892_v19, %s2666_s8  ;;  %1207 = vrot.lane.b32.xlu0 %v2993_v34, %s2666_s8 }
 0x1a8   : > { %v3268_v36 = vpop.permute.xlu1 %656  ;;  %v3270_v33 = vpop.permute.xlu0 %772 }
 0x1a9   : > { %4870 = vst [vmem:[#allocation104_spill] sm:$0xff] %v3268_v36  ;;  %4871 = vst [vmem:[#allocation105_spill] sm:$0xff] %v3270_v33 }
 0x1aa   : > { %1232 = vrot.lane.b32.xlu1 %v2899_v20, %s2666_s8  ;;  %1211 = vrot.lane.b32.xlu0 %v3000_v35, %s2666_s8 }
 0x1ac   : > { %v3274_v47 = vpop.permute.xlu1 %729  ;;  %v3276_v60 = vpop.permute.xlu0 %809 }
 0x1ad   : > { %4872 = vst [vmem:[#allocation106_spill] sm:$0xff] %v3274_v47  ;;  %4873 = vst [vmem:[#allocation107_spill] sm:$0xff] %v3276_v60 }
 0x1ae   : > { %1250 = vrot.lane.b32.xlu1 %v3072_v53, %s2667_s9  ;;  %1230 = vrot.lane.b32.xlu0 %v2852_v9, %s2666_s8  ;;  %s2675_s8 = smov 62  }
 0x1b0   : > { %v3280_v32 = vpop.permute.xlu1 %770  ;;  %v3282_v55 = vpop.permute.xlu0 %813 }
 0x1b1   : > { %4874 = vst [vmem:[#allocation108_spill] sm:$0xff] %v3280_v32  ;;  %4875 = vst [vmem:[#allocation109_spill] sm:$0xff] %v3282_v55 }
 0x1b2   : > { %1269 = vrot.lane.b32.xlu1 %v2906_v21, %s2667_s9  ;;  %1248 = vrot.lane.b32.xlu0 %v3007_v37, %s2667_s9 }
 0x1b4   : > { %v3286_v33 = vpop.permute.xlu1 %811  ;;  %v3288_v36 = vpop.permute.xlu0 %850 }
 0x1b5   : > { %4876 = vst [vmem:[#allocation110_spill] sm:$0xff] %v3286_v33  ;;  %4877 = vst [vmem:[#allocation111_spill] sm:$0xff] %v3288_v36 }
 0x1b6   : > { %1273 = vrot.lane.b32.xlu1 %v2913_v22, %s2667_s9  ;;  %1252 = vrot.lane.b32.xlu0 %v3014_v38, %s2667_s9 }
 0x1b8   : > { %v3292_v60 = vpop.permute.xlu1 %852  ;;  %v3294_v47 = vpop.permute.xlu0 %854 }
 0x1b9   : > { %4878 = vst [vmem:[#allocation112_spill] sm:$0xff] %v3292_v60  ;;  %4879 = vst [vmem:[#allocation113_spill] sm:$0xff] %v3294_v47 }
 0x1ba   : > { %1291 = vrot.lane.b32.xlu1 %v3083_v56, %s2668_s10  ;;  %1271 = vrot.lane.b32.xlu0 %v2862_v11, %s2667_s9  ;;  %s2676_s9 = smov 61  }
 0x1bc   : > { %v3298_v55 = vpop.permute.xlu1 %893  ;;  %v3300_v32 = vpop.permute.xlu0 %891 }
 0x1bd   : > { %4880 = vst [vmem:[#allocation114_spill] sm:$0xff] %v3298_v55  ;;  %4881 = vst [vmem:[#allocation115_spill] sm:$0xff] %v3300_v32 }
 0x1be   : > { %1310 = vrot.lane.b32.xlu1 %v2920_v23, %s2668_s10  ;;  %1289 = vrot.lane.b32.xlu0 %v3024_v40, %s2668_s10 }
 0x1c0   : > { %v3304_v36 = vpop.permute.xlu1 %934  ;;  %v3306_v33 = vpop.permute.xlu0 %895 }
 0x1c1   : > { %4882 = vst [vmem:[#allocation116_spill] sm:$0xff] %v3304_v36  ;;  %4883 = vst [vmem:[#allocation117_spill] sm:$0xff] %v3306_v33 }
 0x1c2   : > { %1314 = vrot.lane.b32.xlu1 %v2927_v24, %s2668_s10  ;;  %1293 = vrot.lane.b32.xlu0 %v3036_v43, %s2668_s10 }
 0x1c4   : > { %v3310_v47 = vpop.permute.xlu1 %953  ;;  %v3312_v60 = vpop.permute.xlu0 %932 }
 0x1c5   : > { %4884 = vst [vmem:[#allocation118_spill] sm:$0xff] %v3310_v47  ;;  %4885 = vst [vmem:[#allocation119_spill] sm:$0xff] %v3312_v60 }
 0x1c6   : > { %1332 = vrot.lane.b32.xlu1 %v2937_v26, %s2669_s11  ;;  %1312 = vrot.lane.b32.xlu0 %v2872_v14, %s2668_s10  ;;  %s2687_s10 = smov 32  }
 0x1c8   : > { %v3316_v32 = vpop.permute.xlu1 %957  ;;  %v3318_v55 = vpop.permute.xlu0 %936 }
 0x1c9   : > { %4886 = vst [vmem:[#allocation120_spill] sm:$0xff] %v3316_v32  ;;  %4887 = vst [vmem:[#allocation121_spill] sm:$0xff] %v3318_v55 }
 0x1ca   : > { %1345 = vrot.lane.b32.xlu1 %v2794_v59, %s2669_s11  ;;  %1330 = vrot.lane.b32.xlu0 %v2882_v16, %s2669_s11 }
 0x1cc   : > { %v3322_v33 = vpop.permute.xlu1 %975  ;;  %v3324_v36 = vpop.permute.xlu0 %955 }
 0x1cd   : > { %4888 = vst [vmem:[#allocation122_spill] sm:$0xff] %v3322_v33  ;;  %4889 = vst [vmem:[#allocation123_spill] sm:$0xff] %v3324_v36 }
 0x1ce   : > { %1349 = vrot.lane.b32.xlu1 %v2802_v62, %s2669_s11  ;;  %1334 = vrot.lane.b32.xlu0 %v2889_v18, %s2669_s11 }
 0x1d0   : > { %v3328_v47 = vpop.permute.xlu1 %994  ;;  %v3330_v60 = vpop.permute.xlu0 %973 }
 0x1d1   : > { %4890 = vst [vmem:[#allocation124_spill] sm:$0xff] %v3328_v47  ;;  %4891 = vst [vmem:[#allocation125_spill] sm:$0xff] %v3330_v60 }
 0x1d2   : > { %1361 = vrot.lane.b32.xlu1 %v3017_v39, %s2670_s18  ;;  %1347 = vrot.lane.b32.xlu0 %v2799_v61, %s2669_s11 }
 0x1d4   : > { %v3334_v32 = vpop.permute.xlu1 %998  ;;  %v3336_v55 = vpop.permute.xlu0 %977 }
 0x1d5   : > { %4892 = vst [vmem:[#allocation126_spill] sm:$0xff] %v3334_v32  ;;  %4893 = vst [vmem:[#allocation127_spill] sm:$0xff] %v3336_v55 }
 0x1d6   : > { %1380 = vrot.lane.b32.xlu1 %v2809_v63, %s2670_s18  ;;  %1359 = vrot.lane.b32.xlu0 %v2934_v25, %s2670_s18 }
 0x1d8   : > { %v3340_v33 = vpop.permute.xlu1 %1016  ;;  %v3342_v36 = vpop.permute.xlu0 %996 }
 0x1d9   : > { %4894 = vst [vmem:[#allocation128_spill] sm:$0xff] %v3340_v33  ;;  %4895 = vst [vmem:[#allocation129_spill] sm:$0xff] %v3342_v36 }
 0x1da   : > { %1384 = vrot.lane.b32.xlu1 %v2819_v2, %s2670_s18  ;;  %1363 = vrot.lane.b32.xlu0 %v2944_v27, %s2670_s18 }
 0x1dc   : > { %v3346_v47 = vpop.permute.xlu1 %1029  ;;  %v3348_v60 = vpop.permute.xlu0 %1014 }
 0x1dd   : > { %4896 = vst [vmem:[#allocation130_spill] sm:$0xff] %v3346_v47  ;;  %4897 = vst [vmem:[#allocation131_spill] sm:$0xff] %v3348_v60  ;;  %v377_v47 = vsel %vm376_vm3, %v3168_v12, %v3232_v46 }
 0x1de   : > { %1402 = vrot.lane.b32.xlu1 %v3027_v41, %s2671_s19  ;;  %1382 = vrot.lane.b32.xlu0 %v2812_v0, %s2670_s18  ;;  %s2677_s18 = smov 60  }
 0x1e0   : > { %v3352_v32 = vpop.permute.xlu1 %1033  ;;  %v3354_v55 = vpop.permute.xlu0 %1018 }
 0x1e1   : > { %4898 = vst [vmem:[#allocation132_spill] sm:$0xff] %v3352_v32  ;;  %4899 = vst [vmem:[#allocation133_spill] sm:$0xff] %v3354_v55  ;;  %v3370_v32 = vld [vmem:[%s4651_s0] sm:$0xff] }
 0x1e2   : > { %1421 = vrot.lane.b32.xlu1 %v2829_v4, %s2671_s19  ;;  %1400 = vrot.lane.b32.xlu0 %v2951_v28, %s2671_s19  ;;  %v357_v12 = vmul.f32 %v2882_v16, %v3370_v32 }
 0x1e4   : > { %v3358_v33 = vpop.permute.xlu1 %1045  ;;  %v3360_v36 = vpop.permute.xlu0 %1031 }
 0x1e5   : > { %4900 = vst [vmem:[#allocation134_spill] sm:$0xff] %v3358_v33  ;;  %4901 = vst [vmem:[#allocation135_spill] sm:$0xff] %v3360_v36  ;;  %v381_v36 = vmul.f32 %v377_v47, %v3370_v32  ;;  %v3380_v33 = vld [vmem:[%s4652_s1] sm:$0xff] }
 0x1e6   : > { %1425 = vrot.lane.b32.xlu1 %v2839_v6, %s2671_s19  ;;  %1404 = vrot.lane.b32.xlu0 %v2958_v29, %s2671_s19  ;;  %v361_v29 = vmul.f32 %v2794_v59, %v3380_v33 }
 0x1e7   : > { %v385_v6 = vrot.slane %v381_v36, 1 }
 0x1e8   : > { %v3372_v55 = vpop.permute.xlu1 %1064  ;;  %v3374_v60 = vpop.permute.xlu0 %1043  ;;  %v363_v28 = vadd.f32 %v361_v29, %v357_v12 }
 0x1e9   : > { %4902 = vst [vmem:[#allocation136_spill] sm:$0xff] %v3372_v55  ;;  %4903 = vst [vmem:[#allocation137_spill] sm:$0xff] %v3374_v60  ;;  %v402_v55 = vsel %vm376_vm3, %v3056_v48, %v3058_v49  ;;  %v378_v48 = vsel %vm376_vm3, %v3232_v46, %v3174_v42  ;;  %v3423_v46 = vld [vmem:[%s4652_s1 + $0x8] sm:$0xff] }
 0x1ea   : > { %1443 = vrot.lane.b32.xlu1 %v3039_v44, %s2672_s28  ;;  %1423 = vrot.lane.b32.xlu0 %v2822_v3, %s2671_s19  ;;  %v426_v44 = vsel %vm425_vm4, %v3180_v17, %v3238_v1  ;;  %v406_v3 = vmul.f32 %v402_v55, %v3380_v33  ;;  %v3414_v17 = vld [vmem:[%s4651_s0 + $0x8] sm:$0xff] }
 0x1eb   : > { %v430_v55 = vmul.f32 %v426_v44, %v3370_v32  ;;  %v382_v29 = vmul.f32 %v378_v48, %v3414_v17 }
 0x1ec   : > { %v3390_v60 = vpop.permute.xlu1 %1068  ;;  %v3392_v47 = vpop.permute.xlu0 %1047  ;;  %v410_v42 = vrot.slane %v406_v3, 1  ;;  %v403_v3 = vsel %vm376_vm3, %v3058_v49, %v3067_v51  ;;  %vm1020_vm3 = vcmask 769024  }
 0x1ed   : > { %4904 = vst [vmem:[#allocation138_spill] sm:$0xff] %v3390_v60  ;;  %4905 = vst [vmem:[#allocation139_spill] sm:$0xff] %v3392_v47  ;;  %v389_v47 = vadd.f32 %v385_v6, %v363_v28  ;;  %v449_v6 = vsel %vm425_vm4, %v3078_v54, %v3069_v52  ;;  %v358_v28 = vmul.f32 %v2937_v26, %v3414_v17 }
 0x1ee   : > { %1462 = vrot.lane.b32.xlu1 %v2849_v8, %s2672_s28  ;;  %1441 = vrot.lane.b32.xlu0 %v2965_v30, %s2672_s28  ;;  %v473_v54 = vsel %vm472_vm5, %v3192_v58, %v3244_v45  ;;  %v407_v51 = vmul.f32 %v403_v3, %v3423_v46  ;;  %v4915_v3 = vld [vmem:[#allocation54_spill] sm:$0xff] }
 0x1ef   : > { %v414_v48 = vadd.f32 %v410_v42, %v389_v47  ;;  %v477_v42 = vmul.f32 %v473_v54, %v3370_v32 }
 0x1f0   : > { %v3407_v60 = vpop.permute.xlu1 %1086  ;;  %v3409_v36 = vpop.permute.xlu0 %1066 }
 0x1f1   : > { %4906 = vst [vmem:[#allocation140_spill] sm:$0xff] %v3407_v60  ;;  %4907 = vst [vmem:[#allocation141_spill] sm:$0xff] %v3409_v36  ;;  %v434_v60 = vrot.slane %v430_v55, 2  ;;  %v362_v36 = vmul.f32 %v2799_v61, %v3423_v46 }
 0x1f2   : > { %1466 = vrot.lane.b32.xlu1 %v2859_v10, %s2672_s28  ;;  %1445 = vrot.lane.b32.xlu0 %v2972_v31, %s2672_s28  ;;  %v386_v31 = vrot.slane %v382_v29, 1  ;;  %v4911_v10 = vld [vmem:[#allocation82_spill] sm:$0xff] }
 0x1f3   : > { %v427_v49 = vsel %vm425_vm4, %v3238_v1, %v4911_v10  ;;  %v364_v47 = vadd.f32 %v362_v36, %v358_v28  ;;  %v438_v58 = vadd.f32 %v434_v60, %v414_v48  ;;  %v4914_v10 = vld [vmem:[#allocation40_spill] sm:$0xff]  ;;  %v4916_v36 = vld [vmem:[#allocation58_spill] sm:$0xff] }
 0x1f4   : > { %v3432_v44 = vpop.permute.xlu1 %1105  ;;  %v3434_v12 = vpop.permute.xlu0 %1084  ;;  %v496_v28 = vsel %vm472_vm5, %v4916_v36, %v4915_v3  ;;  %v4919_v48 = vld [vmem:[#allocation56_spill] sm:$0xff] }
 0x1f5   : > { %4908 = vst [vmem:[#allocation142_spill] sm:$0xff] %v3432_v44  ;;  %4909 = vst [vmem:[#allocation143_spill] sm:$0xff] %v3434_v12  ;;  %v4910_v44 = vld [vmem:[#allocation52_spill] sm:$0xff]  ;;  %v453_v12 = vmul.f32 %v449_v6, %v3380_v33  ;;  %v431_v6 = vmul.f32 %v427_v49, %v3414_v17  ;;  %v481_v49 = vrot.slane %v477_v42, 3  ;;  %v500_v36 = vmul.f32 %v496_v28, %v3380_v33  ;;  %v4925_v28 = vld [vmem:[#allocation57_spill] sm:$0xff] }
 0x1f6   : > { %1484 = vrot.lane.b32.xlu1 %v4910_v44, %s2673_s6  ;;  %1464 = vrot.lane.b32.xlu0 %v2832_v5, %s2672_s28  ;;  %v390_v44 = vadd.f32 %v386_v31, %v364_v47  ;;  %v411_v5 = vrot.slane %v407_v51, 1  ;;  %v450_v31 = vsel %vm425_vm4, %v3069_v52, %v4919_v48  ;;  %v4922_v52 = vld [vmem:[#allocation41_spill] sm:$0xff]  ;;  %v4926_v48 = vld [vmem:[#allocation62_spill] sm:$0xff]  ;;  %vm1049_vm4 = vcmask 760832  }
 0x1f7   : > { %v457_v1 = vrot.slane %v453_v12, 2  ;;  %v435_v47 = vrot.slane %v431_v6, 2 }
 0x1f8   : > { %v3453_v55 = vpop.permute.xlu1 %1109  ;;  %v3455_v29 = vpop.permute.xlu0 %1088  ;;  %v415_v12 = vadd.f32 %v411_v5, %v390_v44 }
 0x1f9   : > { %4912 = vst [vmem:[#allocation82_spill] sm:$0xff] %v3453_v55  ;;  %4913 = vst [vmem:[#allocation144_spill] sm:$0xff] %v3455_v29  ;;  %v461_v54 = vadd.f32 %v457_v1, %v438_v58  ;;  %v4920_v29 = vld [vmem:[#allocation87_spill] sm:$0xff]  ;;  %v454_v58 = vmul.f32 %v450_v31, %v3423_v46  ;;  %v543_v31 = vsel %vm519_vm6, %v4926_v48, %v4925_v28 }
 0x1fa   : > { %1503 = vrot.lane.b32.xlu1 %v2869_v13, %s2673_s6  ;;  %1482 = vrot.lane.b32.xlu0 %v4914_v10, %s2673_s6  ;;  %v520_v51 = vsel %vm519_vm6, %v4920_v29, %v3250_v57  ;;  %v439_v6 = vadd.f32 %v435_v47, %v415_v12  ;;  %v547_v48 = vmul.f32 %v543_v31, %v3380_v33  ;;  %v4934_v31 = vld [vmem:[#allocation66_spill] sm:$0xff] }
 0x1fb   : > { %v485_v42 = vadd.f32 %v481_v49, %v461_v54  ;;  %v524_v29 = vmul.f32 %v520_v51, %v3370_v32  ;;  %v4929_v49 = vld [vmem:[#allocation60_spill] sm:$0xff] }
 0x1fc   : > { %v3466_v55 = vpop.permute.xlu1 %1127  ;;  %v3468_v60 = vpop.permute.xlu0 %1107 }
 0x1fd   : > { %4917 = vst [vmem:[#allocation54_spill] sm:$0xff] %v3466_v55  ;;  %4918 = vst [vmem:[#allocation58_spill] sm:$0xff] %v3468_v60  ;;  %v4921_v55 = vld [vmem:[#allocation85_spill] sm:$0xff]  ;;  %v528_v47 = vrot.slane %v524_v29, 4 }
 0x1fe   : > { %1507 = vrot.lane.b32.xlu1 %v2879_v15, %s2673_s6  ;;  %v474_v60 = vsel %vm472_vm5, %v3244_v45, %v4921_v55  ;;  %1486 = vrot.lane.b32.xlu0 %v4922_v52, %s2673_s6  ;;  %v504_v45 = vrot.slane %v500_v36, 3  ;;  %v458_v55 = vrot.slane %v454_v58, 2 }
 0x1ff   : > { %v478_v1 = vmul.f32 %v474_v60, %v3414_v17  ;;  %v497_v60 = vsel %vm472_vm5, %v4915_v3, %v4929_v49  ;;  %vm1090_vm5 = vcmask 752640  }
 0x200   : > { %v3485_v5 = vpop.permute.xlu1 %1146  ;;  %v3487_v44 = vpop.permute.xlu0 %1125  ;;  %v508_v12 = vadd.f32 %v504_v45, %v485_v42  ;;  %v462_v51 = vadd.f32 %v458_v55, %v439_v6  ;;  %v501_v3 = vmul.f32 %v497_v60, %v3423_v46  ;;  %v551_v55 = vrot.slane %v547_v48, 4 }
 0x201   : > { %4923 = vst [vmem:[#allocation56_spill] sm:$0xff] %v3485_v5  ;;  %4924 = vst [vmem:[#allocation87_spill] sm:$0xff] %v3487_v44  ;;  %v482_v36 = vrot.slane %v478_v1, 3  ;;  %v4930_v44 = vld [vmem:[#allocation100_spill] sm:$0xff] }
 0x202   : > { %1525 = vrot.lane.b32.xlu1 %v3061_v50, %s2674_s7  ;;  %1505 = vrot.lane.b32.xlu0 %v2842_v7, %s2673_s6  ;;  %v4931_v7 = vld [vmem:[#allocation91_spill] sm:$0xff]  ;;  %v532_v29 = vadd.f32 %v528_v47, %v508_v12  ;;  %v4936_v12 = vld [vmem:[#allocation64_spill] sm:$0xff]  ;;  %s2692_s6 = smov 27  }
 0x203   : > { %v567_v58 = vsel %vm566_vm7, %v4931_v7, %v4930_v44  ;;  %v486_v1 = vadd.f32 %v482_v36, %v462_v51  ;;  %v544_v47 = vsel %vm519_vm6, %v4925_v28, %v4936_v12  ;;  %v4942_v12 = vld [vmem:[#allocation70_spill] sm:$0xff] }
 0x204   : > { %v3498_v5 = vpop.permute.xlu1 %1150  ;;  %v3500_v54 = vpop.permute.xlu0 %1129  ;;  %v571_v6 = vmul.f32 %v567_v58, %v3370_v32 }
 0x205   : > { %4927 = vst [vmem:[#allocation85_spill] sm:$0xff] %v3498_v5  ;;  %4928 = vst [vmem:[#allocation57_spill] sm:$0xff] %v3500_v54  ;;  %v4932_v5 = vld [vmem:[#allocation89_spill] sm:$0xff] }
 0x206   : > { %1544 = vrot.lane.b32.xlu1 %v2892_v19, %s2674_s7  ;;  %v521_v54 = vsel %vm519_vm6, %v3250_v57, %v4932_v5  ;;  %1523 = vrot.lane.b32.xlu0 %v2993_v34, %s2674_s7  ;;  %v505_v57 = vrot.slane %v501_v3, 3  ;;  %v4933_v5 = vld [vmem:[#allocation59_spill] sm:$0xff]  ;;  %v575_v51 = vrot.slane %v571_v6, 5  ;;  %vm1131_vm6 = vcmask 744448  }
 0x207   : > { %v525_v45 = vmul.f32 %v521_v54, %v3414_v17  ;;  %v590_v49 = vsel %vm566_vm7, %v4934_v31, %v4933_v5  ;;  %v555_v54 = vadd.f32 %v551_v55, %v532_v29  ;;  %v548_v29 = vmul.f32 %v544_v47, %v3423_v46 }
 0x208   : > { %v3517_v42 = vpop.permute.xlu1 %1168  ;;  %v3520_v7 = vpop.permute.xlu0 %1148  ;;  %v509_v58 = vadd.f32 %v505_v57, %v486_v1  ;;  %v594_v31 = vmul.f32 %v590_v49, %v3380_v33 }
 0x209   : > { %v529_v48 = vrot.slane %v525_v45, 4  ;;  %v579_v1 = vadd.f32 %v575_v51, %v555_v54  ;;  %v4943_v51 = vld [vmem:[#allocation68_spill] sm:$0xff] }
 0x20a   : > { %1548 = vrot.lane.b32.xlu1 %v2899_v20, %s2674_s7  ;;  %1527 = vrot.lane.b32.xlu0 %v3000_v35, %s2674_s7  ;;  %v4937_v20 = vld [vmem:[#allocation102_spill] sm:$0xff]  ;;  %v4938_v35 = vld [vmem:[#allocation95_spill] sm:$0xff]  ;;  %v598_v49 = vrot.slane %v594_v31, 5 }
 0x20b   : > { %v614_v3 = vsel %vm613_vm8, %v4938_v35, %v4937_v20  ;;  %v533_v55 = vadd.f32 %v529_v48, %v509_v58  ;;  %v591_v58 = vsel %vm566_vm7, %v4933_v5, %v4943_v51  ;;  %v4948_v51 = vld [vmem:[#allocation74_spill] sm:$0xff] }
 0x20c   : > { %v3530_v60 = vpop.permute.xlu1 %1187  ;;  %v3535_v36 = vpop.permute.xlu0 %1166  ;;  %v618_v35 = vmul.f32 %v614_v3, %v3370_v32  ;;  %v602_v48 = vadd.f32 %v598_v49, %v579_v1  ;;  %v595_v1 = vmul.f32 %v591_v58, %v3423_v46 }
 0x20d   : > { %4935 = vst [vmem:[#allocation62_spill] sm:$0xff] %v3530_v60  ;;  %v4939_v60 = vld [vmem:[#allocation93_spill] sm:$0xff] }
 0x20e   : > { %1566 = vrot.lane.b32.xlu1 %v3072_v53, %s2675_s8  ;;  %v568_v28 = vsel %vm566_vm7, %v4930_v44, %v4939_v60  ;;  %1546 = vrot.lane.b32.xlu0 %v2852_v9, %s2674_s7  ;;  %v552_v44 = vrot.slane %v548_v29, 4  ;;  %v4941_v60 = vld [vmem:[#allocation61_spill] sm:$0xff]  ;;  %v622_v3 = vrot.slane %v618_v35, 6  ;;  %v4946_v9 = vld [vmem:[#allocation96_spill] sm:$0xff]  ;;  %vm1172_vm7 = vcmask 736256   ;;  %s2693_s7 = smov 26  }
 0x20f   : > { %v572_v57 = vmul.f32 %v568_v28, %v3414_v17  ;;  %v637_v47 = vsel %vm613_vm8, %v4942_v12, %v4941_v60  ;;  %v615_v5 = vsel %vm613_vm8, %v4937_v20, %v4946_v9  ;;  %v599_v20 = vrot.slane %v595_v1, 5 }
 0x210   : > { %v3549_v6 = vpop.permute.xlu1 %1191  ;;  %v3552_v45 = vpop.permute.xlu0 %1170  ;;  %v556_v31 = vadd.f32 %v552_v44, %v533_v55  ;;  %v641_v12 = vmul.f32 %v637_v47, %v3380_v33  ;;  %v626_v55 = vadd.f32 %v622_v3, %v602_v48  ;;  %v619_v44 = vmul.f32 %v615_v5, %v3414_v17  ;;  %v4947_v47 = vld [vmem:[#allocation63_spill] sm:$0xff] }
 0x211   : > { %4940 = vst [vmem:[#allocation60_spill] sm:$0xff] %v3549_v6  ;;  %v4944_v6 = vld [vmem:[#allocation104_spill] sm:$0xff]  ;;  %v684_v58 = vsel %vm660_vm9, %v4948_v51, %v4947_v47 }
 0x212   : > { %1585 = vrot.lane.b32.xlu1 %v2906_v21, %s2675_s8  ;;  %1564 = vrot.lane.b32.xlu0 %v3007_v37, %s2675_s8  ;;  %v576_v21 = vrot.slane %v572_v57, 5  ;;  %v4945_v37 = vld [vmem:[#allocation97_spill] sm:$0xff]  ;;  %v645_v9 = vrot.slane %v641_v12, 6  ;;  %v623_v12 = vrot.slane %v619_v44, 6  ;;  %v688_v1 = vmul.f32 %v684_v58, %v3380_v33 }
 0x213   : > { %v661_v29 = vsel %vm660_vm9, %v4945_v37, %v4944_v6  ;;  %v4952_v58 = vld [vmem:[#allocation65_spill] sm:$0xff] }
 0x214   : > { %v3562_v54 = vpop.permute.xlu1 %1209  ;;  %v3567_v28 = vpop.permute.xlu0 %1189  ;;  %v665_v57 = vmul.f32 %v661_v29, %v3370_v32  ;;  %v580_v49 = vadd.f32 %v576_v21, %v556_v31  ;;  %v4949_v32 = vld [vmem:[#allocation72_spill] sm:$0xff]  ;;  %v649_v3 = vadd.f32 %v645_v9, %v626_v55  ;;  %v692_v33 = vrot.slane %v688_v1, 7 }
 0x215   : > { %v638_v21 = vsel %vm613_vm8, %v4941_v60, %v4949_v32  ;;  %vm1213_vm8 = vcmask 654336  }
 0x216   : > { %1589 = vrot.lane.b32.xlu1 %v2913_v22, %s2675_s8  ;;  %1568 = vrot.lane.b32.xlu0 %v3014_v38, %s2675_s8  ;;  %v669_v31 = vrot.slane %v665_v57, 7  ;;  %v603_v5 = vadd.f32 %v599_v20, %v580_v49  ;;  %v642_v60 = vmul.f32 %v638_v21, %v3423_v46  ;;  %v4951_v20 = vld [vmem:[#allocation78_spill] sm:$0xff] }
 0x217   : > { %v705_v32 = vsel %vm704_vm10, %v4952_v58, %v4951_v20 }
 0x218   : > { %v3581_v35 = vpop.permute.xlu1 %1228  ;;  %v3584_v37 = vpop.permute.xlu0 %1207  ;;  %v673_v57 = vadd.f32 %v669_v31, %v649_v3  ;;  %v627_v49 = vadd.f32 %v623_v12, %v603_v5 }
 0x21a   : > { %1607 = vrot.lane.b32.xlu1 %v3083_v56, %s2676_s9  ;;  %1587 = vrot.lane.b32.xlu0 %v2862_v11, %s2675_s8  ;;  %v4950_v11 = vld [vmem:[#allocation98_spill] sm:$0xff]  ;;  %v696_v31 = vadd.f32 %v692_v33, %v673_v57  ;;  %v4955_v57 = vld [vmem:[#allocation47_spill] sm:$0xff]  ;;  %v4966_v56 = vld [vmem:[#allocation81_spill] sm:$0xff]  ;;  %s2685_s8 = smov 43  }
 0x21b   : > { %v662_v51 = vsel %vm660_vm9, %v4944_v6, %v4950_v11  ;;  %v646_v11 = vrot.slane %v642_v60, 6  ;;  %v3622_v6 = vld [vmem:[%s4651_s0 + $0x10] sm:$0xff]  ;;  %v4956_v33 = vld [vmem:[#allocation106_spill] sm:$0xff] }
 0x21c   : > { %v3594_v48 = vpop.permute.xlu1 %1232  ;;  %v3599_v29 = vpop.permute.xlu0 %1211  ;;  %v666_v44 = vmul.f32 %v662_v51, %v3414_v17  ;;  %v4953_v17 = vld [vmem:[#allocation76_spill] sm:$0xff]  ;;  %v709_v51 = vmul.f32 %v705_v32, %v3622_v6 }
 0x21d   : > { %v685_v3 = vsel %vm660_vm9, %v4947_v47, %v4953_v17  ;;  %v650_v12 = vadd.f32 %v646_v11, %v627_v49  ;;  %v3642_v60 = vld [vmem:[%s4652_s1 + $0x10] sm:$0xff]  ;;  %v4954_v47 = vld [vmem:[#allocation51_spill] sm:$0xff]  ;;  %vm1254_vm9 = vcmask 646144  }
 0x21e   : > { %1626 = vrot.lane.b32.xlu1 %v2920_v23, %s2676_s9  ;;  %1605 = vrot.lane.b32.xlu0 %v3024_v40, %s2676_s9  ;;  %v670_v1 = vrot.slane %v666_v44, 7  ;;  %v719_v49 = vsel %vm704_vm10, %v4955_v57, %v4954_v47  ;;  %v689_v44 = vmul.f32 %v685_v3, %v3423_v46  ;;  %v4957_v11 = vld [vmem:[#allocation99_spill] sm:$0xff]  ;;  %v711_v17 = vadd.f32 %v709_v51, %v696_v31  ;;  %v4958_v3 = vld [vmem:[#allocation69_spill] sm:$0xff] }
 0x21f   : > { %v734_v58 = vsel %vm733_vm11, %v4957_v11, %v4956_v33  ;;  %v4959_v57 = vld [vmem:[#allocation79_spill] sm:$0xff]  ;;  %v3669_v31 = vld [vmem:[%s4651_s0 + $0x18] sm:$0xff] }
 0x220   : > { %v3610_v55 = vpop.permute.xlu1 %1250  ;;  %v3612_v9 = vpop.permute.xlu0 %1230  ;;  %v693_v46 = vrot.slane %v689_v44, 7  ;;  %v754_v11 = vsel %vm733_vm11, %v4959_v57, %v4958_v3  ;;  %v4962_v23 = vld [vmem:[#allocation103_spill] sm:$0xff] }
 0x221   : > { %v758_v44 = vmul.f32 %v754_v11, %v3642_v60 }
 0x222   : > { %1630 = vrot.lane.b32.xlu1 %v2927_v24, %s2676_s9  ;;  %1609 = vrot.lane.b32.xlu0 %v3036_v43, %s2676_s9  ;;  %v723_v43 = vmul.f32 %v719_v49, %v3642_v60  ;;  %v738_v24 = vmul.f32 %v734_v58, %v3622_v6 }
 0x224   : > { %v3627_v21 = vpop.permute.xlu1 %1269  ;;  %v3632_v5 = vpop.permute.xlu0 %1248  ;;  %v725_v51 = vadd.f32 %v723_v43, %v711_v17  ;;  %v742_v57 = vrot.slane %v738_v24, 1  ;;  %v4963_v17 = vld [vmem:[#allocation50_spill] sm:$0xff] }
 0x225   : > { %v720_v24 = vsel %vm704_vm10, %v4954_v47, %v4963_v17  ;;  %v4965_v17 = vld [vmem:[#allocation71_spill] sm:$0xff] }
 0x226   : > { %1648 = vrot.lane.b32.xlu1 %v2937_v26, %s2677_s18  ;;  %1628 = vrot.lane.b32.xlu0 %v2872_v14, %s2676_s9  ;;  %v674_v14 = vadd.f32 %v670_v1, %v650_v12  ;;  %v4960_v12 = vld [vmem:[#allocation67_spill] sm:$0xff]  ;;  %s2686_s9 = smov 42  }
 0x227   : > { %v706_v1 = vsel %vm704_vm10, %v4951_v20, %v4960_v12  ;;  %v746_v12 = vadd.f32 %v742_v57, %v725_v51  ;;  %vm1295_vm10 = vcmask 637952  }
 0x228   : > { %v3651_v32 = vpop.permute.xlu1 %1273  ;;  %v3653_v26 = vpop.permute.xlu0 %1252  ;;  %v697_v58 = vadd.f32 %v693_v46, %v674_v14  ;;  %v3690_v14 = vld [vmem:[%s4652_s1 + $0x18] sm:$0xff] }
 0x229   : > { %v4964_v46 = vld [vmem:[#allocation101_spill] sm:$0xff]  ;;  %v724_v47 = vmul.f32 %v720_v24, %v3690_v14 }
 0x22a   : > { %1661 = vrot.lane.b32.xlu1 %v2794_v59, %s2677_s18  ;;  %1646 = vrot.lane.b32.xlu0 %v2882_v16, %s2677_s18  ;;  %v710_v16 = vmul.f32 %v706_v1, %v3669_v31  ;;  %v4961_v59 = vld [vmem:[#allocation108_spill] sm:$0xff]  ;;  %v735_v11 = vsel %vm733_vm11, %v4956_v33, %v4964_v46  ;;  %v795_v33 = vsel %vm774_vm12, %v4966_v56, %v4965_v17 }
 0x22b   : > { %v775_v20 = vsel %vm774_vm12, %v4962_v23, %v4961_v59  ;;  %v762_v23 = vrot.slane %v758_v44, 1  ;;  %v739_v51 = vmul.f32 %v735_v11, %v3669_v31  ;;  %v799_v24 = vmul.f32 %v795_v33, %v3642_v60 }
 0x22c   : > { %v3664_v40 = vpop.permute.xlu1 %1291  ;;  %v3674_v49 = vpop.permute.xlu0 %1271 }
 0x22d   : > { %v766_v44 = vadd.f32 %v762_v23, %v746_v12  ;;  %v743_v11 = vrot.slane %v739_v51, 1 }
 0x22e   : > { %1665 = vrot.lane.b32.xlu1 %v2802_v62, %s2677_s18  ;;  %1650 = vrot.lane.b32.xlu0 %v2889_v18, %s2677_s18  ;;  %v712_v18 = vadd.f32 %v710_v16, %v697_v58  ;;  %v779_v62 = vmul.f32 %v775_v20, %v3622_v6  ;;  %v4968_v16 = vld [vmem:[#allocation80_spill] sm:$0xff] }
 0x22f   : > { %v755_v58 = vsel %vm733_vm11, %v4958_v3, %v4968_v16  ;;  %v803_v16 = vrot.slane %v799_v24, 2  ;;  %vm1336_vm11 = vcmask 629760  }
 0x230   : > { %v3685_v43 = vpop.permute.xlu1 %1310  ;;  %v3698_v1 = vpop.permute.xlu0 %1289  ;;  %v726_v20 = vadd.f32 %v724_v47, %v712_v18  ;;  %v759_v56 = vmul.f32 %v755_v58, %v3690_v14  ;;  %v4971_v18 = vld [vmem:[#allocation105_spill] sm:$0xff] }
 0x231   : > { %v776_v23 = vsel %vm774_vm12, %v4961_v59, %v4971_v18  ;;  %v4972_v58 = vld [vmem:[#allocation73_spill] sm:$0xff] }
 0x232   : > { %1677 = vrot.lane.b32.xlu1 %v3017_v39, %s2678_s29  ;;  %1663 = vrot.lane.b32.xlu0 %v2799_v61, %s2677_s18  ;;  %v783_v61 = vrot.slane %v779_v62, 2  ;;  %v4969_v39 = vld [vmem:[#allocation110_spill] sm:$0xff]  ;;  %v747_v62 = vadd.f32 %v743_v11, %v726_v20  ;;  %v780_v59 = vmul.f32 %v776_v23, %v3669_v31  ;;  %s2682_s18 = smov 46  }
 0x234   : > { %v3710_v57 = vpop.permute.xlu1 %1314  ;;  %v3715_v46 = vpop.permute.xlu0 %1293  ;;  %v787_v47 = vadd.f32 %v783_v61, %v766_v44  ;;  %v4975_v44 = vld [vmem:[#allocation83_spill] sm:$0xff]  ;;  %v784_v23 = vrot.slane %v780_v59, 2 }
 0x235   : > { %4967 = vst [vmem:[#allocation100_spill] sm:$0xff] %v3710_v57  ;;  %v4970_v57 = vld [vmem:[#allocation107_spill] sm:$0xff]  ;;  %v796_v20 = vsel %vm774_vm12, %v4965_v17, %v4975_v44  ;;  %vm1365_vm12 = vcmask 621568  }
 0x236   : > { %1696 = vrot.lane.b32.xlu1 %v2809_v63, %s2678_s29  ;;  %1675 = vrot.lane.b32.xlu0 %v2934_v25, %s2678_s29  ;;  %v816_v3 = vsel %vm815_vm13, %v4970_v57, %v4969_v39  ;;  %v763_v57 = vrot.slane %v759_v56, 1  ;;  %v4973_v25 = vld [vmem:[#allocation84_spill] sm:$0xff]  ;;  %v807_v11 = vadd.f32 %v803_v16, %v787_v47  ;;  %v800_v18 = vmul.f32 %v796_v20, %v3690_v14  ;;  %v4977_v17 = vld [vmem:[#allocation111_spill] sm:$0xff] }
 0x237   : > { %v820_v51 = vmul.f32 %v816_v3, %v3622_v6  ;;  %v836_v63 = vsel %vm815_vm13, %v4973_v25, %v4972_v58  ;;  %v4981_v20 = vld [vmem:[#allocation36_spill] sm:$0xff] }
 0x238   : > { %v3726_v12 = vpop.permute.xlu1 %1332  ;;  %v3731_v33 = vpop.permute.xlu0 %1312  ;;  %v767_v3 = vadd.f32 %v763_v57, %v747_v62  ;;  %v840_v56 = vmul.f32 %v836_v63, %v3642_v60  ;;  %v4979_v62 = vld [vmem:[#allocation109_spill] sm:$0xff] }
 0x239   : > { %v824_v25 = vrot.slane %v820_v51, 3  ;;  %v817_v57 = vsel %vm815_vm13, %v4969_v39, %v4979_v62  ;;  %v4987_v62 = vld [vmem:[#allocation18_spill] sm:$0xff] }
 0x23a   : > { %1700 = vrot.lane.b32.xlu1 %v2819_v2, %s2678_s29  ;;  %1679 = vrot.lane.b32.xlu0 %v2944_v27, %s2678_s29  ;;  %v4976_v27 = vld [vmem:[#allocation112_spill] sm:$0xff]  ;;  %v788_v51 = vadd.f32 %v784_v23, %v767_v3  ;;  %v821_v39 = vmul.f32 %v817_v57, %v3669_v31 }
 0x23b   : > { %v857_v47 = vsel %vm856_vm14, %v4977_v17, %v4976_v27  ;;  %v828_v44 = vadd.f32 %v824_v25, %v807_v11  ;;  %v804_v17 = vrot.slane %v800_v18, 2  ;;  %v4983_v2 = vld [vmem:[#allocation88_spill] sm:$0xff]  ;;  %v4985_v25 = vld [vmem:[#allocation86_spill] sm:$0xff] }
 0x23c   : > { %v3742_v61 = vpop.permute.xlu1 %1345  ;;  %v3747_v24 = vpop.permute.xlu0 %1330  ;;  %v861_v59 = vmul.f32 %v857_v47, %v3622_v6  ;;  %v837_v3 = vsel %vm815_vm13, %v4972_v58, %v4985_v25  ;;  %v4994_v25 = vld [vmem:[#allocation49_spill] sm:$0xff]  ;;  %vm1406_vm13 = vcmask 613376  }
 0x23d   : > { %4974 = vst [vmem:[#allocation91_spill] sm:$0xff] %v3742_v61  ;;  %v808_v47 = vadd.f32 %v804_v17, %v788_v51  ;;  %v841_v57 = vmul.f32 %v837_v3, %v3690_v14  ;;  %v4990_v61 = vld [vmem:[#allocation115_spill] sm:$0xff]  ;;  %v4992_v51 = vld [vmem:[#allocation113_spill] sm:$0xff] }
 0x23e   : > { %1718 = vrot.lane.b32.xlu1 %v3027_v41, %s2679_s30  ;;  %1698 = vrot.lane.b32.xlu0 %v2812_v0, %s2678_s29  ;;  %v844_v0 = vrot.slane %v840_v56, 3  ;;  %v4982_v41 = vld [vmem:[#allocation75_spill] sm:$0xff]  ;;  %v858_v17 = vsel %vm856_vm14, %v4976_v27, %v4992_v51  ;;  %s2688_s29 = smov 31  }
 0x23f   : > { %v862_v27 = vmul.f32 %v858_v17, %v3669_v31 }
 0x240   : > { %v3758_v16 = vpop.permute.xlu1 %1349  ;;  %v3763_v63 = vpop.permute.xlu0 %1334  ;;  %v848_v23 = vadd.f32 %v844_v0, %v828_v44 }
 0x241   : > { %4978 = vst [vmem:[#allocation89_spill] sm:$0xff] %v3758_v16  ;;  %4980 = vst [vmem:[#allocation59_spill] sm:$0xff] %v3763_v63  ;;  %v877_v16 = vsel %vm856_vm14, %v4983_v2, %v4982_v41  ;;  %v4988_v2 = vld [vmem:[#allocation37_spill] sm:$0xff]  ;;  %v4989_v63 = vld [vmem:[#allocation114_spill] sm:$0xff] }
 0x242   : > { %1737 = vrot.lane.b32.xlu1 %v2829_v4, %s2679_s30  ;;  %1716 = vrot.lane.b32.xlu0 %v4981_v20, %s2679_s30  ;;  %v881_v18 = vmul.f32 %v877_v16, %v3642_v60  ;;  %v865_v20 = vrot.slane %v861_v59, 4  ;;  %v825_v4 = vrot.slane %v821_v39, 3  ;;  %v898_v0 = vsel %vm897_vm15, %v4990_v61, %v4989_v63  ;;  %v4995_v61 = vld [vmem:[#allocation15_spill] sm:$0xff] }
 0x243   : > { %v902_v39 = vmul.f32 %v898_v0, %v3622_v6 }
 0x244   : > { %v3774_v11 = vpop.permute.xlu1 %1361  ;;  %v3779_v56 = vpop.permute.xlu0 %1347  ;;  %v869_v44 = vadd.f32 %v865_v20, %v848_v23  ;;  %v829_v59 = vadd.f32 %v825_v4, %v808_v47  ;;  %v885_v3 = vrot.slane %v881_v18, 4  ;;  %v4996_v20 = vld [vmem:[#allocation77_spill] sm:$0xff]  ;;  %v4997_v23 = vld [vmem:[#allocation92_spill] sm:$0xff]  ;;  %v4999_v4 = vld [vmem:[#allocation90_spill] sm:$0xff] }
 0x245   : > { %4984 = vst [vmem:[#allocation66_spill] sm:$0xff] %v3774_v11  ;;  %4986 = vst [vmem:[#allocation64_spill] sm:$0xff] %v3779_v56  ;;  %v878_v47 = vsel %vm856_vm14, %v4982_v41, %v4999_v4  ;;  %v5002_v56 = vld [vmem:[#allocation119_spill] sm:$0xff]  ;;  %v906_v17 = vrot.slane %v902_v39, 5  ;;  %vm1447_vm14 = vcmask 605184  }
 0x246   : > { %1741 = vrot.lane.b32.xlu1 %v4987_v62, %s2679_s30  ;;  %1720 = vrot.lane.b32.xlu0 %v4988_v2, %s2679_s30  ;;  %v845_v2 = vrot.slane %v841_v57, 3  ;;  %v918_v62 = vsel %vm897_vm15, %v4997_v23, %v4996_v20  ;;  %v889_v18 = vadd.f32 %v885_v3, %v869_v44  ;;  %v882_v41 = vmul.f32 %v878_v47, %v3690_v14  ;;  %v5004_v44 = vld [vmem:[#allocation123_spill] sm:$0xff] }
 0x247   : > { %v922_v23 = vmul.f32 %v918_v62, %v3642_v60 }
 0x248   : > { %v3790_v58 = vpop.permute.xlu1 %1380  ;;  %v3795_v16 = vpop.permute.xlu0 %1359  ;;  %v849_v0 = vadd.f32 %v845_v2, %v829_v59  ;;  %v866_v2 = vrot.slane %v862_v27, 4  ;;  %v5005_v59 = vld [vmem:[#allocation118_spill] sm:$0xff]  ;;  %v910_v4 = vadd.f32 %v906_v17, %v889_v18  ;;  %v886_v18 = vrot.slane %v882_v41, 4  ;;  %v5013_v17 = vld [vmem:[#allocation124_spill] sm:$0xff] }
 0x249   : > { %4991 = vst [vmem:[#allocation102_spill] sm:$0xff] %v3790_v58  ;;  %4993 = vst [vmem:[#allocation95_spill] sm:$0xff] %v3795_v16  ;;  %v5001_v58 = vld [vmem:[#allocation116_spill] sm:$0xff]  ;;  %v5010_v27 = vld [vmem:[#allocation22_spill] sm:$0xff]  ;;  %v926_v47 = vrot.slane %v922_v23, 5 }
 0x24a   : > { %1759 = vrot.lane.b32.xlu1 %v4994_v25, %s2680_s4  ;;  %1739 = vrot.lane.b32.xlu0 %v4995_v61, %s2679_s30  ;;  %v939_v57 = vsel %vm938_vm1, %v5002_v56, %v5001_v58  ;;  %v5003_v61 = vld [vmem:[#allocation117_spill] sm:$0xff]  ;;  %v959_v56 = vsel %vm938_vm1, %v5005_v59, %v5004_v44  ;;  %s2689_s30 = smov 30  }
 0x24b   : > { %v943_v62 = vmul.f32 %v939_v57, %v3622_v6  ;;  %v963_v59 = vmul.f32 %v959_v56, %v3642_v60  ;;  %v5012_v57 = vld [vmem:[#allocation129_spill] sm:$0xff] }
 0x24c   : > { %v3806_v51 = vpop.permute.xlu1 %1384  ;;  %v3811_v25 = vpop.permute.xlu0 %1363 }
 0x24d   : > { %4998 = vst [vmem:[#allocation93_spill] sm:$0xff] %v3806_v51  ;;  %5000 = vst [vmem:[#allocation61_spill] sm:$0xff] %v3811_v25  ;;  %v899_v51 = vsel %vm897_vm15, %v4989_v63, %v5003_v61  ;;  %v5008_v61 = vld [vmem:[#allocation122_spill] sm:$0xff]  ;;  %v5009_v25 = vld [vmem:[#allocation125_spill] sm:$0xff]  ;;  %v947_v16 = vrot.slane %v943_v62, 6 }
 0x24e   : > { %1778 = vrot.lane.b32.xlu1 %v2849_v8, %s2680_s4  ;;  %1757 = vrot.lane.b32.xlu0 %v2965_v30, %s2680_s4  ;;  %v870_v8 = vadd.f32 %v866_v2, %v849_v0  ;;  %v903_v63 = vmul.f32 %v899_v51, %v3669_v31  ;;  %v980_v30 = vsel %vm979_vm2, %v5009_v25, %v5008_v61  ;;  %v5015_v51 = vld [vmem:[#allocation94_spill] sm:$0xff] }
 0x24f   : > { %v1000_v0 = vsel %vm979_vm2, %v5013_v17, %v5012_v57  ;;  %v919_v25 = vsel %vm897_vm15, %v4996_v20, %v5015_v51  ;;  %v984_v23 = vmul.f32 %v980_v30, %v3622_v6  ;;  %v5017_v17 = vld [vmem:[#allocation52_spill] sm:$0xff]  ;;  %v5019_v30 = vld [vmem:[#allocation17_spill] sm:$0xff]  ;;  %v3884_v51 = vld [vmem:[%s4651_s0 + $0x20] sm:$0xff]  ;;  %vm1488_vm15 = vcmask 523264  }
 0x250   : > { %v3828_v3 = vpop.permute.xlu1 %1402  ;;  %v3831_v39 = vpop.permute.xlu0 %1382  ;;  %v890_v56 = vadd.f32 %v886_v18, %v870_v8  ;;  %v907_v11 = vrot.slane %v903_v63, 5  ;;  %v1004_v62 = vmul.f32 %v1000_v0, %v3642_v60  ;;  %v923_v8 = vmul.f32 %v919_v25, %v3690_v14  ;;  %v5025_v25 = vld [vmem:[#allocation131_spill] sm:$0xff] }
 0x251   : > { %5006 = vst [vmem:[#allocation70_spill] sm:$0xff] %v3828_v3  ;;  %5007 = vst [vmem:[#allocation68_spill] sm:$0xff] %v3831_v39  ;;  %v5011_v3 = vld [vmem:[#allocation39_spill] sm:$0xff]  ;;  %v930_v39 = vadd.f32 %v926_v47, %v910_v4  ;;  %v967_v4 = vrot.slane %v963_v59, 6 }
 0x252   : > { %1782 = vrot.lane.b32.xlu1 %v5010_v27, %s2680_s4  ;;  %1761 = vrot.lane.b32.xlu0 %v5011_v3, %s2680_s4  ;;  %v5016_v3 = vld [vmem:[#allocation121_spill] sm:$0xff]  ;;  %v911_v18 = vadd.f32 %v907_v11, %v890_v56  ;;  %v5022_v59 = vld [vmem:[#allocation127_spill] sm:$0xff]  ;;  %v927_v11 = vrot.slane %v923_v8, 5 }
 0x253   : > { %v940_v41 = vsel %vm938_vm1, %v5001_v58, %v5016_v3  ;;  %v951_v63 = vadd.f32 %v947_v16, %v930_v39  ;;  %v988_v3 = vrot.slane %v984_v23, 7  ;;  %v981_v60 = vsel %vm979_vm2, %v5008_v61, %v5022_v59  ;;  %v5024_v61 = vld [vmem:[#allocation128_spill] sm:$0xff] }
 0x254   : > { %v3845_v2 = vpop.permute.xlu1 %1421  ;;  %v3851_v27 = vpop.permute.xlu0 %1400  ;;  %v944_v58 = vmul.f32 %v940_v41, %v3669_v31  ;;  %v1008_v39 = vrot.slane %v1004_v62, 7  ;;  %v1021_v23 = vsel %vm1020_vm3, %v5025_v25, %v5024_v61  ;;  %v5028_v62 = vld [vmem:[#allocation137_spill] sm:$0xff]  ;;  %v931_v59 = vadd.f32 %v927_v11, %v911_v18 }
 0x255   : > { %5014 = vst [vmem:[#allocation104_spill] sm:$0xff] %v3845_v2  ;;  %v5018_v2 = vld [vmem:[#allocation120_spill] sm:$0xff]  ;;  %v971_v0 = vadd.f32 %v967_v4, %v951_v63  ;;  %v5027_v4 = vld [vmem:[#allocation134_spill] sm:$0xff]  ;;  %v5031_v18 = vld [vmem:[#allocation141_spill] sm:$0xff] }
 0x256   : > { %1800 = vrot.lane.b32.xlu1 %v5017_v17, %s2681_s5  ;;  %v960_v20 = vsel %vm938_vm1, %v5004_v44, %v5018_v2  ;;  %1780 = vrot.lane.b32.xlu0 %v5019_v30, %s2680_s4  ;;  %v5023_v2 = vld [vmem:[#allocation126_spill] sm:$0xff]  ;;  %v948_v41 = vrot.slane %v944_v58, 6  ;;  %v1050_v63 = vsel %vm1049_vm4, %v5028_v62, %v5027_v4  ;;  %v1025_v58 = vmul.f32 %v1021_v23, %v3884_v51  ;;  %v5035_v62 = vld [vmem:[#allocation143_spill] sm:$0xff]  ;;  %s2690_s4 = smov 29  }
 0x257   : > { %v964_v44 = vmul.f32 %v960_v20, %v3690_v14  ;;  %v1001_v16 = vsel %vm979_vm2, %v5012_v57, %v5023_v2  ;;  %v992_v20 = vadd.f32 %v988_v3, %v971_v0  ;;  %v985_v57 = vmul.f32 %v981_v60, %v3669_v31  ;;  %v3904_v31 = vld [vmem:[%s4652_s1 + $0x20] sm:$0xff]  ;;  %v5029_v3 = vld [vmem:[#allocation135_spill] sm:$0xff] }
 0x258   : > { %v3865_v6 = vpop.permute.xlu1 %1425  ;;  %v3868_v47 = vpop.permute.xlu0 %1404  ;;  %v5030_v60 = vld [vmem:[#allocation130_spill] sm:$0xff]  ;;  %v952_v11 = vadd.f32 %v948_v41, %v931_v59  ;;  %v5038_v41 = vld [vmem:[#allocation139_spill] sm:$0xff]  ;;  %vm1529_vm1 = vcmask 515072   ;;  %vm1570_vm2 = vcmask 506880  }
 0x259   : > { %5020 = vst [vmem:[#allocation97_spill] sm:$0xff] %v3865_v6  ;;  %5021 = vst [vmem:[#allocation96_spill] sm:$0xff] %v3868_v47  ;;  %v968_v2 = vrot.slane %v964_v44, 6  ;;  %v1012_v25 = vadd.f32 %v1008_v39, %v992_v20  ;;  %v1035_v0 = vsel %vm1020_vm3, %v5030_v60, %v5029_v3  ;;  %v5032_v44 = vld [vmem:[#allocation136_spill] sm:$0xff]  ;;  %v989_v23 = vrot.slane %v985_v57, 7  ;;  %v5040_v6 = vld [vmem:[#allocation142_spill] sm:$0xff] }
 0x25a   : > { %1819 = vrot.lane.b32.xlu1 %v2869_v13, %s2681_s5  ;;  %1798 = vrot.lane.b32.xlu0 %v4914_v10, %s2681_s5  ;;  %v1005_v10 = vmul.f32 %v1001_v16, %v3690_v14  ;;  %v1070_v14 = vsel %vm1049_vm4, %v5032_v44, %v5031_v18  ;;  %v1054_v16 = vmul.f32 %v1050_v63, %v3884_v51  ;;  %v5034_v20 = vld [vmem:[#allocation140_spill] sm:$0xff]  ;;  %v3925_v44 = vld [vmem:[%s4651_s0 + $0x28] sm:$0xff] }
 0x25b   : > { %v1039_v13 = vmul.f32 %v1035_v0, %v3904_v31  ;;  %v1051_v57 = vsel %vm1049_vm4, %v5027_v4, %v5038_v41  ;;  %v1074_v59 = vmul.f32 %v1070_v14, %v3904_v31  ;;  %v1027_v17 = vadd.f32 %v1025_v58, %v1012_v25  ;;  %v3945_v4 = vld [vmem:[%s4652_s1 + $0x28] sm:$0xff]  ;;  %v5042_v0 = vld [vmem:[#allocation132_spill] sm:$0xff] }
 0x25c   : > { %v3889_v56 = vpop.permute.xlu1 %1443  ;;  %v3895_v8 = vpop.permute.xlu0 %1423  ;;  %v1009_v30 = vrot.slane %v1005_v10, 7  ;;  %v1036_v14 = vsel %vm1020_vm3, %v5029_v3, %v5042_v0  ;;  %v1058_v41 = vrot.slane %v1054_v16, 1  ;;  %v5046_v0 = vld [vmem:[#allocation144_spill] sm:$0xff] }
 0x25d   : > { %5026 = vst [vmem:[#allocation63_spill] sm:$0xff] %v3889_v56  ;;  %v1041_v3 = vadd.f32 %v1039_v13, %v1027_v17  ;;  %v1078_v16 = vrot.slane %v1074_v59, 1  ;;  %v5048_v59 = vld [vmem:[#allocation82_spill] sm:$0xff] }
 0x25e   : > { %1823 = vrot.lane.b32.xlu1 %v2879_v15, %s2681_s5  ;;  %1802 = vrot.lane.b32.xlu0 %v4922_v52, %s2681_s5  ;;  %v1091_v15 = vsel %vm1090_vm5, %v5035_v62, %v5034_v20  ;;  %v5037_v52 = vld [vmem:[#allocation133_spill] sm:$0xff]  ;;  %v972_v62 = vadd.f32 %v968_v2, %v952_v11  ;;  %v5043_v2 = vld [vmem:[#allocation138_spill] sm:$0xff] }
 0x25f   : > { %v1022_v63 = vsel %vm1020_vm3, %v5024_v61, %v5037_v52  ;;  %v5041_v61 = vld [vmem:[#allocation19_spill] sm:$0xff]  ;;  %v1071_v10 = vsel %vm1049_vm4, %v5031_v18, %v5043_v2  ;;  %v1095_v25 = vmul.f32 %v1091_v15, %v3884_v51  ;;  %v1092_v18 = vsel %vm1090_vm5, %v5034_v20, %v5046_v0 }
 0x260   : > { %v3915_v39 = vpop.permute.xlu1 %1462  ;;  %v3920_v60 = vpop.permute.xlu0 %1441  ;;  %v993_v58 = vadd.f32 %v989_v23, %v972_v62  ;;  %v1026_v11 = vmul.f32 %v1022_v63, %v3925_v44  ;;  %v1040_v63 = vmul.f32 %v1036_v14, %v3945_v4  ;;  %v1062_v17 = vadd.f32 %v1058_v41, %v1041_v3  ;;  %v5049_v3 = vld [vmem:[#allocation57_spill] sm:$0xff] }
 0x261   : > { %5033 = vst [vmem:[#allocation74_spill] sm:$0xff] %v3915_v39  ;;  %5036 = vst [vmem:[#allocation72_spill] sm:$0xff] %v3920_v60  ;;  %v5039_v39 = vld [vmem:[#allocation58_spill] sm:$0xff]  ;;  %v5045_v60 = vld [vmem:[#allocation87_spill] sm:$0xff]  ;;  %v1099_v20 = vrot.slane %v1095_v25, 2  ;;  %vm1611_vm3 = vcmask 498688  }
 0x262   : > { %1841 = vrot.lane.b32.xlu1 %v3061_v50, %s2682_s18  ;;  %v1111_v52 = vsel %vm1090_vm5, %v5040_v6, %v5039_v39  ;;  %1821 = vrot.lane.b32.xlu0 %v5041_v61, %s2681_s5  ;;  %v1055_v61 = vmul.f32 %v1051_v57, %v3925_v44  ;;  %v5044_v50 = vld [vmem:[#allocation54_spill] sm:$0xff]  ;;  %v1013_v23 = vadd.f32 %v1009_v30, %v993_v58  ;;  %vm1652_vm4 = vcmask 490496   ;;  %s2691_s5 = smov 28  }
 0x263   : > { %v1132_v56 = vsel %vm1131_vm6, %v5045_v60, %v5044_v50  ;;  %v1115_v15 = vmul.f32 %v1111_v52, %v3904_v31  ;;  %v1075_v57 = vmul.f32 %v1071_v10, %v3945_v4  ;;  %v5047_v60 = vld [vmem:[#allocation56_spill] sm:$0xff]  ;;  %v1112_v62 = vsel %vm1090_vm5, %v5039_v39, %v5048_v59 }
 0x264   : > { %v3954_v6 = vpop.permute.xlu1 %1466  ;;  %v3961_v47 = vpop.permute.xlu0 %1445  ;;  %v1152_v13 = vsel %vm1131_vm6, %v5047_v60, %v3520_v7  ;;  %v1136_v52 = vmul.f32 %v1132_v56, %v3884_v51  ;;  %v1028_v14 = vadd.f32 %v1026_v11, %v1013_v23  ;;  %v1059_v2 = vrot.slane %v1055_v61, 1  ;;  %v5050_v11 = vld [vmem:[#allocation29_spill] sm:$0xff] }
 0x265   : > { %v1096_v10 = vmul.f32 %v1092_v18, %v3925_v44  ;;  %v1173_v58 = vsel %vm1172_vm7, %v3535_v36, %v3517_v42  ;;  %v1082_v41 = vadd.f32 %v1078_v16, %v1062_v17  ;;  %v1119_v25 = vrot.slane %v1115_v15, 2  ;;  %v5051_v36 = vld [vmem:[#allocation62_spill] sm:$0xff] }
 0x266   : > { %1860 = vrot.lane.b32.xlu1 %v2892_v19, %s2682_s18  ;;  %1839 = vrot.lane.b32.xlu0 %v2993_v34, %s2682_s18  ;;  %v1133_v39 = vsel %vm1131_vm6, %v5044_v50, %v5049_v3  ;;  %v1156_v56 = vmul.f32 %v1152_v13, %v3904_v31  ;;  %v1042_v61 = vadd.f32 %v1040_v63, %v1028_v14  ;;  %v1079_v18 = vrot.slane %v1075_v57, 1  ;;  %v5052_v16 = vld [vmem:[#allocation42_spill] sm:$0xff]  ;;  %v5053_v50 = vld [vmem:[#allocation85_spill] sm:$0xff] }
 0x267   : > { %v1116_v23 = vmul.f32 %v1112_v62, %v3945_v4  ;;  %v1193_v60 = vsel %vm1172_vm7, %v5051_v36, %v3567_v28  ;;  %v1103_v15 = vadd.f32 %v1099_v20, %v1082_v41  ;;  %v1140_v17 = vrot.slane %v1136_v52, 3 }
 0x268   : > { %v3980_v30 = vpop.permute.xlu1 %1484  ;;  %v3986_v0 = vpop.permute.xlu0 %1464  ;;  %v1153_v13 = vsel %vm1131_vm6, %v3520_v7, %v5053_v50  ;;  %v1177_v59 = vmul.f32 %v1173_v58, %v3884_v51  ;;  %v1063_v63 = vadd.f32 %v1059_v2, %v1042_v61  ;;  %v1100_v57 = vrot.slane %v1096_v10, 2 }
 0x269   : > { %v1137_v62 = vmul.f32 %v1133_v39, %v3925_v44  ;;  %v1214_v14 = vsel %vm1213_vm8, %v3584_v37, %v3562_v54  ;;  %v1123_v20 = vadd.f32 %v1119_v25, %v1103_v15  ;;  %v1160_v52 = vrot.slane %v1156_v56, 3  ;;  %v5054_v25 = vld [vmem:[#allocation21_spill] sm:$0xff] }
 0x26a   : > { %1864 = vrot.lane.b32.xlu1 %v5050_v11, %s2682_s18  ;;  %1843 = vrot.lane.b32.xlu0 %v5052_v16, %s2682_s18  ;;  %v1174_v7 = vsel %vm1172_vm7, %v3517_v42, %v3552_v45  ;;  %v1197_v58 = vmul.f32 %v1193_v60, %v3904_v31  ;;  %v1083_v2 = vadd.f32 %v1079_v18, %v1063_v63  ;;  %v1120_v10 = vrot.slane %v1116_v23, 2  ;;  %v5055_v42 = vld [vmem:[#allocation60_spill] sm:$0xff]  ;;  %v5056_v63 = vld [vmem:[#allocation30_spill] sm:$0xff] }
 0x26b   : > { %v1157_v41 = vmul.f32 %v1153_v13, %v3945_v4  ;;  %v1234_v37 = vsel %vm1213_vm8, %v3581_v35, %v3612_v9  ;;  %v1144_v39 = vadd.f32 %v1140_v17, %v1123_v20  ;;  %v1181_v56 = vrot.slane %v1177_v59, 4  ;;  %v5057_v20 = vld [vmem:[#allocation43_spill] sm:$0xff] }
 0x26c   : > { %v4004_v3 = vpop.permute.xlu1 %1503  ;;  %v4010_v36 = vpop.permute.xlu0 %1482  ;;  %v1194_v45 = vsel %vm1172_vm7, %v3567_v28, %v5055_v42  ;;  %v1218_v61 = vmul.f32 %v1214_v14, %v3884_v51  ;;  %v1104_v18 = vadd.f32 %v1100_v57, %v1083_v2  ;;  %v1141_v23 = vrot.slane %v1137_v62, 3 }
 0x26d   : > { %v1178_v15 = vmul.f32 %v1174_v7, %v3925_v44  ;;  %v1255_v35 = vsel %vm1254_vm9, %v3632_v5, %v3610_v55  ;;  %v1164_v17 = vadd.f32 %v1160_v52, %v1144_v39  ;;  %v1201_v13 = vrot.slane %v1197_v58, 4 }
 0x26e   : > { %1882 = vrot.lane.b32.xlu1 %v3072_v53, %s2683_s23  ;;  %1862 = vrot.lane.b32.xlu0 %v5054_v25, %s2682_s18  ;;  %v1215_v28 = vsel %vm1213_vm8, %v3562_v54, %v3599_v29  ;;  %v1238_v59 = vmul.f32 %v1234_v37, %v3904_v31  ;;  %v1124_v57 = vadd.f32 %v1120_v10, %v1104_v18  ;;  %v1161_v62 = vrot.slane %v1157_v41, 3 }
 0x26f   : > { %v1198_v14 = vmul.f32 %v1194_v45, %v3945_v4  ;;  %v1275_v5 = vsel %vm1254_vm9, %v3627_v21, %v3674_v49  ;;  %v1185_v52 = vadd.f32 %v1181_v56, %v1164_v17  ;;  %v1222_v7 = vrot.slane %v1218_v61, 5 }
 0x270   : > { %v4028_v60 = vpop.permute.xlu1 %1507  ;;  %v4034_v50 = vpop.permute.xlu0 %1486  ;;  %v1235_v54 = vsel %vm1213_vm8, %v3612_v9, %v3594_v48  ;;  %v1259_v29 = vmul.f32 %v1255_v35, %v3884_v51  ;;  %v1145_v2 = vadd.f32 %v1141_v23, %v1124_v57  ;;  %v1182_v10 = vrot.slane %v1178_v15, 4 }
 0x271   : > { %v1219_v41 = vmul.f32 %v1215_v28, %v3925_v44  ;;  %v1296_v21 = vsel %vm1295_vm10, %v3698_v1, %v3664_v40  ;;  %v1205_v39 = vadd.f32 %v1201_v13, %v1185_v52  ;;  %v1242_v56 = vrot.slane %v1238_v59, 5 }
 0x272   : > { %1901 = vrot.lane.b32.xlu1 %v5056_v63, %s2683_s23  ;;  %1880 = vrot.lane.b32.xlu0 %v5057_v20, %s2683_s23  ;;  %v1256_v48 = vsel %vm1254_vm9, %v3610_v55, %v3653_v26  ;;  %v1279_v9 = vmul.f32 %v1275_v5, %v3904_v31  ;;  %v1165_v42 = vadd.f32 %v1161_v62, %v1145_v2  ;;  %v1202_v45 = vrot.slane %v1198_v14, 4  ;;  %v5058_v62 = vld [vmem:[#allocation55_spill] sm:$0xff]  ;;  %v5060_v2 = vld [vmem:[#allocation100_spill] sm:$0xff] }
 0x273   : > { %v1239_v61 = vmul.f32 %v1235_v54, %v3945_v4  ;;  %v1316_v1 = vsel %vm1295_vm10, %v3685_v43, %v3731_v33  ;;  %v1226_v18 = vadd.f32 %v1222_v7, %v1205_v39  ;;  %v1263_v23 = vrot.slane %v1259_v29, 6  ;;  %v5059_v5 = vld [vmem:[#allocation23_spill] sm:$0xff] }
 0x274   : > { %v4052_v58 = vpop.permute.xlu1 %1525  ;;  %v4058_v37 = vpop.permute.xlu0 %1505  ;;  %v1276_v26 = vsel %vm1254_vm9, %v3674_v49, %v3651_v32  ;;  %v1300_v55 = vmul.f32 %v1296_v21, %v3884_v51  ;;  %v1186_v35 = vadd.f32 %v1182_v10, %v1165_v42  ;;  %v1223_v17 = vrot.slane %v1219_v41, 5  ;;  %v5061_v39 = vld [vmem:[#allocation31_spill] sm:$0xff]  ;;  %v5062_v42 = vld [vmem:[#allocation45_spill] sm:$0xff] }
 0x275   : > { %v1260_v13 = vmul.f32 %v1256_v48, %v3925_v44  ;;  %v1246_v43 = vadd.f32 %v1242_v56, %v1226_v18  ;;  %v1283_v59 = vrot.slane %v1279_v9, 6  ;;  %v1320_v57 = vmul.f32 %v1316_v1, %v3904_v31  ;;  %v4103_v9 = vld [vmem:[%s4651_s0 + $0x30] sm:$0xff]  ;;  %v5064_v1 = vld [vmem:[#allocation95_spill] sm:$0xff] }
 0x276   : > { %1905 = vrot.lane.b32.xlu1 %v2913_v22, %s2683_s23  ;;  %1884 = vrot.lane.b32.xlu0 %v3014_v38, %s2683_s23  ;;  %v1206_v14 = vadd.f32 %v1202_v45, %v1186_v35  ;;  %v1243_v32 = vrot.slane %v1239_v61, 5  ;;  %v1280_v49 = vmul.f32 %v1276_v26, %v3945_v4  ;;  %v1297_v51 = vsel %vm1295_vm10, %v3664_v40, %v3715_v46  ;;  %v5063_v61 = vld [vmem:[#allocation66_spill] sm:$0xff]  ;;  %v5065_v35 = vld [vmem:[#allocation64_spill] sm:$0xff] }
 0x277   : > { %v1267_v52 = vadd.f32 %v1263_v23, %v1246_v43  ;;  %v1304_v7 = vrot.slane %v1300_v55, 7  ;;  %v1264_v29 = vrot.slane %v1260_v13, 6  ;;  %v1317_v10 = vsel %vm1295_vm10, %v3731_v33, %v5060_v2  ;;  %v4119_v55 = vld [vmem:[%s4652_s1 + $0x30] sm:$0xff]  ;;  %v5071_v2 = vld [vmem:[#allocation59_spill] sm:$0xff] }
 0x278   : > { %v4076_v15 = vpop.permute.xlu1 %1544  ;;  %v4079_v28 = vpop.permute.xlu0 %1523  ;;  %v1227_v31 = vadd.f32 %v1223_v17, %v1206_v14  ;;  %v1301_v40 = vmul.f32 %v1297_v51, %v3925_v44  ;;  %v1324_v46 = vrot.slane %v1320_v57, 7  ;;  %v1284_v48 = vrot.slane %v1280_v49, 6  ;;  %v5067_v57 = vld [vmem:[#allocation68_spill] sm:$0xff]  ;;  %v5068_v14 = vld [vmem:[#allocation102_spill] sm:$0xff] }
 0x279   : > { %v1287_v21 = vadd.f32 %v1283_v59, %v1267_v52  ;;  %v1337_v33 = vsel %vm1336_vm11, %v3747_v24, %v3726_v12  ;;  %v1321_v44 = vmul.f32 %v1317_v10, %v3945_v4  ;;  %v1366_v18 = vsel %vm1365_vm12, %v5064_v1, %v5063_v61  ;;  %v5066_v24 = vld [vmem:[#allocation91_spill] sm:$0xff]  ;;  %v5069_v49 = vld [vmem:[#allocation32_spill] sm:$0xff] }
 0x27a   : > { %1923 = vrot.lane.b32.xlu1 %v5058_v62, %s2684_s26  ;;  %1903 = vrot.lane.b32.xlu0 %v5059_v5, %s2683_s23  ;;  %v1247_v56 = vadd.f32 %v1243_v32, %v1227_v31  ;;  %v1351_v17 = vsel %vm1336_vm11, %v5066_v24, %v5065_v35  ;;  %v1305_v4 = vrot.slane %v1301_v40, 7  ;;  %v1341_v59 = vmul.f32 %v1337_v33, %v4103_v9  ;;  %v5072_v40 = vld [vmem:[#allocation61_spill] sm:$0xff] }
 0x27b   : > { %v1308_v45 = vadd.f32 %v1304_v7, %v1287_v21  ;;  %v1386_v32 = vsel %vm1365_vm12, %v5068_v14, %v5067_v57  ;;  %v1370_v52 = vmul.f32 %v1366_v18, %v4103_v9  ;;  %v5070_v7 = vld [vmem:[#allocation48_spill] sm:$0xff]  ;;  %v1325_v31 = vrot.slane %v1321_v44, 7  ;;  %v5073_v33 = vld [vmem:[#allocation89_spill] sm:$0xff]  ;;  %v5076_v14 = vld [vmem:[#allocation34_spill] sm:$0xff] }
 0x27c   : > { %v4090_v54 = vpop.permute.xlu1 %1548  ;;  %v4095_v41 = vpop.permute.xlu0 %1527  ;;  %v1268_v26 = vadd.f32 %v1264_v29, %v1247_v56  ;;  %v4138_v29 = vld [vmem:[%s4651_s0 + $0x38] sm:$0xff]  ;;  %v1338_v10 = vsel %vm1336_vm11, %v3726_v12, %v5071_v2  ;;  %v1355_v21 = vmul.f32 %v1351_v17, %v4119_v55  ;;  %v1390_v44 = vmul.f32 %v1386_v32, %v4119_v55  ;;  %v5074_v12 = vld [vmem:[#allocation70_spill] sm:$0xff] }
 0x27d   : > { %v1328_v43 = vadd.f32 %v1324_v46, %v1308_v45  ;;  %v1367_v46 = vsel %vm1365_vm12, %v5063_v61, %v5072_v40  ;;  %v1352_v45 = vsel %vm1336_vm11, %v5065_v35, %v5073_v33  ;;  %v1407_v1 = vsel %vm1406_vm13, %v3851_v27, %v5074_v12  ;;  %v5075_v24 = vld [vmem:[#allocation93_spill] sm:$0xff]  ;;  %v5077_v27 = vld [vmem:[#allocation104_spill] sm:$0xff] }
 0x27e   : > { %1942 = vrot.lane.b32.xlu1 %v5061_v39, %s2684_s26  ;;  %1921 = vrot.lane.b32.xlu0 %v5062_v42, %s2684_s26  ;;  %v1288_v51 = vadd.f32 %v1284_v48, %v1268_v26  ;;  %v4152_v48 = vld [vmem:[%s4652_s1 + $0x38] sm:$0xff]  ;;  %v1387_v17 = vsel %vm1365_vm12, %v5067_v57, %v5075_v24  ;;  %v1342_v35 = vmul.f32 %v1338_v10, %v4138_v29  ;;  %v1374_v32 = vrot.slane %v1370_v52, 1  ;;  %v5079_v24 = vld [vmem:[#allocation96_spill] sm:$0xff] }
 0x27f   : > { %v1343_v26 = vadd.f32 %v1341_v59, %v1328_v43  ;;  %v1371_v2 = vmul.f32 %v1367_v46, %v4138_v29  ;;  %v1427_v40 = vsel %vm1406_vm13, %v5077_v27, %v3895_v8  ;;  %v1356_v59 = vmul.f32 %v1352_v45, %v4152_v48  ;;  %v5081_v27 = vld [vmem:[#allocation72_spill] sm:$0xff] }
 0x280   : > { %v4114_v23 = vpop.permute.xlu1 %1566  ;;  %v4124_v13 = vpop.permute.xlu0 %1546  ;;  %v1309_v61 = vadd.f32 %v1305_v4, %v1288_v51  ;;  %v5078_v4 = vld [vmem:[#allocation25_spill] sm:$0xff]  ;;  %v1411_v51 = vmul.f32 %v1407_v1, %v4103_v9  ;;  %v1391_v10 = vmul.f32 %v1387_v17, %v4152_v48  ;;  %v1394_v52 = vrot.slane %v1390_v44, 1 }
 0x281   : > { %v1357_v57 = vadd.f32 %v1355_v21, %v1343_v26  ;;  %v1408_v46 = vsel %vm1406_vm13, %v5074_v12, %v5079_v24  ;;  %v5082_v21 = vld [vmem:[#allocation9_spill] sm:$0xff]  ;;  %v5084_v12 = vld [vmem:[#allocation27_spill] sm:$0xff]  ;;  %vm1681_vm5 = vcmask 482304   ;;  %vm1722_vm6 = vcmask 474112  }
 0x282   : > { %1946 = vrot.lane.b32.xlu1 %v5069_v49, %s2684_s26  ;;  %1925 = vrot.lane.b32.xlu0 %v5070_v7, %s2684_s26  ;;  %v1329_v43 = vadd.f32 %v1325_v31, %v1309_v61  ;;  %v1431_v31 = vmul.f32 %v1427_v40, %v4119_v55  ;;  %v1375_v61 = vrot.slane %v1371_v2, 1  ;;  %v5083_v44 = vld [vmem:[#allocation97_spill] sm:$0xff]  ;;  %v1415_v17 = vrot.slane %v1411_v51, 2  ;;  %v5085_v40 = vld [vmem:[#allocation74_spill] sm:$0xff] }
 0x283   : > { %v1378_v1 = vadd.f32 %v1374_v32, %v1357_v57  ;;  %v1428_v26 = vsel %vm1406_vm13, %v3895_v8, %v5083_v44  ;;  %v1412_v24 = vmul.f32 %v1408_v46, %v4138_v29  ;;  %v1468_v49 = vsel %vm1447_vm14, %v5085_v40, %v3986_v0  ;;  %v5086_v46 = vld [vmem:[#allocation11_spill] sm:$0xff] }
 0x284   : > { %v4147_v56 = vpop.permute.xlu1 %1585  ;;  %v4161_v18 = vpop.permute.xlu0 %1564  ;;  %v1344_v45 = vadd.f32 %v1342_v35, %v1329_v43  ;;  %v1395_v32 = vrot.slane %v1391_v10, 1  ;;  %v1432_v8 = vmul.f32 %v1428_v26, %v4152_v48  ;;  %v1435_v57 = vrot.slane %v1431_v31, 2  ;;  %v5087_v10 = vld [vmem:[#allocation28_spill] sm:$0xff] }
 0x285   : > { %v1398_v2 = vadd.f32 %v1394_v52, %v1378_v1  ;;  %v1416_v31 = vrot.slane %v1412_v24, 2  ;;  %v1469_v1 = vsel %vm1447_vm14, %v3986_v0, %v3954_v6  ;;  %v5089_v0 = vld [vmem:[#allocation10_spill] sm:$0xff]  ;;  %vm1763_vm7 = vcmask 392192  }
 0x286   : > { %1964 = vrot.lane.b32.xlu1 %v5076_v14, %s2685_s8  ;;  %1944 = vrot.lane.b32.xlu0 %v5078_v4, %s2684_s26  ;;  %v5080_v14 = vld [vmem:[#allocation63_spill] sm:$0xff]  ;;  %v1358_v35 = vadd.f32 %v1356_v59, %v1344_v45  ;;  %v1472_v59 = vmul.f32 %v1468_v49, %v4119_v55  ;;  %v1436_v40 = vrot.slane %v1432_v8, 2  ;;  %v1473_v8 = vmul.f32 %v1469_v1, %v4152_v48  ;;  %s2694_s26 = smov [#allocation4]  }
 0x287   : > { %v1448_v7 = vsel %vm1447_vm14, %v5081_v27, %v5080_v14  ;;  %v1449_v51 = vsel %vm1447_vm14, %v5080_v14, %v3961_v47  ;;  %v1419_v52 = vadd.f32 %v1415_v17, %v1398_v2  ;;  %v1509_v47 = vsel %vm1488_vm15, %v4004_v3, %v4058_v37  ;;  %v5088_v3 = vld [vmem:[#allocation44_spill] sm:$0xff]  ;;  %s2566_s27 = sshll.u32 %s2694_s26, 4  ;;  %s2567_s27 = int_to_ptr.vmem [resolvable:$false] %s2566_s27 }
 0x288   : > { %v4177_v33 = vpop.permute.xlu1 %1589  ;;  %v4186_v4 = vpop.permute.xlu0 %1568  ;;  %v1452_v27 = vmul.f32 %v1448_v7, %v4103_v9  ;;  %v1489_v7 = vsel %vm1488_vm15, %v4010_v36, %v3980_v30  ;;  %v1379_v44 = vadd.f32 %v1375_v61, %v1358_v35  ;;  %v1453_v36 = vmul.f32 %v1449_v51, %v4138_v29  ;;  %s2568_s28 = scalar_lea.vmem %s2567_s27, 64 }
 0x289   : > { %v1493_v49 = vmul.f32 %v1489_v7, %v4103_v9  ;;  %v1439_v35 = vadd.f32 %v1435_v57, %v1419_v52  ;;  %v1530_v17 = vsel %vm1529_vm1, %v4079_v28, %v4052_v58  ;;  %v1476_v24 = vrot.slane %v1472_v59, 3 }
 0x28a   : > { %1977 = vrot.lane.b32.xlu1 %v5082_v21, %s2685_s8  ;;  %1962 = vrot.lane.b32.xlu0 %v5084_v12, %s2685_s8  ;;  %v1456_v45 = vrot.slane %v1452_v27, 3  ;;  %v1399_v26 = vadd.f32 %v1395_v32, %v1379_v44  ;;  %v1490_v27 = vsel %vm1488_vm15, %v3980_v30, %v4034_v50  ;;  %v1513_v6 = vmul.f32 %v1509_v47, %v4119_v55 }
 0x28b   : > { %v1550_v28 = vsel %vm1529_vm1, %v4076_v15, %v4124_v13  ;;  %v1457_v51 = vrot.slane %v1453_v36, 3  ;;  %v1497_v7 = vrot.slane %v1493_v49, 4  ;;  %v1510_v30 = vsel %vm1488_vm15, %v4058_v37, %v4028_v60  ;;  %v5090_v15 = vld [vmem:[#allocation12_spill] sm:$0xff]  ;;  %v5091_v36 = vld [vmem:[#allocation33_spill] sm:$0xff] }
 0x28c   : > { %v4201_v21 = vpop.permute.xlu1 %1607  ;;  %v4203_v43 = vpop.permute.xlu0 %1587  ;;  %v1420_v32 = vadd.f32 %v1416_v31, %v1399_v26  ;;  %v1460_v2 = vadd.f32 %v1456_v45, %v1439_v35  ;;  %v1534_v50 = vmul.f32 %v1530_v17, %v4103_v9  ;;  %v1494_v52 = vmul.f32 %v1490_v27, %v4138_v29 }
 0x28d   : > { %v1571_v31 = vsel %vm1570_vm2, %v4161_v18, %v4114_v23  ;;  %v1517_v47 = vrot.slane %v1513_v6, 4  ;;  %v1531_v60 = vsel %vm1529_vm1, %v4052_v58, %v4095_v41  ;;  %v1554_v37 = vmul.f32 %v1550_v28, %v4119_v55  ;;  %v5093_v28 = vld [vmem:[#allocation35_spill] sm:$0xff] }
 0x28e   : > { %1981 = vrot.lane.b32.xlu1 %v5086_v46, %s2685_s8  ;;  %1966 = vrot.lane.b32.xlu0 %v5087_v10, %s2685_s8  ;;  %v1440_v59 = vadd.f32 %v1436_v40, %v1420_v32  ;;  %v1480_v45 = vadd.f32 %v1476_v24, %v1460_v2  ;;  %v1477_v1 = vrot.slane %v1473_v8, 3  ;;  %v1514_v49 = vmul.f32 %v1510_v30, %v4152_v48 }
 0x28f   : > { %v1591_v18 = vsel %vm1570_vm2, %v4147_v56, %v4203_v43  ;;  %v1538_v17 = vrot.slane %v1534_v50, 5  ;;  %v1498_v41 = vrot.slane %v1494_v52, 4  ;;  %v1535_v24 = vmul.f32 %v1531_v60, %v4138_v29  ;;  %v5092_v56 = vld [vmem:[#allocation14_spill] sm:$0xff] }
 0x290   : > { %v1627_v14 = vpop.permute.xlu1 %1626  ;;  %v1606_v61 = vpop.permute.xlu0 %1605  ;;  %v1461_v40 = vadd.f32 %v1457_v51, %v1440_v59  ;;  %v1501_v35 = vadd.f32 %v1497_v7, %v1480_v45  ;;  %v1551_v27 = vsel %vm1529_vm1, %v4124_v13, %v4090_v54  ;;  %v1558_v2 = vrot.slane %v1554_v37, 5  ;;  %v5094_v60 = vld [vmem:[#allocation46_spill] sm:$0xff] }
 0x291   : > { %v1612_v6 = vsel %vm1611_vm3, %v1606_v61, %v4201_v21  ;;  %v1595_v8 = vmul.f32 %v1591_v18, %v4119_v55  ;;  %v1518_v7 = vrot.slane %v1514_v49, 4  ;;  %v1572_v30 = vsel %vm1570_vm2, %v4114_v23, %v4186_v4 }
 0x292   : > { %1993 = vrot.lane.b32.xlu1 %v5088_v3, %s2686_s9  ;;  %1979 = vrot.lane.b32.xlu0 %v5089_v0, %s2685_s8  ;;  %v1575_v3 = vmul.f32 %v1571_v31, %v4103_v9  ;;  %v1521_v32 = vadd.f32 %v1517_v47, %v1501_v35  ;;  %v1481_v51 = vadd.f32 %v1477_v1, %v1461_v40  ;;  %v1539_v45 = vrot.slane %v1535_v24, 5 }
 0x293   : > { %v1555_v50 = vmul.f32 %v1551_v27, %v4152_v48  ;;  %v1616_v52 = vmul.f32 %v1612_v6, %v4103_v9  ;;  %v1592_v47 = vsel %vm1570_vm2, %v4203_v43, %v4177_v33  ;;  %v1576_v4 = vmul.f32 %v1572_v30, %v4138_v29  ;;  %v4304_v6 = vld [vmem:[%s4651_s0 + $0x40] sm:$0xff] }
 0x294   : > { %v4240_v57 = vpop.permute.xlu1 %1630  ;;  %v1610_v44 = vpop.permute.xlu0 %1609  ;;  %v1542_v61 = vadd.f32 %v1538_v17, %v1521_v32  ;;  %v1579_v59 = vrot.slane %v1575_v3, 6  ;;  %v1596_v18 = vmul.f32 %v1592_v47, %v4152_v48  ;;  %v5098_v30 = vld [vmem:[#allocation18_spill] sm:$0xff]  ;;  %vm1804_vm8 = vcmask 384000  }
 0x295   : > { %v1613_v1 = vsel %vm1611_vm3, %v4201_v21, %v1610_v44  ;;  %v1559_v33 = vrot.slane %v1555_v50, 5  ;;  %v1620_v40 = vrot.slane %v1616_v52, 7  ;;  %v5097_v44 = vld [vmem:[#allocation36_spill] sm:$0xff]  ;;  %v4324_v52 = vld [vmem:[%s4651_s0 + $0x48] sm:$0xff]  ;;  %vm1845_vm9 = vcmask 375808  }
 0x296   : > { %2012 = vrot.lane.b32.xlu1 %v5090_v15, %s2686_s9  ;;  %1991 = vrot.lane.b32.xlu0 %v5091_v36, %s2686_s9  ;;  %v1502_v15 = vadd.f32 %v1498_v41, %v1481_v51  ;;  %v1562_v23 = vadd.f32 %v1558_v2, %v1542_v61  ;;  %v5095_v36 = vld [vmem:[#allocation13_spill] sm:$0xff]  ;;  %v1580_v41 = vrot.slane %v1576_v4, 6  ;;  %v1617_v27 = vmul.f32 %v1613_v1, %v4138_v29  ;;  %v4312_v29 = vld [vmem:[%s4652_s1 + $0x40] sm:$0xff]  ;;  %v5101_v1 = vld [vmem:[#allocation15_spill] sm:$0xff] }
 0x297   : > { %v1600_v32 = vrot.slane %v1596_v18, 6  ;;  %vm1886_vm10 = vcmask 367616   ;;  %vm1927_vm11 = vcmask 359424   ;;  %vm1968_vm12 = vcmask 351232  }
 0x298   : > { %v4262_v26 = vpop.permute.xlu1 %1648  ;;  %v1629_v58 = vpop.permute.xlu0 %1628  ;;  %v1522_v9 = vadd.f32 %v1518_v7, %v1502_v15  ;;  %v1583_v43 = vadd.f32 %v1579_v59, %v1562_v23  ;;  %v1621_v61 = vrot.slane %v1617_v27, 7  ;;  %v4332_v23 = vld [vmem:[%s4652_s1 + $0x48] sm:$0xff]  ;;  %v5103_v27 = vld [vmem:[#allocation38_spill] sm:$0xff]  ;;  %vm1997_vm13 = vcmask 343040  }
 0x299   : > { %v1632_v54 = vsel %vm1611_vm3, %v1627_v14, %v1629_v58  ;;  %v1599_v14 = vrot.slane %v1595_v8, 6  ;;  %v1633_v3 = vsel %vm1611_vm3, %v1629_v58, %v4240_v57  ;;  %vm2038_vm14 = vcmask 261120  }
 0x29a   : > { %2016 = vrot.lane.b32.xlu1 %v5092_v56, %s2686_s9  ;;  %1995 = vrot.lane.b32.xlu0 %v5093_v28, %s2686_s9  ;;  %v1636_v37 = vmul.f32 %v1632_v54, %v4119_v55  ;;  %v1543_v17 = vadd.f32 %v1539_v45, %v1522_v9  ;;  %v5096_v55 = vld [vmem:[#allocation16_spill] sm:$0xff]  ;;  %v1637_v8 = vmul.f32 %v1633_v3, %v4152_v48  ;;  %v5099_v48 = vld [vmem:[#allocation37_spill] sm:$0xff]  ;;  %vm2079_vm15 = vcmask 252928  }
 0x29b   : > { %v1603_v24 = vadd.f32 %v1599_v14, %v1583_v43  ;;  %v5100_v14 = vld [vmem:[#allocation49_spill] sm:$0xff]  ;;  %v5102_v3 = vld [vmem:[#allocation20_spill] sm:$0xff]  ;;  %vm2120_vm1 = vcmask 244736   ;;  %vm2161_vm2 = vcmask 236544   ;;  %vm2202_vm3 = vcmask 228352  }
 0x29c   : > { %v1662_v13 = vpop.permute.xlu1 %1661  ;;  %v1647_v31 = vpop.permute.xlu0 %1646  ;;  %v1640_v21 = vrot.slane %v1636_v37, 7  ;;  %v1563_v58 = vadd.f32 %v1559_v33, %v1543_v17  ;;  %v1641_v45 = vrot.slane %v1637_v8, 7 }
 0x29d   : > { %v1653_v56 = vsel %vm1652_vm4, %v1647_v31, %v4262_v26  ;;  %v1624_v2 = vadd.f32 %v1620_v40, %v1603_v24 }
 0x29e   : > { %2034 = vrot.lane.b32.xlu1 %v5094_v60, %s2687_s10  ;;  %2014 = vrot.lane.b32.xlu0 %v5095_v36, %s2686_s9  ;;  %v1584_v54 = vadd.f32 %v1580_v41, %v1563_v58  ;;  %v1657_v59 = vmul.f32 %v1653_v56, %v4304_v6  ;;  %s2445_s9 = sshll.u32 %s2632_s15, 5 }
 0x29f   : > { %v1644_v50 = vadd.f32 %v1640_v21, %v1624_v2  ;;  %s4602_s21 = scalar_lea.hbm %s4654_s3, %s2445_s9 }
 0x2a0   : > { %v1666_v49 = vpop.permute.xlu1 %1665  ;;  %v1651_v35 = vpop.permute.xlu0 %1650  ;;  %v1604_v15 = vadd.f32 %v1600_v32, %v1584_v54 }
 0x2a1   : > { %v1659_v36 = vadd.f32 %v1657_v59, %v1644_v50 }
 0x2a2   : > { %2053 = vrot.lane.b32.xlu1 %v5096_v55, %s2687_s10  ;;  %2032 = vrot.lane.b32.xlu0 %v5097_v44, %s2687_s10  ;;  %v1625_v37 = vadd.f32 %v1621_v61, %v1604_v15 }
 0x2a4   : > { %v1678_v57 = vpop.permute.xlu1 %1677  ;;  %v1664_v28 = vpop.permute.xlu0 %1663  ;;  %v1645_v33 = vadd.f32 %v1641_v45, %v1625_v37  ;;  %v5107_v45 = vld [vmem:[#allocation17_spill] sm:$0xff]  ;;  %v5108_v37 = vld [vmem:[#allocation24_spill] sm:$0xff] }
 0x2a5   : > { %v1667_v51 = vsel %vm1652_vm4, %v1662_v13, %v1664_v28  ;;  %v1668_v7 = vsel %vm1652_vm4, %v1664_v28, %v1666_v49  ;;  %v1654_v13 = vsel %vm1652_vm4, %v4262_v26, %v1651_v35  ;;  %vm2243_vm4 = vcmask 220160  }
 0x2a6   : > { %2057 = vrot.lane.b32.xlu1 %v5098_v30, %s2687_s10  ;;  %2036 = vrot.lane.b32.xlu0 %v5099_v48, %s2687_s10  ;;  %v1671_v47 = vmul.f32 %v1667_v51, %v4312_v29  ;;  %v1658_v26 = vmul.f32 %v1654_v13, %v4324_v52  ;;  %v1672_v43 = vmul.f32 %v1668_v7, %v4332_v23  ;;  %v5105_v7 = vld [vmem:[#allocation39_spill] sm:$0xff]  ;;  %v5106_v48 = vld [vmem:[#allocation52_spill] sm:$0xff] }
 0x2a8   : > { %v1697_v31 = vpop.permute.xlu1 %1696  ;;  %v1676_v60 = vpop.permute.xlu0 %1675  ;;  %v1673_v18 = vadd.f32 %v1671_v47, %v1659_v36  ;;  %v1660_v55 = vadd.f32 %v1658_v26, %v1645_v33 }
 0x2a9   : > { %v1682_v4 = vsel %vm1681_vm5, %v1676_v60, %v1678_v57 }
 0x2aa   : > { %2075 = vrot.lane.b32.xlu1 %v5100_v14, %s2688_s29  ;;  %v1686_v9 = vmul.f32 %v1682_v4, %v4304_v6  ;;  %2055 = vrot.lane.b32.xlu0 %v5101_v1, %s2687_s10  ;;  %v1674_v44 = vadd.f32 %v1672_v43, %v1660_v55  ;;  %v5111_v55 = vld [vmem:[#allocation41_spill] sm:$0xff] }
 0x2ac   : > { %v1701_v49 = vpop.permute.xlu1 %1700  ;;  %v1690_v40 = vrot.slane %v1686_v9, 1  ;;  %v1680_v35 = vpop.permute.xlu0 %1679  ;;  %v5109_v9 = vld [vmem:[#allocation40_spill] sm:$0xff] }
 0x2ad   : > { %v1683_v17 = vsel %vm1681_vm5, %v1678_v57, %v1680_v35  ;;  %v5104_v57 = vld [vmem:[#allocation22_spill] sm:$0xff] }
 0x2ae   : > { %2094 = vrot.lane.b32.xlu1 %v5102_v3, %s2688_s29  ;;  %v1694_v41 = vadd.f32 %v1690_v40, %v1673_v18  ;;  %v1687_v24 = vmul.f32 %v1683_v17, %v4324_v52  ;;  %2073 = vrot.lane.b32.xlu0 %v5103_v27, %s2688_s29  ;;  %v5110_v40 = vld [vmem:[#allocation26_spill] sm:$0xff] }
 0x2b0   : > { %v1719_v21 = vpop.permute.xlu1 %1718  ;;  %v1691_v56 = vrot.slane %v1687_v24, 1  ;;  %v1699_v58 = vpop.permute.xlu0 %1698 }
 0x2b1   : > { %v1702_v32 = vsel %vm1681_vm5, %v1697_v31, %v1699_v58  ;;  %v1703_v2 = vsel %vm1681_vm5, %v1699_v58, %v1701_v49  ;;  %vm2284_vm5 = vcmask 211968  }
 0x2b2   : > { %2098 = vrot.lane.b32.xlu1 %v5104_v57, %s2688_s29  ;;  %v1695_v8 = vadd.f32 %v1691_v56, %v1674_v44  ;;  %v1706_v28 = vmul.f32 %v1702_v32, %v4312_v29  ;;  %v1707_v51 = vmul.f32 %v1703_v2, %v4332_v23  ;;  %2077 = vrot.lane.b32.xlu0 %v5105_v7, %s2688_s29  ;;  %v5112_v56 = vld [vmem:[#allocation53_spill] sm:$0xff]  ;;  %v5113_v57 = vld [vmem:[#allocation19_spill] sm:$0xff] }
 0x2b4   : > { %v1738_v30 = vpop.permute.xlu1 %1737  ;;  %v1710_v54 = vrot.slane %v1706_v28, 1  ;;  %v1711_v61 = vrot.slane %v1707_v51, 1  ;;  %v1717_v50 = vpop.permute.xlu0 %1716 }
 0x2b5   : > { %v1723_v59 = vsel %vm1722_vm6, %v1717_v50, %v1719_v21 }
 0x2b6   : > { %2116 = vrot.lane.b32.xlu1 %v5106_v48, %s2689_s30  ;;  %v1714_v13 = vadd.f32 %v1710_v54, %v1694_v41  ;;  %v1715_v31 = vadd.f32 %v1711_v61, %v1695_v8  ;;  %v1727_v15 = vmul.f32 %v1723_v59, %v4304_v6  ;;  %2096 = vrot.lane.b32.xlu0 %v5107_v45, %s2688_s29 }
 0x2b8   : > { %v1742_v47 = vpop.permute.xlu1 %1741  ;;  %v1731_v60 = vrot.slane %v1727_v15, 2  ;;  %v1721_v4 = vpop.permute.xlu0 %1720 }
 0x2b9   : > { %v1724_v14 = vsel %vm1722_vm6, %v1719_v21, %v1721_v4 }
 0x2ba   : > { %2135 = vrot.lane.b32.xlu1 %v5108_v37, %s2689_s30  ;;  %v1735_v36 = vadd.f32 %v1731_v60, %v1714_v13  ;;  %v1728_v26 = vmul.f32 %v1724_v14, %v4324_v52  ;;  %2114 = vrot.lane.b32.xlu0 %v5109_v9, %s2689_s30 }
 0x2bc   : > { %v1760_v1 = vpop.permute.xlu1 %1759  ;;  %v1732_v49 = vrot.slane %v1728_v26, 2  ;;  %v1740_v33 = vpop.permute.xlu0 %1739 }
 0x2bd   : > { %v1743_v43 = vsel %vm1722_vm6, %v1738_v30, %v1740_v33  ;;  %v1744_v18 = vsel %vm1722_vm6, %v1740_v33, %v1742_v47 }
 0x2be   : > { %2139 = vrot.lane.b32.xlu1 %v5110_v40, %s2689_s30  ;;  %v1736_v35 = vadd.f32 %v1732_v49, %v1715_v31  ;;  %v1747_v17 = vmul.f32 %v1743_v43, %v4312_v29  ;;  %v1748_v3 = vmul.f32 %v1744_v18, %v4332_v23  ;;  %2118 = vrot.lane.b32.xlu0 %v5111_v55, %s2689_s30 }
 0x2c0   : > { %v1779_v41 = vpop.permute.xlu1 %1778  ;;  %v1751_v24 = vrot.slane %v1747_v17, 2  ;;  %v1752_v27 = vrot.slane %v1748_v3, 2  ;;  %v1758_v21 = vpop.permute.xlu0 %1757 }
 0x2c1   : > { %v1764_v44 = vsel %vm1763_vm7, %v1758_v21, %v1760_v1 }
 0x2c2   : > { %2157 = vrot.lane.b32.xlu1 %v5112_v56, %s2690_s4  ;;  %v1755_v58 = vadd.f32 %v1751_v24, %v1735_v36  ;;  %v1756_v32 = vadd.f32 %v1752_v27, %v1736_v35  ;;  %v1768_v2 = vmul.f32 %v1764_v44, %v4304_v6  ;;  %2137 = vrot.lane.b32.xlu0 %v5113_v57, %s2689_s30 }
 0x2c4   : > { %v1783_v8 = vpop.permute.xlu1 %1782  ;;  %v1772_v28 = vrot.slane %v1768_v2, 3  ;;  %v1762_v51 = vpop.permute.xlu0 %1761 }
 0x2c5   : > { %v1765_v7 = vsel %vm1763_vm7, %v1760_v1, %v1762_v51 }
 0x2c6   : > { %2176 = vrot.lane.b32.xlu1 %v2892_v19, %s2690_s4  ;;  %v1776_v30 = vadd.f32 %v1772_v28, %v1755_v58  ;;  %v1769_v54 = vmul.f32 %v1765_v7, %v4324_v52  ;;  %2155 = vrot.lane.b32.xlu0 %v2993_v34, %s2690_s4  ;;  %v5114_v28 = vld [vmem:[#allocation32_spill] sm:$0xff] }
 0x2c8   : > { %v1801_v61 = vpop.permute.xlu1 %1800  ;;  %v1773_v50 = vrot.slane %v1769_v54, 3  ;;  %v1781_v59 = vpop.permute.xlu0 %1780 }
 0x2c9   : > { %v1784_v48 = vsel %vm1763_vm7, %v1779_v41, %v1781_v59  ;;  %v1785_v13 = vsel %vm1763_vm7, %v1781_v59, %v1783_v8 }
 0x2ca   : > { %2180 = vrot.lane.b32.xlu1 %v5050_v11, %s2690_s4  ;;  %v1777_v31 = vadd.f32 %v1773_v50, %v1756_v32  ;;  %v1788_v15 = vmul.f32 %v1784_v48, %v4312_v29  ;;  %v1789_v19 = vmul.f32 %v1785_v13, %v4332_v23  ;;  %2159 = vrot.lane.b32.xlu0 %v5052_v16, %s2690_s4  ;;  %v5116_v48 = vld [vmem:[#allocation34_spill] sm:$0xff] }
 0x2cc   : > { %v1820_v34 = vpop.permute.xlu1 %1819  ;;  %v1792_v45 = vrot.slane %v1788_v15, 3  ;;  %v1793_v47 = vrot.slane %v1789_v19, 3  ;;  %v1799_v60 = vpop.permute.xlu0 %1798  ;;  %v5117_v19 = vld [vmem:[#allocation25_spill] sm:$0xff] }
 0x2cd   : > { %v1805_v4 = vsel %vm1804_vm8, %v1799_v60, %v1801_v61 }
 0x2ce   : > { %2198 = vrot.lane.b32.xlu1 %v3072_v53, %s2691_s5  ;;  %v1796_v11 = vadd.f32 %v1792_v45, %v1776_v30  ;;  %v1797_v14 = vadd.f32 %v1793_v47, %v1777_v31  ;;  %v1809_v37 = vmul.f32 %v1805_v4, %v4304_v6  ;;  %2178 = vrot.lane.b32.xlu0 %v5054_v25, %s2690_s4  ;;  %v5115_v30 = vld [vmem:[#allocation48_spill] sm:$0xff]  ;;  %v5118_v4 = vld [vmem:[#allocation9_spill] sm:$0xff] }
 0x2d0   : > { %v1824_v36 = vpop.permute.xlu1 %1823  ;;  %v1813_v16 = vrot.slane %v1809_v37, 4  ;;  %v1803_v26 = vpop.permute.xlu0 %1802 }
 0x2d1   : > { %v1806_v9 = vsel %vm1804_vm8, %v1801_v61, %v1803_v26 }
 0x2d2   : > { %2217 = vrot.lane.b32.xlu1 %v5056_v63, %s2691_s5  ;;  %v1817_v1 = vadd.f32 %v1813_v16, %v1796_v11  ;;  %v1810_v49 = vmul.f32 %v1806_v9, %v4324_v52  ;;  %2196 = vrot.lane.b32.xlu0 %v5057_v20, %s2691_s5 }
 0x2d4   : > { %v1842_v53 = vpop.permute.xlu1 %1841  ;;  %v1814_v33 = vrot.slane %v1810_v49, 4  ;;  %v1822_v43 = vpop.permute.xlu0 %1821 }
 0x2d5   : > { %v1825_v18 = vsel %vm1804_vm8, %v1820_v34, %v1822_v43  ;;  %v1826_v25 = vsel %vm1804_vm8, %v1822_v43, %v1824_v36 }
 0x2d6   : > { %2221 = vrot.lane.b32.xlu1 %v2913_v22, %s2691_s5  ;;  %v1818_v40 = vadd.f32 %v1814_v33, %v1797_v14  ;;  %v1829_v35 = vmul.f32 %v1825_v18, %v4312_v29  ;;  %v1830_v63 = vmul.f32 %v1826_v25, %v4332_v23  ;;  %2200 = vrot.lane.b32.xlu0 %v3014_v38, %s2691_s5 }
 0x2d8   : > { %v1861_v20 = vpop.permute.xlu1 %1860  ;;  %v1833_v17 = vrot.slane %v1829_v35, 4  ;;  %v1834_v3 = vrot.slane %v1830_v63, 4  ;;  %v1840_v55 = vpop.permute.xlu0 %1839 }
 0x2d9   : > { %v1846_v41 = vsel %vm1845_vm9, %v1840_v55, %v1842_v53 }
 0x2da   : > { %2239 = vrot.lane.b32.xlu1 %v5058_v62, %s2692_s6  ;;  %v1837_v22 = vadd.f32 %v1833_v17, %v1817_v1  ;;  %v1838_v24 = vadd.f32 %v1834_v3, %v1818_v40  ;;  %v1850_v27 = vmul.f32 %v1846_v41, %v4304_v6  ;;  %2219 = vrot.lane.b32.xlu0 %v5059_v5, %s2691_s5 }
 0x2dc   : > { %v1865_v21 = vpop.permute.xlu1 %1864  ;;  %v1854_v38 = vrot.slane %v1850_v27, 5  ;;  %v1844_v44 = vpop.permute.xlu0 %1843 }
 0x2dd   : > { %v1847_v56 = vsel %vm1845_vm9, %v1842_v53, %v1844_v44 }
 0x2de   : > { %2258 = vrot.lane.b32.xlu1 %v5061_v39, %s2692_s6  ;;  %v1858_v58 = vadd.f32 %v1854_v38, %v1837_v22  ;;  %v1851_v32 = vmul.f32 %v1847_v56, %v4324_v52  ;;  %2237 = vrot.lane.b32.xlu0 %v5062_v42, %s2692_s6  ;;  %v4469_v56 = vld [vmem:[%s4651_s0 + $0x50] sm:$0xff] }
 0x2e0   : > { %v1883_v62 = vpop.permute.xlu1 %1882  ;;  %v1855_v2 = vrot.slane %v1851_v32, 5  ;;  %v1863_v57 = vpop.permute.xlu0 %1862 }
 0x2e1   : > { %v1866_v8 = vsel %vm1845_vm9, %v1861_v20, %v1863_v57  ;;  %v1867_v5 = vsel %vm1845_vm9, %v1863_v57, %v1865_v21 }
 0x2e2   : > { %2262 = vrot.lane.b32.xlu1 %v5114_v28, %s2692_s6  ;;  %v1859_v51 = vadd.f32 %v1855_v2, %v1838_v24  ;;  %v1870_v7 = vmul.f32 %v1866_v8, %v4312_v29  ;;  %v1871_v39 = vmul.f32 %v1867_v5, %v4332_v23  ;;  %2241 = vrot.lane.b32.xlu0 %v5115_v30, %s2692_s6  ;;  %v4483_v30 = vld [vmem:[%s4652_s1 + $0x50] sm:$0xff] }
 0x2e4   : > { %v1902_v42 = vpop.permute.xlu1 %1901  ;;  %v1874_v54 = vrot.slane %v1870_v7, 5  ;;  %v1875_v61 = vrot.slane %v1871_v39, 5  ;;  %v1881_v50 = vpop.permute.xlu0 %1880 }
 0x2e5   : > { %v1887_v59 = vsel %vm1886_vm10, %v1881_v50, %v1883_v62 }
 0x2e6   : > { %2280 = vrot.lane.b32.xlu1 %v5116_v48, %s2693_s7  ;;  %v1878_v13 = vadd.f32 %v1874_v54, %v1858_v58  ;;  %v1879_v31 = vadd.f32 %v1875_v61, %v1859_v51  ;;  %v1891_v15 = vmul.f32 %v1887_v59, %v4304_v6  ;;  %2260 = vrot.lane.b32.xlu0 %v5117_v19, %s2692_s6 }
 0x2e8   : > { %v1906_v34 = vpop.permute.xlu1 %1905  ;;  %v1895_v45 = vrot.slane %v1891_v15, 6  ;;  %v1885_v47 = vpop.permute.xlu0 %1884 }
 0x2e9   : > { %v1888_v60 = vsel %vm1886_vm10, %v1883_v62, %v1885_v47 }
 0x2ea   : > { %2293 = vrot.lane.b32.xlu1 %v5118_v4, %s2693_s7  ;;  %v1899_v11 = vadd.f32 %v1895_v45, %v1878_v13  ;;  %v1892_v14 = vmul.f32 %v1888_v60, %v4324_v52  ;;  %2278 = vrot.lane.b32.xlu0 %v5084_v12, %s2693_s7 }
 0x2ec   : > { %v1924_v37 = vpop.permute.xlu1 %1923  ;;  %v1896_v36 = vrot.slane %v1892_v14, 6  ;;  %v1904_v16 = vpop.permute.xlu0 %1903 }
 0x2ed   : > { %v1907_v26 = vsel %vm1886_vm10, %v1902_v42, %v1904_v16  ;;  %v1908_v9 = vsel %vm1886_vm10, %v1904_v16, %v1906_v34  ;;  %v4488_v42 = vld [vmem:[%s4652_s1 + $0x58] sm:$0xff] }
 0x2ee   : > { %2297 = vrot.lane.b32.xlu1 %v5086_v46, %s2693_s7  ;;  %v1900_v1 = vadd.f32 %v1896_v36, %v1879_v31  ;;  %v1911_v49 = vmul.f32 %v1907_v26, %v4312_v29  ;;  %v1912_v53 = vmul.f32 %v1908_v9, %v4332_v23  ;;  %2282 = vrot.lane.b32.xlu0 %v5087_v10, %s2693_s7 }
 0x2f0   : > { %v1943_v12 = vpop.permute.xlu1 %1942  ;;  %v1915_v33 = vrot.slane %v1911_v49, 6  ;;  %v1916_v43 = vrot.slane %v1912_v53, 6  ;;  %v1922_v18 = vpop.permute.xlu0 %1921 }
 0x2f1   : > { %v1928_v25 = vsel %vm1927_vm11, %v1922_v18, %v1924_v37 }
 0x2f2   : > { %v1919_v40 = vadd.f32 %v1915_v33, %v1899_v11  ;;  %v1920_v35 = vadd.f32 %v1916_v43, %v1900_v1  ;;  %v1932_v63 = vmul.f32 %v1928_v25, %v4304_v6  ;;  %2295 = vrot.lane.b32.xlu0 %v5089_v0, %s2693_s7  ;;  %s183_s7 = sand.u32 1, %s2624_s13  }
 0x2f3   : > { %s2434_s8 = sshll.u32 %s183_s7, 1  ;;  %s2339_s15 = scalar_lea.sflag [#allocation5], %s183_s7 }
 0x2f4   : > { %v1947_v46 = vpop.permute.xlu1 %1946  ;;  %v1936_v20 = vrot.slane %v1932_v63, 7  ;;  %v1926_v17 = vpop.permute.xlu0 %1925  ;;  %s185_s10 = scalar_lea.vmem [#allocation4], %s2434_s8 }
 0x2f5   : > { %v1929_v3 = vsel %vm1927_vm11, %v1924_v37, %v1926_v17  ;;  %s2353_s11 = sshll.u32 %s185_s10, 4  ;;  %s4604_s11 = int_to_ptr.vmem [resolvable:$true] %s2353_s11 }
 0x2f6   : > { %v1940_v10 = vadd.f32 %v1936_v20, %v1919_v40  ;;  %v1933_v55 = vmul.f32 %v1929_v3, %v4324_v52  ;;  %s2562_s23 = scalar_lea.vmem %s4604_s11, 32  ;;  %p2569_p1 = scmp.lt.s32.totalorder %s4604_s11, %s2567_s27 }
 0x2f7   : > { %p2563_p12 = scmp.ne.s32.totalorder %s4604_s11, %s2562_s23  ;;  %p2570_p2 = scmp.lt.s32.totalorder %s2568_s28, %s2562_s23 }
 0x2f8   : > { %v1965_v41 = vpop.permute.xlu1 %1964  ;;  %v1937_v22 = vrot.slane %v1933_v55, 7  ;;  %v1945_v24 = vpop.permute.xlu0 %1944 }
 0x2f9   : > { %v1948_v27 = vsel %vm1927_vm11, %v1943_v12, %v1945_v24  ;;  %v1949_v21 = vsel %vm1927_vm11, %v1945_v24, %v1947_v46  ;;  %p2564_p13 = pnand %p2563_p12, %p2755_p4  ;;  %p2571_p3 = por %p2570_p2, %p2569_p1 }
 0x2fa   : > { %v1941_v38 = vadd.f32 %v1937_v22, %v1920_v35  ;;  %v1952_v6 = vmul.f32 %v1948_v27, %v4312_v29  ;;  %v1953_v0 = vmul.f32 %v1949_v21, %v4332_v23  ;;  %v4476_v29 = vld [vmem:[%s4651_s0 + $0x58] sm:$0xff] }
 0x2fb   : > { %p2565_p0 = pneg %p2564_p13 }
 0x2fc   : > { %v1978_v44 = vpop.permute.xlu1 %1977  ;;  %v1956_v52 = vrot.slane %v1952_v6, 7  ;;  %v1957_v58 = vrot.slane %v1953_v0, 7  ;;  %v1963_v32 = vpop.permute.xlu0 %1962 }
 0x2fd   : > { %v1969_v62 = vsel %vm1968_vm12, %v1963_v32, %v1965_v41  ;;  %p2572_p5 = pnand %p2571_p3, %p2565_p0 }
 0x2fe   : > { %v1960_v2 = vadd.f32 %v1956_v52, %v1940_v10  ;;  %v1961_v57 = vadd.f32 %v1957_v58, %v1941_v38  ;;  %v1973_v8 = vmul.f32 %v1969_v62, %v4469_v56 }
 0x300   : > { %v1982_v5 = vpop.permute.xlu1 %1981  ;;  %v1975_v23 = vadd.f32 %v1973_v8, %v1960_v2  ;;  %v1967_v28 = vpop.permute.xlu0 %1966 }
 0x301   : > { %v1970_v51 = vsel %vm1968_vm12, %v1965_v41, %v1967_v28 }
 0x302   : > { %v1974_v7 = vmul.f32 %v1970_v51, %v4476_v29 }
 0x304   : > { %v1994_v39 = vpop.permute.xlu1 %1993  ;;  %v1976_v54 = vadd.f32 %v1974_v7, %v1961_v57  ;;  %v1980_v61 = vpop.permute.xlu0 %1979 }
 0x305   : > { %v1983_v50 = vsel %vm1968_vm12, %v1978_v44, %v1980_v61  ;;  %v1984_v59 = vsel %vm1968_vm12, %v1980_v61, %v1982_v5 }
 0x306   : > { %v1987_v48 = vmul.f32 %v1983_v50, %v4483_v30  ;;  %v1988_v13 = vmul.f32 %v1984_v59, %v4488_v42 }
 0x308   : > { %v2013_v31 = vpop.permute.xlu1 %2012  ;;  %v1989_v15 = vadd.f32 %v1987_v48, %v1975_v23  ;;  %v4494_v19 = vadd.f32 %v1988_v13, %v1976_v54  ;;  %v1992_v34 = vpop.permute.xlu0 %1991 }
 0x309   : > { %v1998_v20 = vsel %vm1997_vm13, %v1992_v34, %v1994_v39 }
 0x30a   : > { %v2002_v3 = vmul.f32 %v1998_v20, %v4469_v56 }
 0x30c   : > { %v2017_v45 = vpop.permute.xlu1 %2016  ;;  %v1996_v47 = vpop.permute.xlu0 %1995  ;;  %v2006_v6 = vrot.slane %v2002_v3, 1 }
 0x30d   : > { %v1999_v10 = vsel %vm1997_vm13, %v1994_v39, %v1996_v47 }
 0x30e   : > { %v2003_v21 = vmul.f32 %v1999_v10, %v4476_v29  ;;  %v2010_v23 = vadd.f32 %v2006_v6, %v1989_v15 }
 0x310   : > { %v2035_v60 = vpop.permute.xlu1 %2034  ;;  %v2015_v4 = vpop.permute.xlu0 %2014  ;;  %v2007_v57 = vrot.slane %v2003_v21, 1 }
 0x311   : > { %v2018_v55 = vsel %vm1997_vm13, %v2013_v31, %v2015_v4  ;;  %v2019_v24 = vsel %vm1997_vm13, %v2015_v4, %v2017_v45 }
 0x312   : > { %v2022_v38 = vmul.f32 %v2018_v55, %v4483_v30  ;;  %v2023_v44 = vmul.f32 %v2019_v24, %v4488_v42  ;;  %v2011_v31 = vadd.f32 %v2007_v57, %v4494_v19 }
 0x314   : > { %v2054_v11 = vpop.permute.xlu1 %2053  ;;  %v2033_v14 = vpop.permute.xlu0 %2032  ;;  %v2026_v8 = vrot.slane %v2022_v38, 1  ;;  %v2027_v39 = vrot.slane %v2023_v44, 1 }
 0x315   : > { %v2039_v27 = vsel %vm2038_vm14, %v2033_v14, %v2035_v60 }
 0x316   : > { %v2043_v52 = vmul.f32 %v2039_v27, %v4469_v56  ;;  %v2030_v15 = vadd.f32 %v2026_v8, %v2010_v23  ;;  %v2031_v14 = vadd.f32 %v2027_v39, %v2011_v31 }
 0x318   : > { %v2058_v37 = vpop.permute.xlu1 %2057  ;;  %v2037_v36 = vpop.permute.xlu0 %2036  ;;  %v2047_v54 = vrot.slane %v2043_v52, 2 }
 0x319   : > { %v2040_v58 = vsel %vm2038_vm14, %v2035_v60, %v2037_v36 }
 0x31a   : > { %v2044_v28 = vmul.f32 %v2040_v58, %v4476_v29 }
 0x31c   : > { %v2076_v16 = vpop.permute.xlu1 %2075  ;;  %v2056_v26 = vpop.permute.xlu0 %2055  ;;  %v2048_v45 = vrot.slane %v2044_v28, 2 }
 0x31d   : > { %v2059_v32 = vsel %vm2038_vm14, %v2054_v11, %v2056_v26  ;;  %v2060_v2 = vsel %vm2038_vm14, %v2056_v26, %v2058_v37  ;;  %v2051_v37 = vadd.f32 %v2047_v54, %v2030_v15 }
 0x31e   : > { %v2063_v51 = vmul.f32 %v2059_v32, %v4483_v30  ;;  %v2064_v61 = vmul.f32 %v2060_v2, %v4488_v42 }
 0x320   : > { %v2095_v9 = vpop.permute.xlu1 %2094  ;;  %v2074_v1 = vpop.permute.xlu0 %2073  ;;  %v2067_v47 = vrot.slane %v2063_v51, 2  ;;  %v2068_v36 = vrot.slane %v2064_v61, 2 }
 0x321   : > { %v2080_v5 = vsel %vm2079_vm15, %v2074_v1, %v2076_v16 }
 0x322   : > { %v2084_v48 = vmul.f32 %v2080_v5, %v4469_v56  ;;  %v2071_v20 = vadd.f32 %v2067_v47, %v2051_v37 }
 0x324   : > { %v2099_v49 = vpop.permute.xlu1 %2098  ;;  %v2078_v53 = vpop.permute.xlu0 %2077 }
 0x325   : > { %v2081_v50 = vsel %vm2079_vm15, %v2076_v16, %v2078_v53 }
 0x326   : > { %v2085_v60 = vmul.f32 %v2081_v50, %v4476_v29 }
 0x328   : > { %v4496_v12 = vpop.permute.xlu1 %2116  ;;  %v2097_v33 = vpop.permute.xlu0 %2096 }
 0x329   : > { %v2100_v13 = vsel %vm2079_vm15, %v2095_v9, %v2097_v33  ;;  %v2101_v34 = vsel %vm2079_vm15, %v2097_v33, %v2099_v49  ;;  %v2088_v9 = vrot.slane %v2084_v48, 3  ;;  %v2052_v33 = vadd.f32 %v2048_v45, %v2031_v14 }
 0x32a   : > { %v2104_v16 = vmul.f32 %v2100_v13, %v4483_v30  ;;  %v2105_v19 = vmul.f32 %v2101_v34, %v4488_v42 }
 0x32b   : > { %v2092_v21 = vadd.f32 %v2088_v9, %v2071_v20 }
 0x32c   : > { %v2136_v43 = vpop.permute.xlu1 %2135  ;;  %v2115_v18 = vpop.permute.xlu0 %2114  ;;  %v2108_v55 = vrot.slane %v2104_v16, 3  ;;  %v2109_v38 = vrot.slane %v2105_v19, 3 }
 0x32d   : > { %v2121_v4 = vsel %vm2120_vm1, %v2115_v18, %v4496_v12  ;;  %v2089_v18 = vrot.slane %v2085_v60, 3 }
 0x32e   : > { %v2125_v53 = vmul.f32 %v2121_v4, %v4469_v56 }
 0x330   : > { %v4498_v25 = vpop.permute.xlu1 %2139  ;;  %v2119_v40 = vpop.permute.xlu0 %2118  ;;  %v2129_v6 = vrot.slane %v2125_v53, 4 }
 0x331   : > { %v2122_v1 = vsel %vm2120_vm1, %v4496_v12, %v2119_v40 }
 0x332   : > { %v2126_v24 = vmul.f32 %v2122_v1, %v4476_v29 }
 0x334   : > { %v4500_v35 = vpop.permute.xlu1 %2157  ;;  %v2138_v63 = vpop.permute.xlu0 %2137  ;;  %v2130_v2 = vrot.slane %v2126_v24, 4 }
 0x335   : > { %v2141_v49 = vsel %vm2120_vm1, %v2136_v43, %v2138_v63  ;;  %v2142_v3 = vsel %vm2120_vm1, %v2138_v63, %v4498_v25  ;;  %v2072_v43 = vadd.f32 %v2068_v36, %v2052_v33 }
 0x336   : > { %v2145_v27 = vmul.f32 %v2141_v49, %v4483_v30  ;;  %v2146_v44 = vmul.f32 %v2142_v3, %v4488_v42 }
 0x337   : > { %v2093_v52 = vadd.f32 %v2089_v18, %v2072_v43 }
 0x338   : > { %v4502_v46 = vpop.permute.xlu1 %2176  ;;  %v4504_v17 = vpop.permute.xlu0 %2155  ;;  %v2149_v57 = vrot.slane %v2145_v27, 4  ;;  %v2150_v51 = vrot.slane %v2146_v44, 4 }
 0x339   : > { %v2162_v12 = vsel %vm2161_vm2, %v4504_v17, %v4500_v35  ;;  %v2112_v17 = vadd.f32 %v2108_v55, %v2092_v21 }
 0x33a   : > { %v2166_v58 = vmul.f32 %v2162_v12, %v4469_v56 }
 0x33c   : > { %v4507_v41 = vpop.permute.xlu1 %2180  ;;  %v4509_v22 = vpop.permute.xlu0 %2159  ;;  %v2170_v39 = vrot.slane %v2166_v58, 5 }
 0x33d   : > { %v2163_v25 = vsel %vm2161_vm2, %v4500_v35, %v4509_v22  ;;  %v2113_v22 = vadd.f32 %v2109_v38, %v2093_v52 }
 0x33e   : > { %v2167_v23 = vmul.f32 %v2163_v25, %v4476_v29 }
 0x33f   : > { %v2134_v50 = vadd.f32 %v2130_v2, %v2113_v22 }
 0x340   : > { %v4514_v0 = vpop.permute.xlu1 %2198  ;;  %v2179_v62 = vpop.permute.xlu0 %2178 }
 0x341   : > { %v2182_v63 = vsel %vm2161_vm2, %v4502_v46, %v2179_v62  ;;  %v2183_v8 = vsel %vm2161_vm2, %v2179_v62, %v4507_v41  ;;  %v2133_v46 = vadd.f32 %v2129_v6, %v2112_v17  ;;  %v302_v6 = vld [vmem:[%s4651_s0 + $0x60] sm:$0x1] }
 0x342   : > { %v2186_v28 = vmul.f32 %v2182_v63, %v4483_v30  ;;  %v2187_v54 = vmul.f32 %v2183_v8, %v4488_v42  ;;  %v317_v8 = vld [vmem:[%s4652_s1 + $0x68] sm:$0x1] }
 0x343   : > { %v2153_v48 = vadd.f32 %v2149_v57, %v2133_v46  ;;  %v316_v57 = vld [vmem:[%s4652_s1 + $0x60] sm:$0x1] }
 0x344   : > { %v4524_v7 = vpop.permute.xlu1 %2217  ;;  %v2197_v59 = vpop.permute.xlu0 %2196  ;;  %v2190_v15 = vrot.slane %v2186_v28, 5  ;;  %v2191_v14 = vrot.slane %v2187_v54, 5 }
 0x345   : > { %v2203_v35 = vsel %vm2202_vm3, %v2197_v59, %v4514_v0  ;;  %v2171_v59 = vrot.slane %v2167_v23, 5  ;;  %v2174_v4 = vadd.f32 %v2170_v39, %v2153_v48 }
 0x346   : > { %v2207_v13 = vmul.f32 %v2203_v35, %v4469_v56 }
 0x348   : > { %v2222_v11 = vpop.permute.xlu1 %2221  ;;  %v2201_v26 = vpop.permute.xlu0 %2200  ;;  %v2211_v37 = vrot.slane %v2207_v13, 6 }
 0x349   : > { %v2204_v61 = vsel %vm2202_vm3, %v4514_v0, %v2201_v26  ;;  %v2154_v0 = vadd.f32 %v2150_v51, %v2134_v50 }
 0x34a   : > { %v2208_v47 = vmul.f32 %v2204_v61, %v4476_v29 }
 0x34b   : > { %v2175_v19 = vadd.f32 %v2171_v59, %v2154_v0 }
 0x34c   : > { %v2240_v10 = vpop.permute.xlu1 %2239  ;;  %v2220_v40 = vpop.permute.xlu0 %2219  ;;  %v2212_v53 = vrot.slane %v2208_v47, 6  ;;  %v5119_v47 = vld [vmem:[#allocation8_spill] sm:$0xff] }
 0x34d   : > { %v2223_v41 = vsel %vm2202_vm3, %v4524_v7, %v2220_v40  ;;  %v2224_v34 = vsel %vm2202_vm3, %v2220_v40, %v2222_v11  ;;  %v2194_v11 = vadd.f32 %v2190_v15, %v2174_v4  ;;  %v2195_v3 = vadd.f32 %v2191_v14, %v2175_v19 }
 0x34e   : > { %v2227_v60 = vmul.f32 %v2223_v41, %v4483_v30  ;;  %v2228_v36 = vmul.f32 %v2224_v34, %v4488_v42 }
 0x34f   : > { %v2216_v12 = vadd.f32 %v2212_v53, %v2195_v3 }
 0x350   : > { %v2259_v32 = vpop.permute.xlu1 %2258  ;;  %v2238_v5 = vpop.permute.xlu0 %2237  ;;  %v2231_v33 = vrot.slane %v2227_v60, 6  ;;  %v2232_v55 = vrot.slane %v2228_v36, 6 }
 0x351   : > { %v2244_v45 = vsel %vm2243_vm4, %v2238_v5, %v2240_v10 }
 0x352   : > { %v2248_v16 = vmul.f32 %v2244_v45, %v4469_v56  ;;  %v2236_v44 = vadd.f32 %v2232_v55, %v2216_v12 }
 0x354   : > { %v2263_v62 = vpop.permute.xlu1 %2262  ;;  %v2242_v31 = vpop.permute.xlu0 %2241  ;;  %v2252_v24 = vrot.slane %v2248_v16, 7 }
 0x355   : > { %v2245_v7 = vsel %vm2243_vm4, %v2240_v10, %v2242_v31  ;;  %v2215_v10 = vadd.f32 %v2211_v37, %v2194_v11 }
 0x356   : > { %v2249_v20 = vmul.f32 %v2245_v7, %v4476_v29 }
 0x357   : > { %v2235_v40 = vadd.f32 %v2231_v33, %v2215_v10 }
 0x358   : > { %v2281_v26 = vpop.permute.xlu1 %2280  ;;  %v2261_v9 = vpop.permute.xlu0 %2260  ;;  %v2253_v43 = vrot.slane %v2249_v20, 7 }
 0x359   : > { %v2264_v1 = vsel %vm2243_vm4, %v2259_v32, %v2261_v9  ;;  %v2265_v49 = vsel %vm2243_vm4, %v2261_v9, %v2263_v62  ;;  %v2256_v25 = vadd.f32 %v2252_v24, %v2235_v40 }
 0x35a   : > { %v2268_v18 = vmul.f32 %v2264_v1, %v4483_v30  ;;  %v2269_v56 = vmul.f32 %v2265_v49, %v4488_v42  ;;  %v303_v30 = vld [vmem:[%s4651_s0 + $0x68] sm:$0x1]  ;;  %v2257_v58 = vadd.f32 %v2253_v43, %v2236_v44 }
 0x35c   : > { %v2279_v27 = vpop.permute.xlu0 %2278  ;;  %v2272_v21 = vrot.slane %v2268_v18, 7  ;;  %v2294_v38 = vpop.permute.xlu1 %2293  ;;  %v2273_v63 = vrot.slane %v2269_v56, 7 }
 0x35d   : > { %v2285_v29 = vsel %vm2284_vm5, %v2279_v27, %v2281_v26 }
 0x35e   : > { %v2276_v32 = vadd.f32 %v2272_v21, %v2256_v25  ;;  %v2289_v17 = vmul.f32 %v2285_v29, %v302_v6  ;;  %v2277_v5 = vadd.f32 %v2273_v63, %v2257_v58 }
 0x360   : > { %v2283_v42 = vpop.permute.xlu0 %2282  ;;  %v2298_v23 = vpop.permute.xlu1 %2297  ;;  %v2291_v46 = vadd.f32 %v2289_v17, %v2276_v32 }
 0x361   : > { %v2286_v52 = vsel %vm2284_vm5, %v2281_v26, %v2283_v42 }
 0x362   : > { %v2290_v2 = vmul.f32 %v2286_v52, %v303_v30 }
 0x364   : > { %v2296_v28 = vpop.permute.xlu0 %2295  ;;  %v2292_v51 = vadd.f32 %v2290_v2, %v2277_v5 }
 0x365   : > { %v2299_v35 = vsel %vm2284_vm5, %v2294_v38, %v2296_v28  ;;  %v2300_v22 = vsel %vm2284_vm5, %v2296_v28, %v2298_v23 }
 0x366   : > { %v2303_v39 = vmul.f32 %v2299_v35, %v316_v57  ;;  %v2304_v54 = vmul.f32 %v2300_v22, %v317_v8 }
 0x368   : > { %v2305_v61 = vadd.f32 %v2303_v39, %v2291_v46  ;;  %v2306_v41 = vadd.f32 %v2304_v54, %v2292_v51 }
 0x36a   : > { %v2437_v62 = vmul.f32 -1.442695, %v2305_v61  ;;  %v2438_v50 = vmul.f32 -1.442695, %v2306_v41 }
 0x36c   : > { %2554 = vpow2.f32 %v2437_v62 }
 0x36d   : > { %2556 = vpow2.f32 %v2438_v50 }
 0x376   : > { %v2555_v48 = vpop.eup %2554 }
 0x377   : > { %v2557_v13 = vpop.eup %2556  ;;  %v2313_v31 = vadd.f32 1.0, %v2555_v48 }
 0x378   : > { %v2314_v59 = vadd.f32 1.0, %v2557_v13 }
 0x379   : > { %2558 = vrcp.f32 %v2313_v31 }
 0x37a   : > { %2560 = vrcp.f32 %v2314_v59 }
 0x383   : > { %v2559_v15 = vpop.eup %2558 }
 0x384   : > { %v2561_v34 = vpop.eup %2560 }
 0x385   : > { %v2321_v45 = vcombine.low %v2559_v15, %v2561_v34 }
 0x387   : > { %v2328_v60 = vrot.slane %v2321_v45, %v5119_v47 }
 0x389   : > { %v2335_v0 = vrot.slane %v2328_v60, %v5119_v47 }
 0x38b   : > { %2337 = vst.msk [vmem:[%s185_s10] sm:$0x3] %vm2772_vm0, %v2335_v0 }
 0x38c   : > { %2575 = shalt.err (!%p2572_p5)
}
 0x38d   : > { %s2576_s29 = scalar_lea.hbm %s4602_s21, 32  ;;  %s2580_s5 = scalar_lea.hbm %s4654_s3, 64 }
 0x38e   : > { %p2577_p6 = scmp.ne.s32.totalorder %s4602_s21, %s2576_s29  ;;  %p2581_p10 = scmp.lt.u32.totalorder %s4602_s21, %s4654_s3 }
 0x38f   : > { %p2582_p11 = scmp.lt.u32.totalorder %s2580_s5, %s2576_s29  ;;  %p2584_p13 = scmp.lt.u32.totalorder %s2576_s29, %s4602_s21 }
 0x390   : > { %p2578_p7 = pnand %p2577_p6, %p2755_p4 }
 0x391   : > { %p2583_p12 = por %p2582_p11, %p2581_p10 }
 0x392   : > { %p2579_p9 = pneg %p2578_p7 }
 0x393   : > { %p2585_p0 = por %p2584_p13, %p2583_p12 }
 0x395   : > { %p2586_p1 = pnand %p2585_p0, %p2579_p9 }
 0x397   : > { %2589 = shalt.err (!%p2586_p1)
}
 0x398   : > { %2446 = dma.vmem_to_hbm [thread:$0]  (%p2755_p4), %s4604_s11, 32, %s4602_s21, %s2339_s15  }
 0x399 PF: > { %p2452_p2 = scmp.ge.s32.totalorder %s2640_s17, 2  ;;  %s2365_s8 = sand.u32 1, %s2620_s12  }
 0x39a   : > { %s2366_s9 = scalar_lea.sflag [#allocation5], %s2365_s8 }
 0x39b   : > { %p2449_p3 = pnand %p2452_p2, %p2762_p8 }
 0x39d   : > { %2615 = dma.done.wait (!%p2449_p3), %s2366_s9, 32  }
 0x39e   : > { %2617 = vsyncadd (!%p2449_p3), %s2366_s9, 4294967264  ;;  %s16_s17 = sadd.s32 1, %s2640_s17   ;;  %s5121_s12 = smov %s2624_s13 }
 0x39f   : > { %p13_p5 = scmp.ge.s32.totalorder %s16_s17, 4   ;;  %s5122_s13 = smov %s2628_s14 }
 0x3a0   : > { %s5123_s14 = smov %s2768_s25  ;;  %s5124_s15 = smov %s2636_s16 }
 0x3a1   : > { %s5125_s16 = smov %s5127_s20  ;;  %15 = sbr.rel (!%p13_p5) target bundleno = 4 (0x4), region = 75 }
 0x3a8   :  { %2371 = vsyncpa [#allocation5], 1 }
 0x3a9   :  { %2373 = vsyncpa [#allocation5 + $0x1], 1 }

</bundles_post_ra>
